<compile_context>
chip_gen: v6e
topology: v6e:2x2x1
jax: 0.10.0
libtpu: 0.0.40
codegen_flags: <defaults>
</compile_context>

<pallas_src>
import functools
import math

import jax
import jax.numpy as jnp
import numpy as np
from jax.experimental import pallas as pl
from jax.experimental.pallas import tpu as pltpu


# ------------------------------ in-kernel helpers ----------------------------


def _norm(x, alpha, bias, eps):
    # torch-style Norm: alpha * (x - mean) / (std_unbiased + eps) + bias
    d = x.shape[-1]
    mean = jnp.mean(x, axis=-1, keepdims=True)
    xc = x - mean
    var = jnp.sum(xc * xc, axis=-1, keepdims=True) * (1.0 / (d - 1))  # torch.std (ddof=1)
    inv = pl.reciprocal(jnp.sqrt(var) + eps, approx=True)
    return alpha * xc * inv + bias


def _mha(q_in, kv_in, bias, wq, bq, wk, bk, wv, bv, wo, bo, *, B, Tq, Tk, H, dk):
    D = H * dk
    # Full-width projections on the flattened (batch*seq, D) activations.
    # 1/sqrt(dk) is already folded into wq/bq (done once at param-stacking time).
    q = jnp.dot(q_in, wq, preferred_element_type=jnp.float32) + bq   # (B*Tq, D)
    k = jnp.dot(kv_in, wk, preferred_element_type=jnp.float32) + bk  # (B*Tk, D)
    v = jnp.dot(kv_in, wv, preferred_element_type=jnp.float32) + bv  # (B*Tk, D)

    q3 = q.reshape(B, Tq, D)
    k3 = k.reshape(B, Tk, D)
    v3 = v.reshape(B, Tk, D)

    # Merge heads into the leading batch dim: (H*B, T, dk).  One batched einsum then
    # handles scores / softmax / context for all heads at once (no per-head matmuls).
    qs = jnp.concatenate([q3[:, :, h * dk:(h + 1) * dk] for h in range(H)], axis=0)
    ks = jnp.concatenate([k3[:, :, h * dk:(h + 1) * dk] for h in range(H)], axis=0)
    vs = jnp.concatenate([v3[:, :, h * dk:(h + 1) * dk] for h in range(H)], axis=0)

    s = jnp.einsum("bqd,bkd->bqk", qs, ks, preferred_element_type=jnp.float32)
    s = s + bias                                   # additive mask bias (precomputed)
    s = s - jnp.max(s, axis=-1, keepdims=True)     # stable softmax
    p = jnp.exp(s)
    p = p * pl.reciprocal(jnp.sum(p, axis=-1, keepdims=True), approx=True)

    ctx = jnp.einsum("bqk,bkd->bqd", p, vs, preferred_element_type=jnp.float32)  # (H*B, Tq, dk)

    # Output projection: one batched einsum over heads + reduce over heads
    # (mathematically identical to concat-heads-then-(B*T,D)@(D,D)).
    ctx = ctx.reshape(H, B * Tq, dk)               # (H, B*Tq, dk)
    wo3 = wo.reshape(H, dk, D)                     # (H, dk, D)
    out_h = jnp.einsum("hrd,hde->hre", ctx, wo3, preferred_element_type=jnp.float32)
    return jnp.sum(out_h, axis=0) + bo             # (B*Tq, D)


# ---------------------------------- kernel -----------------------------------


def decoder_kernel(x0_ref, e_ref, tbias_ref, sbias_ref,
                   n1a_ref, n1b_ref, n2a_ref, n2b_ref, n3a_ref, n3b_ref,
                   wq1_ref, bq1_ref, wk1_ref, bk1_ref, wv1_ref, bv1_ref, wo1_ref, bo1_ref,
                   wq2_ref, bq2_ref, wk2_ref, bk2_ref, wv2_ref, bv2_ref, wo2_ref, bo2_ref,
                   w1_ref, b1_ref, w2_ref, b2_ref,
                   nfa_ref, nfb_ref,
                   o_ref, x_scr,
                   *, B, Tq, S, H, dk, eps):
    # Residual stream persists in VMEM scratch across layer (grid) steps.
    @pl.when(pl.program_id(0) == 0)
    def _():
        x_scr[...] = x0_ref[...].astype(jnp.float32)

    x = x_scr[...]

    # sublayer 1: Norm -> masked self-attention -> residual   (dropout = identity)
    x2 = _norm(x, n1a_ref[0], n1b_ref[0], eps)
    x = x + _mha(x2, x2, tbias_ref[...],
                 wq1_ref[0], bq1_ref[0], wk1_ref[0], bk1_ref[0],
                 wv1_ref[0], bv1_ref[0], wo1_ref[0], bo1_ref[0],
                 B=B, Tq=Tq, Tk=Tq, H=H, dk=dk)

    # sublayer 2: Norm -> cross-attention over encoder outputs -> residual
    x2 = _norm(x, n2a_ref[0], n2b_ref[0], eps)
    x = x + _mha(x2, e_ref[...], sbias_ref[...],
                 wq2_ref[0], bq2_ref[0], wk2_ref[0], bk2_ref[0],
                 wv2_ref[0], bv2_ref[0], wo2_ref[0], bo2_ref[0],
                 B=B, Tq=Tq, Tk=S, H=H, dk=dk)

    # sublayer 3: Norm -> FeedForward (Linear-ReLU-Linear) -> residual
    x2 = _norm(x, n3a_ref[0], n3b_ref[0], eps)
    h = jnp.maximum(
        jnp.dot(x2, w1_ref[0], preferred_element_type=jnp.float32) + b1_ref[0], 0.0)
    x = x + jnp.dot(h, w2_ref[0], preferred_element_type=jnp.float32) + b2_ref[0]

    x_scr[...] = x
    # Final Norm.  The output BlockSpec is layer-invariant, so the block stays resident
    # in VMEM and only the last revision is written back to HBM.
    o_ref[...] = _norm(x, nfa_ref[...], nfb_ref[...], eps).astype(o_ref.dtype)


# --------------------------- parameter construction ---------------------------


LAYER_PARAM_KEYS = [
    "n1_a", "n1_b", "n2_a", "n2_b", "n3_a", "n3_b",
    "wq1", "bq1", "wk1", "bk1", "wv1", "bv1", "wo1", "bo1",
    "wq2", "bq2", "wk2", "bk2", "wv2", "bv2", "wo2", "bo2",
    "w1", "b1", "w2", "b2",
]


def make_positional_encoding(max_seq_len, d_model):
    pe = np.zeros((max_seq_len, d_model), np.float32)
    for pos in range(max_seq_len):
        for i in range(0, d_model, 2):
            pe[pos, i] = math.sin(pos / 10000 ** (2 * i / d_model))
            pe[pos, i + 1] = math.cos(pos / 10000 ** (2 * (i + 1) / d_model))
    return jnp.asarray(pe)[None, :, :]  # (1, max_seq_len, d_model)


def init_params(key, vocab_size, d_model, N, heads, d_ff, max_seq_len):
    def dense(k, fan_in, fan_out):
        kw, kb = jax.random.split(k)
        w = jax.random.normal(kw, (fan_in, fan_out), jnp.float32) * 0.05
        b = jax.random.normal(kb, (1, fan_out), jnp.float32) * 0.05
        return w, b

    keys = jax.random.split(key, 2 + N)
    params = {
        "embed": jax.random.normal(keys[0], (vocab_size, d_model), jnp.float32),
        "pe": make_positional_encoding(max_seq_len, d_model),
        "norm_a": jnp.ones((1, d_model), jnp.float32),
        "norm_b": jnp.zeros((1, d_model), jnp.float32),
        "layers": [],
    }
    for l in range(N):
        lk = jax.random.split(keys[2 + l], 10)

        def attn_params(k0, k1, k2, k3):
            wq, bq = dense(k0, d_model, d_model)
            wk, bk = dense(k1, d_model, d_model)
            wv, bv = dense(k2, d_model, d_model)
            wo, bo = dense(k3, d_model, d_model)
            return {"wq": wq, "bq": bq, "wk": wk, "bk": bk,
                    "wv": wv, "bv": bv, "wo": wo, "bo": bo}

        w1, b1 = dense(lk[8], d_model, d_ff)
        w2, b2 = dense(lk[9], d_ff, d_model)
        params["layers"].append({
            "n1_a": jnp.ones((1, d_model), jnp.float32),
            "n1_b": jnp.zeros((1, d_model), jnp.float32),
            "n2_a": jnp.ones((1, d_model), jnp.float32),
            "n2_b": jnp.zeros((1, d_model), jnp.float32),
            "n3_a": jnp.ones((1, d_model), jnp.float32),
            "n3_b": jnp.zeros((1, d_model), jnp.float32),
            "attn1": attn_params(lk[0], lk[1], lk[2], lk[3]),
            "attn2": attn_params(lk[4], lk[5], lk[6], lk[7]),
            "ff": {"w1": w1, "b1": b1, "w2": w2, "b2": b2},
        })
    return params


def stack_params(params, heads):
    """Stack per-layer params along a leading layer axis; fold 1/sqrt(dk) into Wq/bq."""
    d_model = params["embed"].shape[1]
    dk = d_model // heads
    scale = 1.0 / math.sqrt(dk)
    layers = params["layers"]

    def stack(fn):
        return jnp.stack([fn(lp) for lp in layers], axis=0)

    return {
        "embed": params["embed"],
        "pe": params["pe"],
        "norm_a": params["norm_a"],
        "norm_b": params["norm_b"],
        "n1_a": stack(lambda l: l["n1_a"]),
        "n1_b": stack(lambda l: l["n1_b"]),
        "n2_a": stack(lambda l: l["n2_a"]),
        "n2_b": stack(lambda l: l["n2_b"]),
        "n3_a": stack(lambda l: l["n3_a"]),
        "n3_b": stack(lambda l: l["n3_b"]),
        "wq1": stack(lambda l: l["attn1"]["wq"] * scale),
        "bq1": stack(lambda l: l["attn1"]["bq"] * scale),
        "wk1": stack(lambda l: l["attn1"]["wk"]),
        "bk1": stack(lambda l: l["attn1"]["bk"]),
        "wv1": stack(lambda l: l["attn1"]["wv"]),
        "bv1": stack(lambda l: l["attn1"]["bv"]),
        "wo1": stack(lambda l: l["attn1"]["wo"]),
        "bo1": stack(lambda l: l["attn1"]["bo"]),
        "wq2": stack(lambda l: l["attn2"]["wq"] * scale),
        "bq2": stack(lambda l: l["attn2"]["bq"] * scale),
        "wk2": stack(lambda l: l["attn2"]["wk"]),
        "bk2": stack(lambda l: l["attn2"]["bk"]),
        "wv2": stack(lambda l: l["attn2"]["wv"]),
        "bv2": stack(lambda l: l["attn2"]["bv"]),
        "wo2": stack(lambda l: l["attn2"]["wo"]),
        "bo2": stack(lambda l: l["attn2"]["bo"]),
        "w1": stack(lambda l: l["ff"]["w1"]),
        "b1": stack(lambda l: l["ff"]["b1"]),
        "w2": stack(lambda l: l["ff"]["w2"]),
        "b2": stack(lambda l: l["ff"]["b2"]),
    }


# ------------------------------- forward pass --------------------------------


def decoder_forward(trg, e_outputs, src_mask, trg_mask, stacked, *, heads):
    d_model = stacked["embed"].shape[1]
    N = stacked["wq1"].shape[0]
    B, T = trg.shape
    S = e_outputs.shape[1]
    dk = d_model // heads
    BT, BS = B * T, B * S

    # Embedder + PositionalEncoder (plain-JAX glue, fused by jit).
    x = jnp.take(stacked["embed"], trg, axis=0)                  # (B, T, D)
    x = x * math.sqrt(d_model) + stacked["pe"][:, :T]
    x0 = x.reshape(BT, d_model).astype(jnp.float32)
    e_flat = e_outputs.reshape(BS, d_model).astype(jnp.float32)

    # Additive mask biases, precomputed once and tiled over heads so the kernel does a
    # single add (no per-head compare/select).  Batched index = h*B + b.
    neg = jnp.float32(-1e9)
    trg_bias = jnp.tile(jnp.where(trg_mask == 0, neg, 0.0).astype(jnp.float32),
                        (heads, 1, 1))                           # (H*B, T, T)
    src_bias = jnp.tile(jnp.where(src_mask == 0, neg, 0.0).astype(jnp.float32),
                        (heads, 1, 1))                           # (H*B, Mq, S)

    def const_spec(shape):
        n = len(shape)
        return pl.BlockSpec(tuple(shape), lambda l: (0,) * n)

    def layer_spec(shape):
        rest = tuple(shape[1:])
        n = len(rest)
        return pl.BlockSpec((1,) + rest, lambda l: (l,) + (0,) * n)

    in_specs = [
        const_spec((BT, d_model)),
        const_spec((BS, d_model)),
        const_spec(trg_bias.shape),
        const_spec(src_bias.shape),
    ]
    in_specs += [layer_spec(stacked[k].shape) for k in LAYER_PARAM_KEYS]
    in_specs += [const_spec((1, d_model)), const_spec((1, d_model))]

    kernel = functools.partial(decoder_kernel,
                               B=B, Tq=T, S=S, H=heads, dk=dk, eps=1e-6)

    out = pl.pallas_call(
        kernel,
        out_shape=jax.ShapeDtypeStruct((BT, d_model), jnp.float32),
        grid=(N,),
        in_specs=in_specs,
        out_specs=const_spec((BT, d_model)),
        scratch_shapes=[pltpu.VMEM((BT, d_model), jnp.float32)],
        compiler_params=pltpu.CompilerParams(
            dimension_semantics=("arbitrary",),      # serial carry over layers
            vmem_limit_bytes=32 * 1024 * 1024,
        ),
    )(x0, e_flat, trg_bias, src_bias,
      *[stacked[k] for k in LAYER_PARAM_KEYS],
      stacked["norm_a"], stacked["norm_b"])

    return out.reshape(B, T, d_model)


# ----------------------------------- main ------------------------------------


if __name__ == "__main__":
    B, T, S = 2, 8, 8
    vocab_size, d_model, N, heads = 50, 32, 2, 4
    d_ff = 2048          # nn.Linear default in FeedForward
    max_seq_len = 64

    key = jax.random.PRNGKey(0)
    kp, kt, ke = jax.random.split(key, 3)

    params = init_params(kp, vocab_size, d_model, N, heads, d_ff, max_seq_len)
    stacked = stack_params(params, heads)

    trg = jax.random.randint(kt, (B, T), 0, vocab_size, dtype=jnp.int32)
    e_outputs = jax.random.normal(ke, (B, S, d_model), jnp.float32)
    src_mask = jnp.ones((B, 1, S), jnp.int32)                              # attend everywhere
    trg_mask = jnp.tril(jnp.ones((T, T), jnp.int32))[None].repeat(B, 0)    # causal (B, T, T)

    fwd = jax.jit(functools.partial(decoder_forward, heads=heads))
    out = fwd(trg, e_outputs, src_mask, trg_mask, stacked)
    out = jax.block_until_ready(out)

    assert out.shape == (B, T, d_model)
    assert bool(jnp.all(jnp.isfinite(out)))
    print("KERNEL_OK")
</pallas_src>

<mosaic_0001>
module attributes {stable_mosaic.version = 11 : i64} {
  func.func @decoder_kernel(%arg0: i32, %arg1: memref<16x32xf32, #tpu.memory_space<vmem>>, %arg2: memref<16x32xf32, #tpu.memory_space<vmem>>, %arg3: memref<8x8x8xf32, #tpu.memory_space<vmem>>, %arg4: memref<8x1x8xf32, #tpu.memory_space<vmem>>, %arg5: memref<1x1x32xf32, #tpu.memory_space<vmem>>, %arg6: memref<1x1x32xf32, #tpu.memory_space<vmem>>, %arg7: memref<1x1x32xf32, #tpu.memory_space<vmem>>, %arg8: memref<1x1x32xf32, #tpu.memory_space<vmem>>, %arg9: memref<1x1x32xf32, #tpu.memory_space<vmem>>, %arg10: memref<1x1x32xf32, #tpu.memory_space<vmem>>, %arg11: memref<1x32x32xf32, #tpu.memory_space<vmem>>, %arg12: memref<1x1x32xf32, #tpu.memory_space<vmem>>, %arg13: memref<1x32x32xf32, #tpu.memory_space<vmem>>, %arg14: memref<1x1x32xf32, #tpu.memory_space<vmem>>, %arg15: memref<1x32x32xf32, #tpu.memory_space<vmem>>, %arg16: memref<1x1x32xf32, #tpu.memory_space<vmem>>, %arg17: memref<1x32x32xf32, #tpu.memory_space<vmem>>, %arg18: memref<1x1x32xf32, #tpu.memory_space<vmem>>, %arg19: memref<1x32x32xf32, #tpu.memory_space<vmem>>, %arg20: memref<1x1x32xf32, #tpu.memory_space<vmem>>, %arg21: memref<1x32x32xf32, #tpu.memory_space<vmem>>, %arg22: memref<1x1x32xf32, #tpu.memory_space<vmem>>, %arg23: memref<1x32x32xf32, #tpu.memory_space<vmem>>, %arg24: memref<1x1x32xf32, #tpu.memory_space<vmem>>, %arg25: memref<1x32x32xf32, #tpu.memory_space<vmem>>, %arg26: memref<1x1x32xf32, #tpu.memory_space<vmem>>, %arg27: memref<1x32x2048xf32, #tpu.memory_space<vmem>>, %arg28: memref<1x1x2048xf32, #tpu.memory_space<vmem>>, %arg29: memref<1x2048x32xf32, #tpu.memory_space<vmem>>, %arg30: memref<1x1x32xf32, #tpu.memory_space<vmem>>, %arg31: memref<1x32xf32, #tpu.memory_space<vmem>>, %arg32: memref<1x32xf32, #tpu.memory_space<vmem>>, %arg33: memref<16x32xf32, #tpu.memory_space<vmem>>, %arg34: memref<16x32xf32, #tpu.memory_space<vmem>>) attributes {dimension_semantics = [#tpu.dimension_semantics<arbitrary>], iteration_bounds = array<i64: 2>, scalar_prefetch = 0 : i64, scratch_operands = 1 : i64, tpu.core_type = #tpu.core_type<tc>, window_params = [{pipeline_mode = #tpu.pipeline_mode<synchronous>, transform_indices = @transform_0, window_bounds = array<i64: 16, 32>}, {pipeline_mode = #tpu.pipeline_mode<synchronous>, transform_indices = @transform_1, window_bounds = array<i64: 16, 32>}, {pipeline_mode = #tpu.pipeline_mode<synchronous>, transform_indices = @transform_2, window_bounds = array<i64: 8, 8, 8>}, {pipeline_mode = #tpu.pipeline_mode<synchronous>, transform_indices = @transform_3, window_bounds = array<i64: 8, 1, 8>}, {transform_indices = @transform_4, window_bounds = array<i64: 1, 1, 32>}, {transform_indices = @transform_5, window_bounds = array<i64: 1, 1, 32>}, {transform_indices = @transform_6, window_bounds = array<i64: 1, 1, 32>}, {transform_indices = @transform_7, window_bounds = array<i64: 1, 1, 32>}, {transform_indices = @transform_8, window_bounds = array<i64: 1, 1, 32>}, {transform_indices = @transform_9, window_bounds = array<i64: 1, 1, 32>}, {transform_indices = @transform_10, window_bounds = array<i64: 1, 32, 32>}, {transform_indices = @transform_11, window_bounds = array<i64: 1, 1, 32>}, {transform_indices = @transform_12, window_bounds = array<i64: 1, 32, 32>}, {transform_indices = @transform_13, window_bounds = array<i64: 1, 1, 32>}, {transform_indices = @transform_14, window_bounds = array<i64: 1, 32, 32>}, {transform_indices = @transform_15, window_bounds = array<i64: 1, 1, 32>}, {transform_indices = @transform_16, window_bounds = array<i64: 1, 32, 32>}, {transform_indices = @transform_17, window_bounds = array<i64: 1, 1, 32>}, {transform_indices = @transform_18, window_bounds = array<i64: 1, 32, 32>}, {transform_indices = @transform_19, window_bounds = array<i64: 1, 1, 32>}, {transform_indices = @transform_20, window_bounds = array<i64: 1, 32, 32>}, {transform_indices = @transform_21, window_bounds = array<i64: 1, 1, 32>}, {transform_indices = @transform_22, window_bounds = array<i64: 1, 32, 32>}, {transform_indices = @transform_23, window_bounds = array<i64: 1, 1, 32>}, {transform_indices = @transform_24, window_bounds = array<i64: 1, 32, 32>}, {transform_indices = @transform_25, window_bounds = array<i64: 1, 1, 32>}, {transform_indices = @transform_26, window_bounds = array<i64: 1, 32, 2048>}, {transform_indices = @transform_27, window_bounds = array<i64: 1, 1, 2048>}, {transform_indices = @transform_28, window_bounds = array<i64: 1, 2048, 32>}, {transform_indices = @transform_29, window_bounds = array<i64: 1, 1, 32>}, {pipeline_mode = #tpu.pipeline_mode<synchronous>, transform_indices = @transform_30, window_bounds = array<i64: 1, 32>}, {pipeline_mode = #tpu.pipeline_mode<synchronous>, transform_indices = @transform_31, window_bounds = array<i64: 1, 32>}, {pipeline_mode = #tpu.pipeline_mode<synchronous>, transform_indices = @transform_32, window_bounds = array<i64: 16, 32>}]} {
    %c0_i32 = arith.constant 0 : i32
    %0 = arith.cmpi eq, %arg0, %c0_i32 : i32
    %1 = arith.extui %0 : i1 to i32
    %c0_i32_0 = arith.constant 0 : i32
    %2 = arith.cmpi ne, %1, %c0_i32_0 : i32
    scf.if %2 {
      %c0_136 = arith.constant 0 : index
      %c0_137 = arith.constant 0 : index
      %251 = vector.load %arg1[%c0_136, %c0_137] : memref<16x32xf32, #tpu.memory_space<vmem>>, vector<16x32xf32>
      %c0_138 = arith.constant 0 : index
      %c0_139 = arith.constant 0 : index
      %252 = vector.load %arg34[%c0_138, %c0_139] : memref<16x32xf32, #tpu.memory_space<vmem>>, vector<16x32xf32>
      tpu.vector_store %arg34[%c0_138, %c0_139], %251 {strides = array<i32>} : memref<16x32xf32, #tpu.memory_space<vmem>>, vector<16x32xf32>,
    } else {
    }
    %c0 = arith.constant 0 : index
    %c0_1 = arith.constant 0 : index
    %3 = vector.load %arg34[%c0, %c0_1] : memref<16x32xf32, #tpu.memory_space<vmem>>, vector<16x32xf32>
    %c0_2 = arith.constant 0 : index
    %c0_3 = arith.constant 0 : index
    %c0_4 = arith.constant 0 : index
    %4 = vector.load %arg5[%c0_2, %c0_3, %c0_4] : memref<1x1x32xf32, #tpu.memory_space<vmem>>, vector<1x1x32xf32>
    %5 = vector.shape_cast %4 : vector<1x1x32xf32> to vector<1x32xf32>
    %c0_5 = arith.constant 0 : index
    %c0_6 = arith.constant 0 : index
    %c0_7 = arith.constant 0 : index
    %6 = vector.load %arg6[%c0_5, %c0_6, %c0_7] : memref<1x1x32xf32, #tpu.memory_space<vmem>>, vector<1x1x32xf32>
    %7 = vector.shape_cast %6 : vector<1x1x32xf32> to vector<1x32xf32>
    %cst = arith.constant dense<0.000000e+00> : vector<16xf32>
    %8 = vector.multi_reduction <add>, %3, %cst [1] : vector<16x32xf32> to vector<16xf32>
    %9 = vector.shape_cast %8 : vector<16xf32> to vector<16x1xf32>
    %cst_8 = arith.constant 3.200000e+01 : f32
    %10 = vector.broadcast %cst_8 : f32 to vector<16x1xf32>
    %11 = arith.divf %9, %10 : vector<16x1xf32>
    %12 = vector.broadcast %11 : vector<16x1xf32> to vector<16x32xf32>
    %13 = arith.subf %3, %12 : vector<16x32xf32>
    %14 = arith.mulf %13, %13 : vector<16x32xf32>
    %cst_9 = arith.constant dense<0.000000e+00> : vector<16xf32>
    %15 = vector.multi_reduction <add>, %14, %cst_9 [1] : vector<16x32xf32> to vector<16xf32>
    %16 = vector.shape_cast %15 : vector<16xf32> to vector<16x1xf32>
    %cst_10 = arith.constant 0.0322580636 : f32
    %17 = vector.broadcast %cst_10 : f32 to vector<16x1xf32>
    %18 = arith.mulf %16, %17 : vector<16x1xf32>
    %19 = math.sqrt %18 : vector<16x1xf32>
    %cst_11 = arith.constant 9.99999997E-7 : f32
    %20 = vector.broadcast %cst_11 : f32 to vector<16x1xf32>
    %21 = arith.addf %19, %20 : vector<16x1xf32>
    %22 = tpu.reciprocal %21 {approx = true} : vector<16x1xf32> -> vector<16x1xf32>
    %23 = vector.broadcast %5 : vector<1x32xf32> to vector<16x32xf32>
    %24 = arith.mulf %23, %13 : vector<16x32xf32>
    %25 = vector.broadcast %22 : vector<16x1xf32> to vector<16x32xf32>
    %26 = arith.mulf %24, %25 : vector<16x32xf32>
    %27 = vector.broadcast %7 : vector<1x32xf32> to vector<16x32xf32>
    %28 = arith.addf %26, %27 : vector<16x32xf32>
    %c0_12 = arith.constant 0 : index
    %c0_13 = arith.constant 0 : index
    %c0_14 = arith.constant 0 : index
    %29 = vector.load %arg3[%c0_12, %c0_13, %c0_14] : memref<8x8x8xf32, #tpu.memory_space<vmem>>, vector<8x8x8xf32>
    %c0_15 = arith.constant 0 : index
    %c0_16 = arith.constant 0 : index
    %c0_17 = arith.constant 0 : index
    %30 = vector.load %arg11[%c0_15, %c0_16, %c0_17] : memref<1x32x32xf32, #tpu.memory_space<vmem>>, vector<1x32x32xf32>
    %31 = vector.shape_cast %30 : vector<1x32x32xf32> to vector<32x32xf32>
    %c0_18 = arith.constant 0 : index
    %c0_19 = arith.constant 0 : index
    %c0_20 = arith.constant 0 : index
    %32 = vector.load %arg12[%c0_18, %c0_19, %c0_20] : memref<1x1x32xf32, #tpu.memory_space<vmem>>, vector<1x1x32xf32>
    %33 = vector.shape_cast %32 : vector<1x1x32xf32> to vector<1x32xf32>
    %c0_21 = arith.constant 0 : index
    %c0_22 = arith.constant 0 : index
    %c0_23 = arith.constant 0 : index
    %34 = vector.load %arg13[%c0_21, %c0_22, %c0_23] : memref<1x32x32xf32, #tpu.memory_space<vmem>>, vector<1x32x32xf32>
    %35 = vector.shape_cast %34 : vector<1x32x32xf32> to vector<32x32xf32>
    %c0_24 = arith.constant 0 : index
    %c0_25 = arith.constant 0 : index
    %c0_26 = arith.constant 0 : index
    %36 = vector.load %arg14[%c0_24, %c0_25, %c0_26] : memref<1x1x32xf32, #tpu.memory_space<vmem>>, vector<1x1x32xf32>
    %37 = vector.shape_cast %36 : vector<1x1x32xf32> to vector<1x32xf32>
    %c0_27 = arith.constant 0 : index
    %c0_28 = arith.constant 0 : index
    %c0_29 = arith.constant 0 : index
    %38 = vector.load %arg15[%c0_27, %c0_28, %c0_29] : memref<1x32x32xf32, #tpu.memory_space<vmem>>, vector<1x32x32xf32>
    %39 = vector.shape_cast %38 : vector<1x32x32xf32> to vector<32x32xf32>
    %c0_30 = arith.constant 0 : index
    %c0_31 = arith.constant 0 : index
    %c0_32 = arith.constant 0 : index
    %40 = vector.load %arg16[%c0_30, %c0_31, %c0_32] : memref<1x1x32xf32, #tpu.memory_space<vmem>>, vector<1x1x32xf32>
    %41 = vector.shape_cast %40 : vector<1x1x32xf32> to vector<1x32xf32>
    %c0_33 = arith.constant 0 : index
    %c0_34 = arith.constant 0 : index
    %c0_35 = arith.constant 0 : index
    %42 = vector.load %arg17[%c0_33, %c0_34, %c0_35] : memref<1x32x32xf32, #tpu.memory_space<vmem>>, vector<1x32x32xf32>
    %43 = vector.shape_cast %42 : vector<1x32x32xf32> to vector<32x32xf32>
    %c0_36 = arith.constant 0 : index
    %c0_37 = arith.constant 0 : index
    %c0_38 = arith.constant 0 : index
    %44 = vector.load %arg18[%c0_36, %c0_37, %c0_38] : memref<1x1x32xf32, #tpu.memory_space<vmem>>, vector<1x1x32xf32>
    %45 = vector.shape_cast %44 : vector<1x1x32xf32> to vector<1x32xf32>
    %cst_39 = arith.constant dense<0.000000e+00> : vector<16x32xf32>
    %46 = tpu.matmul %28, %31, %cst_39 {dimension_numbers = #tpu.dot_dimension_numbers<[1], [0], [0], [1], [0, 0, 1, 1], [], []>} : vector<16x32xf32>, vector<32x32xf32>, vector<16x32xf32> -> vector<16x32xf32>
    %47 = vector.broadcast %33 : vector<1x32xf32> to vector<16x32xf32>
    %48 = arith.addf %46, %47 : vector<16x32xf32>
    %cst_40 = arith.constant dense<0.000000e+00> : vector<16x32xf32>
    %49 = tpu.matmul %28, %35, %cst_40 {dimension_numbers = #tpu.dot_dimension_numbers<[1], [0], [0], [1], [0, 0, 1, 1], [], []>} : vector<16x32xf32>, vector<32x32xf32>, vector<16x32xf32> -> vector<16x32xf32>
    %50 = vector.broadcast %37 : vector<1x32xf32> to vector<16x32xf32>
    %51 = arith.addf %49, %50 : vector<16x32xf32>
    %cst_41 = arith.constant dense<0.000000e+00> : vector<16x32xf32>
    %52 = tpu.matmul %28, %39, %cst_41 {dimension_numbers = #tpu.dot_dimension_numbers<[1], [0], [0], [1], [0, 0, 1, 1], [], []>} : vector<16x32xf32>, vector<32x32xf32>, vector<16x32xf32> -> vector<16x32xf32>
    %53 = vector.broadcast %41 : vector<1x32xf32> to vector<16x32xf32>
    %54 = arith.addf %52, %53 : vector<16x32xf32>
    %55 = vector.shape_cast %48 : vector<16x32xf32> to vector<2x8x32xf32>
    %56 = vector.shape_cast %51 : vector<16x32xf32> to vector<2x8x32xf32>
    %57 = vector.shape_cast %54 : vector<16x32xf32> to vector<2x8x32xf32>
    %58 = vector.extract_strided_slice %55 {offsets = [0, 0, 0], sizes = [2, 8, 8], strides = [1, 1, 1]} : vector<2x8x32xf32> to vector<2x8x8xf32>
    %59 = vector.extract_strided_slice %55 {offsets = [0, 0, 8], sizes = [2, 8, 8], strides = [1, 1, 1]} : vector<2x8x32xf32> to vector<2x8x8xf32>
    %60 = vector.extract_strided_slice %55 {offsets = [0, 0, 16], sizes = [2, 8, 8], strides = [1, 1, 1]} : vector<2x8x32xf32> to vector<2x8x8xf32>
    %61 = vector.extract_strided_slice %55 {offsets = [0, 0, 24], sizes = [2, 8, 8], strides = [1, 1, 1]} : vector<2x8x32xf32> to vector<2x8x8xf32>
    %62 = tpu.concatenate %58, %59, %60, %61 in 0 : vector<2x8x8xf32>, vector<2x8x8xf32>, vector<2x8x8xf32>, vector<2x8x8xf32> -> vector<8x8x8xf32>
    %63 = vector.extract_strided_slice %56 {offsets = [0, 0, 0], sizes = [2, 8, 8], strides = [1, 1, 1]} : vector<2x8x32xf32> to vector<2x8x8xf32>
    %64 = vector.extract_strided_slice %56 {offsets = [0, 0, 8], sizes = [2, 8, 8], strides = [1, 1, 1]} : vector<2x8x32xf32> to vector<2x8x8xf32>
    %65 = vector.extract_strided_slice %56 {offsets = [0, 0, 16], sizes = [2, 8, 8], strides = [1, 1, 1]} : vector<2x8x32xf32> to vector<2x8x8xf32>
    %66 = vector.extract_strided_slice %56 {offsets = [0, 0, 24], sizes = [2, 8, 8], strides = [1, 1, 1]} : vector<2x8x32xf32> to vector<2x8x8xf32>
    %67 = tpu.concatenate %63, %64, %65, %66 in 0 : vector<2x8x8xf32>, vector<2x8x8xf32>, vector<2x8x8xf32>, vector<2x8x8xf32> -> vector<8x8x8xf32>
    %68 = vector.extract_strided_slice %57 {offsets = [0, 0, 0], sizes = [2, 8, 8], strides = [1, 1, 1]} : vector<2x8x32xf32> to vector<2x8x8xf32>
    %69 = vector.extract_strided_slice %57 {offsets = [0, 0, 8], sizes = [2, 8, 8], strides = [1, 1, 1]} : vector<2x8x32xf32> to vector<2x8x8xf32>
    %70 = vector.extract_strided_slice %57 {offsets = [0, 0, 16], sizes = [2, 8, 8], strides = [1, 1, 1]} : vector<2x8x32xf32> to vector<2x8x8xf32>
    %71 = vector.extract_strided_slice %57 {offsets = [0, 0, 24], sizes = [2, 8, 8], strides = [1, 1, 1]} : vector<2x8x32xf32> to vector<2x8x8xf32>
    %72 = tpu.concatenate %68, %69, %70, %71 in 0 : vector<2x8x8xf32>, vector<2x8x8xf32>, vector<2x8x8xf32>, vector<2x8x8xf32> -> vector<8x8x8xf32>
    "tpu.trace_start"() <{level = 10 : i32, message = "bqd,bkd->bqk"}> : () -> ()
    %cst_42 = arith.constant dense<0.000000e+00> : vector<8x8x8xf32>
    %73 = tpu.matmul %62, %67, %cst_42 {dimension_numbers = #tpu.dot_dimension_numbers<[2], [2], [1], [1], [0, 0, 0, 1, 1, 1], [0], [0]>} : vector<8x8x8xf32>, vector<8x8x8xf32>, vector<8x8x8xf32> -> vector<8x8x8xf32>
    "tpu.trace_stop"() : () -> ()
    %74 = arith.addf %73, %29 : vector<8x8x8xf32>
    %cst_43 = arith.constant dense<0xFF800000> : vector<8x8xf32>
    %75 = vector.multi_reduction <maximumf>, %74, %cst_43 [2] : vector<8x8x8xf32> to vector<8x8xf32>
    %76 = vector.shape_cast %75 : vector<8x8xf32> to vector<8x8x1xf32>
    %77 = vector.broadcast %76 : vector<8x8x1xf32> to vector<8x8x8xf32>
    %78 = arith.subf %74, %77 : vector<8x8x8xf32>
    %79 = math.exp %78 : vector<8x8x8xf32>
    %cst_44 = arith.constant dense<0.000000e+00> : vector<8x8xf32>
    %80 = vector.multi_reduction <add>, %79, %cst_44 [2] : vector<8x8x8xf32> to vector<8x8xf32>
    %81 = vector.shape_cast %80 : vector<8x8xf32> to vector<8x8x1xf32>
    %82 = tpu.reciprocal %81 {approx = true} : vector<8x8x1xf32> -> vector<8x8x1xf32>
    %83 = vector.broadcast %82 : vector<8x8x1xf32> to vector<8x8x8xf32>
    %84 = arith.mulf %79, %83 : vector<8x8x8xf32>
    "tpu.trace_start"() <{level = 10 : i32, message = "bqk,bkd->bqd"}> : () -> ()
    %cst_45 = arith.constant dense<0.000000e+00> : vector<8x8x8xf32>
    %85 = tpu.matmul %84, %72, %cst_45 {dimension_numbers = #tpu.dot_dimension_numbers<[2], [1], [1], [2], [0, 0, 0, 1, 1, 2], [0], [0]>} : vector<8x8x8xf32>, vector<8x8x8xf32>, vector<8x8x8xf32> -> vector<8x8x8xf32>
    "tpu.trace_stop"() : () -> ()
    %86 = vector.shape_cast %85 : vector<8x8x8xf32> to vector<4x16x8xf32>
    %87 = vector.shape_cast %43 : vector<32x32xf32> to vector<4x8x32xf32>
    "tpu.trace_start"() <{level = 10 : i32, message = "hrd,hde->hre"}> : () -> ()
    %cst_46 = arith.constant dense<0.000000e+00> : vector<4x16x32xf32>
    %88 = tpu.matmul %86, %87, %cst_46 {dimension_numbers = #tpu.dot_dimension_numbers<[2], [1], [1], [2], [0, 0, 0, 1, 1, 2], [0], [0]>} : vector<4x16x8xf32>, vector<4x8x32xf32>, vector<4x16x32xf32> -> vector<4x16x32xf32>
    "tpu.trace_stop"() : () -> ()
    %cst_47 = arith.constant dense<0.000000e+00> : vector<16x32xf32>
    %89 = vector.multi_reduction <add>, %88, %cst_47 [0] : vector<4x16x32xf32> to vector<16x32xf32>
    %90 = vector.broadcast %45 : vector<1x32xf32> to vector<16x32xf32>
    %91 = arith.addf %89, %90 : vector<16x32xf32>
    %92 = arith.addf %3, %91 : vector<16x32xf32>
    %c0_48 = arith.constant 0 : index
    %c0_49 = arith.constant 0 : index
    %c0_50 = arith.constant 0 : index
    %93 = vector.load %arg7[%c0_48, %c0_49, %c0_50] : memref<1x1x32xf32, #tpu.memory_space<vmem>>, vector<1x1x32xf32>
    %94 = vector.shape_cast %93 : vector<1x1x32xf32> to vector<1x32xf32>
    %c0_51 = arith.constant 0 : index
    %c0_52 = arith.constant 0 : index
    %c0_53 = arith.constant 0 : index
    %95 = vector.load %arg8[%c0_51, %c0_52, %c0_53] : memref<1x1x32xf32, #tpu.memory_space<vmem>>, vector<1x1x32xf32>
    %96 = vector.shape_cast %95 : vector<1x1x32xf32> to vector<1x32xf32>
    %cst_54 = arith.constant dense<0.000000e+00> : vector<16xf32>
    %97 = vector.multi_reduction <add>, %92, %cst_54 [1] : vector<16x32xf32> to vector<16xf32>
    %98 = vector.shape_cast %97 : vector<16xf32> to vector<16x1xf32>
    %cst_55 = arith.constant 3.200000e+01 : f32
    %99 = vector.broadcast %cst_55 : f32 to vector<16x1xf32>
    %100 = arith.divf %98, %99 : vector<16x1xf32>
    %101 = vector.broadcast %100 : vector<16x1xf32> to vector<16x32xf32>
    %102 = arith.subf %92, %101 : vector<16x32xf32>
    %103 = arith.mulf %102, %102 : vector<16x32xf32>
    %cst_56 = arith.constant dense<0.000000e+00> : vector<16xf32>
    %104 = vector.multi_reduction <add>, %103, %cst_56 [1] : vector<16x32xf32> to vector<16xf32>
    %105 = vector.shape_cast %104 : vector<16xf32> to vector<16x1xf32>
    %cst_57 = arith.constant 0.0322580636 : f32
    %106 = vector.broadcast %cst_57 : f32 to vector<16x1xf32>
    %107 = arith.mulf %105, %106 : vector<16x1xf32>
    %108 = math.sqrt %107 : vector<16x1xf32>
    %cst_58 = arith.constant 9.99999997E-7 : f32
    %109 = vector.broadcast %cst_58 : f32 to vector<16x1xf32>
    %110 = arith.addf %108, %109 : vector<16x1xf32>
    %111 = tpu.reciprocal %110 {approx = true} : vector<16x1xf32> -> vector<16x1xf32>
    %112 = vector.broadcast %94 : vector<1x32xf32> to vector<16x32xf32>
    %113 = arith.mulf %112, %102 : vector<16x32xf32>
    %114 = vector.broadcast %111 : vector<16x1xf32> to vector<16x32xf32>
    %115 = arith.mulf %113, %114 : vector<16x32xf32>
    %116 = vector.broadcast %96 : vector<1x32xf32> to vector<16x32xf32>
    %117 = arith.addf %115, %116 : vector<16x32xf32>
    %c0_59 = arith.constant 0 : index
    %c0_60 = arith.constant 0 : index
    %118 = vector.load %arg2[%c0_59, %c0_60] : memref<16x32xf32, #tpu.memory_space<vmem>>, vector<16x32xf32>
    %c0_61 = arith.constant 0 : index
    %c0_62 = arith.constant 0 : index
    %c0_63 = arith.constant 0 : index
    %119 = vector.load %arg4[%c0_61, %c0_62, %c0_63] : memref<8x1x8xf32, #tpu.memory_space<vmem>>, vector<8x1x8xf32>
    %c0_64 = arith.constant 0 : index
    %c0_65 = arith.constant 0 : index
    %c0_66 = arith.constant 0 : index
    %120 = vector.load %arg19[%c0_64, %c0_65, %c0_66] : memref<1x32x32xf32, #tpu.memory_space<vmem>>, vector<1x32x32xf32>
    %121 = vector.shape_cast %120 : vector<1x32x32xf32> to vector<32x32xf32>
    %c0_67 = arith.constant 0 : index
    %c0_68 = arith.constant 0 : index
    %c0_69 = arith.constant 0 : index
    %122 = vector.load %arg20[%c0_67, %c0_68, %c0_69] : memref<1x1x32xf32, #tpu.memory_space<vmem>>, vector<1x1x32xf32>
    %123 = vector.shape_cast %122 : vector<1x1x32xf32> to vector<1x32xf32>
    %c0_70 = arith.constant 0 : index
    %c0_71 = arith.constant 0 : index
    %c0_72 = arith.constant 0 : index
    %124 = vector.load %arg21[%c0_70, %c0_71, %c0_72] : memref<1x32x32xf32, #tpu.memory_space<vmem>>, vector<1x32x32xf32>
    %125 = vector.shape_cast %124 : vector<1x32x32xf32> to vector<32x32xf32>
    %c0_73 = arith.constant 0 : index
    %c0_74 = arith.constant 0 : index
    %c0_75 = arith.constant 0 : index
    %126 = vector.load %arg22[%c0_73, %c0_74, %c0_75] : memref<1x1x32xf32, #tpu.memory_space<vmem>>, vector<1x1x32xf32>
    %127 = vector.shape_cast %126 : vector<1x1x32xf32> to vector<1x32xf32>
    %c0_76 = arith.constant 0 : index
    %c0_77 = arith.constant 0 : index
    %c0_78 = arith.constant 0 : index
    %128 = vector.load %arg23[%c0_76, %c0_77, %c0_78] : memref<1x32x32xf32, #tpu.memory_space<vmem>>, vector<1x32x32xf32>
    %129 = vector.shape_cast %128 : vector<1x32x32xf32> to vector<32x32xf32>
    %c0_79 = arith.constant 0 : index
    %c0_80 = arith.constant 0 : index
    %c0_81 = arith.constant 0 : index
    %130 = vector.load %arg24[%c0_79, %c0_80, %c0_81] : memref<1x1x32xf32, #tpu.memory_space<vmem>>, vector<1x1x32xf32>
    %131 = vector.shape_cast %130 : vector<1x1x32xf32> to vector<1x32xf32>
    %c0_82 = arith.constant 0 : index
    %c0_83 = arith.constant 0 : index
    %c0_84 = arith.constant 0 : index
    %132 = vector.load %arg25[%c0_82, %c0_83, %c0_84] : memref<1x32x32xf32, #tpu.memory_space<vmem>>, vector<1x32x32xf32>
    %133 = vector.shape_cast %132 : vector<1x32x32xf32> to vector<32x32xf32>
    %c0_85 = arith.constant 0 : index
    %c0_86 = arith.constant 0 : index
    %c0_87 = arith.constant 0 : index
    %134 = vector.load %arg26[%c0_85, %c0_86, %c0_87] : memref<1x1x32xf32, #tpu.memory_space<vmem>>, vector<1x1x32xf32>
    %135 = vector.shape_cast %134 : vector<1x1x32xf32> to vector<1x32xf32>
    %cst_88 = arith.constant dense<0.000000e+00> : vector<16x32xf32>
    %136 = tpu.matmul %117, %121, %cst_88 {dimension_numbers = #tpu.dot_dimension_numbers<[1], [0], [0], [1], [0, 0, 1, 1], [], []>} : vector<16x32xf32>, vector<32x32xf32>, vector<16x32xf32> -> vector<16x32xf32>
    %137 = vector.broadcast %123 : vector<1x32xf32> to vector<16x32xf32>
    %138 = arith.addf %136, %137 : vector<16x32xf32>
    %cst_89 = arith.constant dense<0.000000e+00> : vector<16x32xf32>
    %139 = tpu.matmul %118, %125, %cst_89 {dimension_numbers = #tpu.dot_dimension_numbers<[1], [0], [0], [1], [0, 0, 1, 1], [], []>} : vector<16x32xf32>, vector<32x32xf32>, vector<16x32xf32> -> vector<16x32xf32>
    %140 = vector.broadcast %127 : vector<1x32xf32> to vector<16x32xf32>
    %141 = arith.addf %139, %140 : vector<16x32xf32>
    %cst_90 = arith.constant dense<0.000000e+00> : vector<16x32xf32>
    %142 = tpu.matmul %118, %129, %cst_90 {dimension_numbers = #tpu.dot_dimension_numbers<[1], [0], [0], [1], [0, 0, 1, 1], [], []>} : vector<16x32xf32>, vector<32x32xf32>, vector<16x32xf32> -> vector<16x32xf32>
    %143 = vector.broadcast %131 : vector<1x32xf32> to vector<16x32xf32>
    %144 = arith.addf %142, %143 : vector<16x32xf32>
    %145 = vector.shape_cast %138 : vector<16x32xf32> to vector<2x8x32xf32>
    %146 = vector.shape_cast %141 : vector<16x32xf32> to vector<2x8x32xf32>
    %147 = vector.shape_cast %144 : vector<16x32xf32> to vector<2x8x32xf32>
    %148 = vector.extract_strided_slice %145 {offsets = [0, 0, 0], sizes = [2, 8, 8], strides = [1, 1, 1]} : vector<2x8x32xf32> to vector<2x8x8xf32>
    %149 = vector.extract_strided_slice %145 {offsets = [0, 0, 8], sizes = [2, 8, 8], strides = [1, 1, 1]} : vector<2x8x32xf32> to vector<2x8x8xf32>
    %150 = vector.extract_strided_slice %145 {offsets = [0, 0, 16], sizes = [2, 8, 8], strides = [1, 1, 1]} : vector<2x8x32xf32> to vector<2x8x8xf32>
    %151 = vector.extract_strided_slice %145 {offsets = [0, 0, 24], sizes = [2, 8, 8], strides = [1, 1, 1]} : vector<2x8x32xf32> to vector<2x8x8xf32>
    %152 = tpu.concatenate %148, %149, %150, %151 in 0 : vector<2x8x8xf32>, vector<2x8x8xf32>, vector<2x8x8xf32>, vector<2x8x8xf32> -> vector<8x8x8xf32>
    %153 = vector.extract_strided_slice %146 {offsets = [0, 0, 0], sizes = [2, 8, 8], strides = [1, 1, 1]} : vector<2x8x32xf32> to vector<2x8x8xf32>
    %154 = vector.extract_strided_slice %146 {offsets = [0, 0, 8], sizes = [2, 8, 8], strides = [1, 1, 1]} : vector<2x8x32xf32> to vector<2x8x8xf32>
    %155 = vector.extract_strided_slice %146 {offsets = [0, 0, 16], sizes = [2, 8, 8], strides = [1, 1, 1]} : vector<2x8x32xf32> to vector<2x8x8xf32>
    %156 = vector.extract_strided_slice %146 {offsets = [0, 0, 24], sizes = [2, 8, 8], strides = [1, 1, 1]} : vector<2x8x32xf32> to vector<2x8x8xf32>
    %157 = tpu.concatenate %153, %154, %155, %156 in 0 : vector<2x8x8xf32>, vector<2x8x8xf32>, vector<2x8x8xf32>, vector<2x8x8xf32> -> vector<8x8x8xf32>
    %158 = vector.extract_strided_slice %147 {offsets = [0, 0, 0], sizes = [2, 8, 8], strides = [1, 1, 1]} : vector<2x8x32xf32> to vector<2x8x8xf32>
    %159 = vector.extract_strided_slice %147 {offsets = [0, 0, 8], sizes = [2, 8, 8], strides = [1, 1, 1]} : vector<2x8x32xf32> to vector<2x8x8xf32>
    %160 = vector.extract_strided_slice %147 {offsets = [0, 0, 16], sizes = [2, 8, 8], strides = [1, 1, 1]} : vector<2x8x32xf32> to vector<2x8x8xf32>
    %161 = vector.extract_strided_slice %147 {offsets = [0, 0, 24], sizes = [2, 8, 8], strides = [1, 1, 1]} : vector<2x8x32xf32> to vector<2x8x8xf32>
    %162 = tpu.concatenate %158, %159, %160, %161 in 0 : vector<2x8x8xf32>, vector<2x8x8xf32>, vector<2x8x8xf32>, vector<2x8x8xf32> -> vector<8x8x8xf32>
    "tpu.trace_start"() <{level = 10 : i32, message = "bqd,bkd->bqk"}> : () -> ()
    %cst_91 = arith.constant dense<0.000000e+00> : vector<8x8x8xf32>
    %163 = tpu.matmul %152, %157, %cst_91 {dimension_numbers = #tpu.dot_dimension_numbers<[2], [2], [1], [1], [0, 0, 0, 1, 1, 1], [0], [0]>} : vector<8x8x8xf32>, vector<8x8x8xf32>, vector<8x8x8xf32> -> vector<8x8x8xf32>
    "tpu.trace_stop"() : () -> ()
    %164 = vector.broadcast %119 : vector<8x1x8xf32> to vector<8x8x8xf32>
    %165 = arith.addf %163, %164 : vector<8x8x8xf32>
    %cst_92 = arith.constant dense<0xFF800000> : vector<8x8xf32>
    %166 = vector.multi_reduction <maximumf>, %165, %cst_92 [2] : vector<8x8x8xf32> to vector<8x8xf32>
    %167 = vector.shape_cast %166 : vector<8x8xf32> to vector<8x8x1xf32>
    %168 = vector.broadcast %167 : vector<8x8x1xf32> to vector<8x8x8xf32>
    %169 = arith.subf %165, %168 : vector<8x8x8xf32>
    %170 = math.exp %169 : vector<8x8x8xf32>
    %cst_93 = arith.constant dense<0.000000e+00> : vector<8x8xf32>
    %171 = vector.multi_reduction <add>, %170, %cst_93 [2] : vector<8x8x8xf32> to vector<8x8xf32>
    %172 = vector.shape_cast %171 : vector<8x8xf32> to vector<8x8x1xf32>
    %173 = tpu.reciprocal %172 {approx = true} : vector<8x8x1xf32> -> vector<8x8x1xf32>
    %174 = vector.broadcast %173 : vector<8x8x1xf32> to vector<8x8x8xf32>
    %175 = arith.mulf %170, %174 : vector<8x8x8xf32>
    "tpu.trace_start"() <{level = 10 : i32, message = "bqk,bkd->bqd"}> : () -> ()
    %cst_94 = arith.constant dense<0.000000e+00> : vector<8x8x8xf32>
    %176 = tpu.matmul %175, %162, %cst_94 {dimension_numbers = #tpu.dot_dimension_numbers<[2], [1], [1], [2], [0, 0, 0, 1, 1, 2], [0], [0]>} : vector<8x8x8xf32>, vector<8x8x8xf32>, vector<8x8x8xf32> -> vector<8x8x8xf32>
    "tpu.trace_stop"() : () -> ()
    %177 = vector.shape_cast %176 : vector<8x8x8xf32> to vector<4x16x8xf32>
    %178 = vector.shape_cast %133 : vector<32x32xf32> to vector<4x8x32xf32>
    "tpu.trace_start"() <{level = 10 : i32, message = "hrd,hde->hre"}> : () -> ()
    %cst_95 = arith.constant dense<0.000000e+00> : vector<4x16x32xf32>
    %179 = tpu.matmul %177, %178, %cst_95 {dimension_numbers = #tpu.dot_dimension_numbers<[2], [1], [1], [2], [0, 0, 0, 1, 1, 2], [0], [0]>} : vector<4x16x8xf32>, vector<4x8x32xf32>, vector<4x16x32xf32> -> vector<4x16x32xf32>
    "tpu.trace_stop"() : () -> ()
    %cst_96 = arith.constant dense<0.000000e+00> : vector<16x32xf32>
    %180 = vector.multi_reduction <add>, %179, %cst_96 [0] : vector<4x16x32xf32> to vector<16x32xf32>
    %181 = vector.broadcast %135 : vector<1x32xf32> to vector<16x32xf32>
    %182 = arith.addf %180, %181 : vector<16x32xf32>
    %183 = arith.addf %92, %182 : vector<16x32xf32>
    %c0_97 = arith.constant 0 : index
    %c0_98 = arith.constant 0 : index
    %c0_99 = arith.constant 0 : index
    %184 = vector.load %arg9[%c0_97, %c0_98, %c0_99] : memref<1x1x32xf32, #tpu.memory_space<vmem>>, vector<1x1x32xf32>
    %185 = vector.shape_cast %184 : vector<1x1x32xf32> to vector<1x32xf32>
    %c0_100 = arith.constant 0 : index
    %c0_101 = arith.constant 0 : index
    %c0_102 = arith.constant 0 : index
    %186 = vector.load %arg10[%c0_100, %c0_101, %c0_102] : memref<1x1x32xf32, #tpu.memory_space<vmem>>, vector<1x1x32xf32>
    %187 = vector.shape_cast %186 : vector<1x1x32xf32> to vector<1x32xf32>
    %cst_103 = arith.constant dense<0.000000e+00> : vector<16xf32>
    %188 = vector.multi_reduction <add>, %183, %cst_103 [1] : vector<16x32xf32> to vector<16xf32>
    %189 = vector.shape_cast %188 : vector<16xf32> to vector<16x1xf32>
    %cst_104 = arith.constant 3.200000e+01 : f32
    %190 = vector.broadcast %cst_104 : f32 to vector<16x1xf32>
    %191 = arith.divf %189, %190 : vector<16x1xf32>
    %192 = vector.broadcast %191 : vector<16x1xf32> to vector<16x32xf32>
    %193 = arith.subf %183, %192 : vector<16x32xf32>
    %194 = arith.mulf %193, %193 : vector<16x32xf32>
    %cst_105 = arith.constant dense<0.000000e+00> : vector<16xf32>
    %195 = vector.multi_reduction <add>, %194, %cst_105 [1] : vector<16x32xf32> to vector<16xf32>
    %196 = vector.shape_cast %195 : vector<16xf32> to vector<16x1xf32>
    %cst_106 = arith.constant 0.0322580636 : f32
    %197 = vector.broadcast %cst_106 : f32 to vector<16x1xf32>
    %198 = arith.mulf %196, %197 : vector<16x1xf32>
    %199 = math.sqrt %198 : vector<16x1xf32>
    %cst_107 = arith.constant 9.99999997E-7 : f32
    %200 = vector.broadcast %cst_107 : f32 to vector<16x1xf32>
    %201 = arith.addf %199, %200 : vector<16x1xf32>
    %202 = tpu.reciprocal %201 {approx = true} : vector<16x1xf32> -> vector<16x1xf32>
    %203 = vector.broadcast %185 : vector<1x32xf32> to vector<16x32xf32>
    %204 = arith.mulf %203, %193 : vector<16x32xf32>
    %205 = vector.broadcast %202 : vector<16x1xf32> to vector<16x32xf32>
    %206 = arith.mulf %204, %205 : vector<16x32xf32>
    %207 = vector.broadcast %187 : vector<1x32xf32> to vector<16x32xf32>
    %208 = arith.addf %206, %207 : vector<16x32xf32>
    %c0_108 = arith.constant 0 : index
    %c0_109 = arith.constant 0 : index
    %c0_110 = arith.constant 0 : index
    %209 = vector.load %arg27[%c0_108, %c0_109, %c0_110] : memref<1x32x2048xf32, #tpu.memory_space<vmem>>, vector<1x32x2048xf32>
    %210 = vector.shape_cast %209 : vector<1x32x2048xf32> to vector<32x2048xf32>
    %cst_111 = arith.constant dense<0.000000e+00> : vector<16x2048xf32>
    %211 = tpu.matmul %208, %210, %cst_111 {dimension_numbers = #tpu.dot_dimension_numbers<[1], [0], [0], [1], [0, 0, 1, 1], [], []>} : vector<16x32xf32>, vector<32x2048xf32>, vector<16x2048xf32> -> vector<16x2048xf32>
    %c0_112 = arith.constant 0 : index
    %c0_113 = arith.constant 0 : index
    %c0_114 = arith.constant 0 : index
    %212 = vector.load %arg28[%c0_112, %c0_113, %c0_114] : memref<1x1x2048xf32, #tpu.memory_space<vmem>>, vector<1x1x2048xf32>
    %213 = vector.shape_cast %212 : vector<1x1x2048xf32> to vector<1x2048xf32>
    %214 = vector.broadcast %213 : vector<1x2048xf32> to vector<16x2048xf32>
    %215 = arith.addf %211, %214 : vector<16x2048xf32>
    %cst_115 = arith.constant 0.000000e+00 : f32
    %216 = vector.broadcast %cst_115 : f32 to vector<16x2048xf32>
    %217 = arith.maximumf %215, %216 : vector<16x2048xf32>
    %c0_116 = arith.constant 0 : index
    %c0_117 = arith.constant 0 : index
    %c0_118 = arith.constant 0 : index
    %218 = vector.load %arg29[%c0_116, %c0_117, %c0_118] : memref<1x2048x32xf32, #tpu.memory_space<vmem>>, vector<1x2048x32xf32>
    %219 = vector.shape_cast %218 : vector<1x2048x32xf32> to vector<2048x32xf32>
    %cst_119 = arith.constant dense<0.000000e+00> : vector<16x32xf32>
    %220 = tpu.matmul %217, %219, %cst_119 {dimension_numbers = #tpu.dot_dimension_numbers<[1], [0], [0], [1], [0, 0, 1, 1], [], []>} : vector<16x2048xf32>, vector<2048x32xf32>, vector<16x32xf32> -> vector<16x32xf32>
    %221 = arith.addf %183, %220 : vector<16x32xf32>
    %c0_120 = arith.constant 0 : index
    %c0_121 = arith.constant 0 : index
    %c0_122 = arith.constant 0 : index
    %222 = vector.load %arg30[%c0_120, %c0_121, %c0_122] : memref<1x1x32xf32, #tpu.memory_space<vmem>>, vector<1x1x32xf32>
    %223 = vector.shape_cast %222 : vector<1x1x32xf32> to vector<1x32xf32>
    %224 = vector.broadcast %223 : vector<1x32xf32> to vector<16x32xf32>
    %225 = arith.addf %221, %224 : vector<16x32xf32>
    %c0_123 = arith.constant 0 : index
    %c0_124 = arith.constant 0 : index
    %226 = vector.load %arg34[%c0_123, %c0_124] : memref<16x32xf32, #tpu.memory_space<vmem>>, vector<16x32xf32>
    tpu.vector_store %arg34[%c0_123, %c0_124], %225 {strides = array<i32>} : memref<16x32xf32, #tpu.memory_space<vmem>>, vector<16x32xf32>,
    %c0_125 = arith.constant 0 : index
    %c0_126 = arith.constant 0 : index
    %227 = vector.load %arg31[%c0_125, %c0_126] : memref<1x32xf32, #tpu.memory_space<vmem>>, vector<1x32xf32>
    %c0_127 = arith.constant 0 : index
    %c0_128 = arith.constant 0 : index
    %228 = vector.load %arg32[%c0_127, %c0_128] : memref<1x32xf32, #tpu.memory_space<vmem>>, vector<1x32xf32>
    %cst_129 = arith.constant dense<0.000000e+00> : vector<16xf32>
    %229 = vector.multi_reduction <add>, %225, %cst_129 [1] : vector<16x32xf32> to vector<16xf32>
    %230 = vector.shape_cast %229 : vector<16xf32> to vector<16x1xf32>
    %cst_130 = arith.constant 3.200000e+01 : f32
    %231 = vector.broadcast %cst_130 : f32 to vector<16x1xf32>
    %232 = arith.divf %230, %231 : vector<16x1xf32>
    %233 = vector.broadcast %232 : vector<16x1xf32> to vector<16x32xf32>
    %234 = arith.subf %225, %233 : vector<16x32xf32>
    %235 = arith.mulf %234, %234 : vector<16x32xf32>
    %cst_131 = arith.constant dense<0.000000e+00> : vector<16xf32>
    %236 = vector.multi_reduction <add>, %235, %cst_131 [1] : vector<16x32xf32> to vector<16xf32>
    %237 = vector.shape_cast %236 : vector<16xf32> to vector<16x1xf32>
    %cst_132 = arith.constant 0.0322580636 : f32
    %238 = vector.broadcast %cst_132 : f32 to vector<16x1xf32>
    %239 = arith.mulf %237, %238 : vector<16x1xf32>
    %240 = math.sqrt %239 : vector<16x1xf32>
    %cst_133 = arith.constant 9.99999997E-7 : f32
    %241 = vector.broadcast %cst_133 : f32 to vector<16x1xf32>
    %242 = arith.addf %240, %241 : vector<16x1xf32>
    %243 = tpu.reciprocal %242 {approx = true} : vector<16x1xf32> -> vector<16x1xf32>
    %244 = vector.broadcast %227 : vector<1x32xf32> to vector<16x32xf32>
    %245 = arith.mulf %244, %234 : vector<16x32xf32>
    %246 = vector.broadcast %243 : vector<16x1xf32> to vector<16x32xf32>
    %247 = arith.mulf %245, %246 : vector<16x32xf32>
    %248 = vector.broadcast %228 : vector<1x32xf32> to vector<16x32xf32>
    %249 = arith.addf %247, %248 : vector<16x32xf32>
    %c0_134 = arith.constant 0 : index
    %c0_135 = arith.constant 0 : index
    %250 = vector.load %arg33[%c0_134, %c0_135] : memref<16x32xf32, #tpu.memory_space<vmem>>, vector<16x32xf32>
    tpu.vector_store %arg33[%c0_134, %c0_135], %249 {strides = array<i32>} : memref<16x32xf32, #tpu.memory_space<vmem>>, vector<16x32xf32>,
    return
  }
  func.func @transform_0(%arg0: i32) -> (i32, i32) {
    %c0_i32 = arith.constant 0 : i32
    %c0_i32_0 = arith.constant 0 : i32
    %c0_i32_1 = arith.constant 0 : i32
    return %c0_i32, %c0_i32_0 : i32, i32
  }
  func.func @transform_1(%arg0: i32) -> (i32, i32) {
    %c0_i32 = arith.constant 0 : i32
    %c0_i32_0 = arith.constant 0 : i32
    %c0_i32_1 = arith.constant 0 : i32
    return %c0_i32, %c0_i32_0 : i32, i32
  }
  func.func @transform_2(%arg0: i32) -> (i32, i32, i32) {
    %c0_i32 = arith.constant 0 : i32
    %c0_i32_0 = arith.constant 0 : i32
    %c0_i32_1 = arith.constant 0 : i32
    %c0_i32_2 = arith.constant 0 : i32
    return %c0_i32, %c0_i32_0, %c0_i32_1 : i32, i32, i32
  }
  func.func @transform_3(%arg0: i32) -> (i32, i32, i32) {
    %c0_i32 = arith.constant 0 : i32
    %c0_i32_0 = arith.constant 0 : i32
    %c0_i32_1 = arith.constant 0 : i32
    %c0_i32_2 = arith.constant 0 : i32
    return %c0_i32, %c0_i32_0, %c0_i32_1 : i32, i32, i32
  }
  func.func @transform_4(%arg0: i32) -> (i32, i32, i32) {
    %c0_i32 = arith.constant 0 : i32
    %c0_i32_0 = arith.constant 0 : i32
    %c0_i32_1 = arith.constant 0 : i32
    return %arg0, %c0_i32, %c0_i32_0 : i32, i32, i32
  }
  func.func @transform_5(%arg0: i32) -> (i32, i32, i32) {
    %c0_i32 = arith.constant 0 : i32
    %c0_i32_0 = arith.constant 0 : i32
    %c0_i32_1 = arith.constant 0 : i32
    return %arg0, %c0_i32, %c0_i32_0 : i32, i32, i32
  }
  func.func @transform_6(%arg0: i32) -> (i32, i32, i32) {
    %c0_i32 = arith.constant 0 : i32
    %c0_i32_0 = arith.constant 0 : i32
    %c0_i32_1 = arith.constant 0 : i32
    return %arg0, %c0_i32, %c0_i32_0 : i32, i32, i32
  }
  func.func @transform_7(%arg0: i32) -> (i32, i32, i32) {
    %c0_i32 = arith.constant 0 : i32
    %c0_i32_0 = arith.constant 0 : i32
    %c0_i32_1 = arith.constant 0 : i32
    return %arg0, %c0_i32, %c0_i32_0 : i32, i32, i32
  }
  func.func @transform_8(%arg0: i32) -> (i32, i32, i32) {
    %c0_i32 = arith.constant 0 : i32
    %c0_i32_0 = arith.constant 0 : i32
    %c0_i32_1 = arith.constant 0 : i32
    return %arg0, %c0_i32, %c0_i32_0 : i32, i32, i32
  }
  func.func @transform_9(%arg0: i32) -> (i32, i32, i32) {
    %c0_i32 = arith.constant 0 : i32
    %c0_i32_0 = arith.constant 0 : i32
    %c0_i32_1 = arith.constant 0 : i32
    return %arg0, %c0_i32, %c0_i32_0 : i32, i32, i32
  }
  func.func @transform_10(%arg0: i32) -> (i32, i32, i32) {
    %c0_i32 = arith.constant 0 : i32
    %c0_i32_0 = arith.constant 0 : i32
    %c0_i32_1 = arith.constant 0 : i32
    return %arg0, %c0_i32, %c0_i32_0 : i32, i32, i32
  }
  func.func @transform_11(%arg0: i32) -> (i32, i32, i32) {
    %c0_i32 = arith.constant 0 : i32
    %c0_i32_0 = arith.constant 0 : i32
    %c0_i32_1 = arith.constant 0 : i32
    return %arg0, %c0_i32, %c0_i32_0 : i32, i32, i32
  }
  func.func @transform_12(%arg0: i32) -> (i32, i32, i32) {
    %c0_i32 = arith.constant 0 : i32
    %c0_i32_0 = arith.constant 0 : i32
    %c0_i32_1 = arith.constant 0 : i32
    return %arg0, %c0_i32, %c0_i32_0 : i32, i32, i32
  }
  func.func @transform_13(%arg0: i32) -> (i32, i32, i32) {
    %c0_i32 = arith.constant 0 : i32
    %c0_i32_0 = arith.constant 0 : i32
    %c0_i32_1 = arith.constant 0 : i32
    return %arg0, %c0_i32, %c0_i32_0 : i32, i32, i32
  }
  func.func @transform_14(%arg0: i32) -> (i32, i32, i32) {
    %c0_i32 = arith.constant 0 : i32
    %c0_i32_0 = arith.constant 0 : i32
    %c0_i32_1 = arith.constant 0 : i32
    return %arg0, %c0_i32, %c0_i32_0 : i32, i32, i32
  }
  func.func @transform_15(%arg0: i32) -> (i32, i32, i32) {
    %c0_i32 = arith.constant 0 : i32
    %c0_i32_0 = arith.constant 0 : i32
    %c0_i32_1 = arith.constant 0 : i32
    return %arg0, %c0_i32, %c0_i32_0 : i32, i32, i32
  }
  func.func @transform_16(%arg0: i32) -> (i32, i32, i32) {
    %c0_i32 = arith.constant 0 : i32
    %c0_i32_0 = arith.constant 0 : i32
    %c0_i32_1 = arith.constant 0 : i32
    return %arg0, %c0_i32, %c0_i32_0 : i32, i32, i32
  }
  func.func @transform_17(%arg0: i32) -> (i32, i32, i32) {
    %c0_i32 = arith.constant 0 : i32
    %c0_i32_0 = arith.constant 0 : i32
    %c0_i32_1 = arith.constant 0 : i32
    return %arg0, %c0_i32, %c0_i32_0 : i32, i32, i32
  }
  func.func @transform_18(%arg0: i32) -> (i32, i32, i32) {
    %c0_i32 = arith.constant 0 : i32
    %c0_i32_0 = arith.constant 0 : i32
    %c0_i32_1 = arith.constant 0 : i32
    return %arg0, %c0_i32, %c0_i32_0 : i32, i32, i32
  }
  func.func @transform_19(%arg0: i32) -> (i32, i32, i32) {
    %c0_i32 = arith.constant 0 : i32
    %c0_i32_0 = arith.constant 0 : i32
    %c0_i32_1 = arith.constant 0 : i32
    return %arg0, %c0_i32, %c0_i32_0 : i32, i32, i32
  }
  func.func @transform_20(%arg0: i32) -> (i32, i32, i32) {
    %c0_i32 = arith.constant 0 : i32
    %c0_i32_0 = arith.constant 0 : i32
    %c0_i32_1 = arith.constant 0 : i32
    return %arg0, %c0_i32, %c0_i32_0 : i32, i32, i32
  }
  func.func @transform_21(%arg0: i32) -> (i32, i32, i32) {
    %c0_i32 = arith.constant 0 : i32
    %c0_i32_0 = arith.constant 0 : i32
    %c0_i32_1 = arith.constant 0 : i32
    return %arg0, %c0_i32, %c0_i32_0 : i32, i32, i32
  }
  func.func @transform_22(%arg0: i32) -> (i32, i32, i32) {
    %c0_i32 = arith.constant 0 : i32
    %c0_i32_0 = arith.constant 0 : i32
    %c0_i32_1 = arith.constant 0 : i32
    return %arg0, %c0_i32, %c0_i32_0 : i32, i32, i32
  }
  func.func @transform_23(%arg0: i32) -> (i32, i32, i32) {
    %c0_i32 = arith.constant 0 : i32
    %c0_i32_0 = arith.constant 0 : i32
    %c0_i32_1 = arith.constant 0 : i32
    return %arg0, %c0_i32, %c0_i32_0 : i32, i32, i32
  }
  func.func @transform_24(%arg0: i32) -> (i32, i32, i32) {
    %c0_i32 = arith.constant 0 : i32
    %c0_i32_0 = arith.constant 0 : i32
    %c0_i32_1 = arith.constant 0 : i32
    return %arg0, %c0_i32, %c0_i32_0 : i32, i32, i32
  }
  func.func @transform_25(%arg0: i32) -> (i32, i32, i32) {
    %c0_i32 = arith.constant 0 : i32
    %c0_i32_0 = arith.constant 0 : i32
    %c0_i32_1 = arith.constant 0 : i32
    return %arg0, %c0_i32, %c0_i32_0 : i32, i32, i32
  }
  func.func @transform_26(%arg0: i32) -> (i32, i32, i32) {
    %c0_i32 = arith.constant 0 : i32
    %c0_i32_0 = arith.constant 0 : i32
    %c0_i32_1 = arith.constant 0 : i32
    return %arg0, %c0_i32, %c0_i32_0 : i32, i32, i32
  }
  func.func @transform_27(%arg0: i32) -> (i32, i32, i32) {
    %c0_i32 = arith.constant 0 : i32
    %c0_i32_0 = arith.constant 0 : i32
    %c0_i32_1 = arith.constant 0 : i32
    return %arg0, %c0_i32, %c0_i32_0 : i32, i32, i32
  }
  func.func @transform_28(%arg0: i32) -> (i32, i32, i32) {
    %c0_i32 = arith.constant 0 : i32
    %c0_i32_0 = arith.constant 0 : i32
    %c0_i32_1 = arith.constant 0 : i32
    return %arg0, %c0_i32, %c0_i32_0 : i32, i32, i32
  }
  func.func @transform_29(%arg0: i32) -> (i32, i32, i32) {
    %c0_i32 = arith.constant 0 : i32
    %c0_i32_0 = arith.constant 0 : i32
    %c0_i32_1 = arith.constant 0 : i32
    return %arg0, %c0_i32, %c0_i32_0 : i32, i32, i32
  }
  func.func @transform_30(%arg0: i32) -> (i32, i32) {
    %c0_i32 = arith.constant 0 : i32
    %c0_i32_0 = arith.constant 0 : i32
    %c0_i32_1 = arith.constant 0 : i32
    return %c0_i32, %c0_i32_0 : i32, i32
  }
  func.func @transform_31(%arg0: i32) -> (i32, i32) {
    %c0_i32 = arith.constant 0 : i32
    %c0_i32_0 = arith.constant 0 : i32
    %c0_i32_1 = arith.constant 0 : i32
    return %c0_i32, %c0_i32_0 : i32, i32
  }
  func.func @transform_32(%arg0: i32) -> (i32, i32) {
    %c0_i32 = arith.constant 0 : i32
    %c0_i32_0 = arith.constant 0 : i32
    %c0_i32_1 = arith.constant 0 : i32
    return %c0_i32, %c0_i32_0 : i32, i32
  }
}

</mosaic_0001>

<bundles_post_ra>
// kernel: decoder_forward.1
= control target key start
LH: loop header
LB: loop body
LE: loop exit
PB: predicated region body
PF: predicated region fallthrough
CT: control target
= control target key end

     0   :  { %s8601_s6 = smov 1   ;;  %s8602_s10 = smov 2   ;;  %s9862_s0 = inlined_call_operand.smem [shape: u32[33], index: -1, kind: input, shape index: {}] }
   0x1   :  { %s8649_s5 = sld [smem:[%s9862_s0]]   ;;  %s8603_s14 = smov 3  }
   0x2   :  { %s8654_s9 = sld [smem:[%s9862_s0 + %s8601_s6]]   ;;  %s8604_s18 = smov 4  }
   0x3   :  { %s8659_s13 = sld [smem:[%s9862_s0 + %s8602_s10]]   ;;  %s8605_s22 = smov 5  }
   0x4   :  { %s8664_s17 = sld [smem:[%s9862_s0 + %s8603_s14]]   ;;  %s8606_s26 = smov 6  }
   0x5   :  { %s8669_s21 = sld [smem:[%s9862_s0 + %s8604_s18]]   ;;  %s8607_s30 = smov 7  }
   0x6   :  { %s8674_s25 = sld [smem:[%s9862_s0 + %s8605_s22]]   ;;  %s8608_s4 = smov 8  }
   0x7   :  { %9872 = sst [smem:[#allocation6_spill]] %s8649_s5  ;;  %s8609_s10 = smov 9  }
   0x8   :  { %9873 = sst [smem:[#allocation7_spill]] %s8654_s9  ;;  %s8610_s15 = smov 10  }
   0x9   :  { %9874 = sst [smem:[#allocation8_spill]] %s8659_s13  ;;  %s8611_s20 = smov 11  }
   0xa   :  { %9875 = sst [smem:[#allocation9_spill]] %s8664_s17  ;;  %s8613_s1 = smov 13  }
   0xb   :  { %9876 = sst [smem:[#allocation10_spill]] %s8669_s21  ;;  %s8614_s7 = smov 14  }
   0xc   :  { %9877 = sst [smem:[#allocation11_spill]] %s8674_s25  ;;  %s8616_s22 = smov 16  }
   0xd   :  { %s8679_s29 = sld [smem:[%s9862_s0 + %s8606_s26]]   ;;  %s8612_s26 = smov 12  }
   0xe   :  { %s8684_s3 = sld [smem:[%s9862_s0 + %s8607_s30]]   ;;  %s8617_s28 = smov 17  }
   0xf   :  { %s8689_s8 = sld [smem:[%s9862_s0 + %s8608_s4]]  }
  0x10   :  { %s8694_s14 = sld [smem:[%s9862_s0 + %s8609_s10]]  }
  0x11   :  { %s8699_s19 = sld [smem:[%s9862_s0 + %s8610_s15]]   ;;  %s8615_s15 = smov 15  }
  0x12   :  { %s8704_s24 = sld [smem:[%s9862_s0 + %s8611_s20]]  }
  0x13   :  { %9878 = sst [smem:[#allocation12_spill]] %s8679_s29 }
  0x14   :  { %9879 = sst [smem:[#allocation13_spill]] %s8684_s3 }
  0x15   :  { %9880 = sst [smem:[#allocation14_spill]] %s8689_s8 }
  0x16   :  { %9881 = sst [smem:[#allocation15_spill]] %s8694_s14 }
  0x17   :  { %9882 = sst [smem:[#allocation16_spill]] %s8699_s19 }
  0x18   :  { %9883 = sst [smem:[#allocation17_spill]] %s8704_s24 }
  0x19   :  { %s8709_s30 = sld [smem:[%s9862_s0 + %s8612_s26]]  }
  0x1a   :  { %s8714_s6 = sld [smem:[%s9862_s0 + %s8613_s1]]  }
  0x1b   :  { %s8719_s12 = sld [smem:[%s9862_s0 + %s8614_s7]]   ;;  %s8618_s7 = smov 18  }
  0x1c   :  { %s8724_s20 = sld [smem:[%s9862_s0 + %s8615_s15]]   ;;  %s8619_s15 = smov 19  }
  0x1d   :  { %s8729_s27 = sld [smem:[%s9862_s0 + %s8616_s22]]   ;;  %s8620_s22 = smov 20  }
  0x1e   :  { %s8734_s4 = sld [smem:[%s9862_s0 + %s8617_s28]]   ;;  %s8621_s28 = smov 21  }
  0x1f   :  { %9884 = sst [smem:[#allocation18_spill]] %s8709_s30 }
  0x20   :  { %9885 = sst [smem:[#allocation19_spill]] %s8714_s6 }
  0x21   :  { %9886 = sst [smem:[#allocation20_spill]] %s8719_s12 }
  0x22   :  { %9887 = sst [smem:[#allocation21_spill]] %s8724_s20 }
  0x23   :  { %9888 = sst [smem:[#allocation22_spill]] %s8729_s27 }
  0x24   :  { %s8739_s17 = sld [smem:[%s9862_s0 + %s8618_s7]]   ;;  %s8622_s7 = smov 22  }
  0x25   :  { %s8744_s9 = sld [smem:[%s9862_s0 + %s8619_s15]]   ;;  %s8623_s15 = smov 23  }
  0x26   :  { %s8749_s13 = sld [smem:[%s9862_s0 + %s8620_s22]]   ;;  %s8624_s22 = smov 24  }
  0x27   :  { %s8754_s5 = sld [smem:[%s9862_s0 + %s8621_s28]]   ;;  %s8625_s28 = smov 25  }
  0x2a   :  { %9889 = sst [smem:[#allocation23_spill]] %s8739_s17 }
  0x2b   :  { %9890 = sst [smem:[#allocation24_spill]] %s8744_s9 }
  0x2c   :  { %9891 = sst [smem:[#allocation25_spill]] %s8749_s13 }
  0x2d   :  { %9892 = sst [smem:[#allocation26_spill]] %s8754_s5 }
  0x2e   :  { %s8759_s17 = sld [smem:[%s9862_s0 + %s8622_s7]]   ;;  %s8626_s7 = smov 26  }
  0x2f   :  { %s8764_s9 = sld [smem:[%s9862_s0 + %s8623_s15]]   ;;  %s8627_s15 = smov 27  }
  0x30   :  { %s8769_s13 = sld [smem:[%s9862_s0 + %s8624_s22]]   ;;  %s8628_s22 = smov 28  }
  0x31   :  { %s8774_s5 = sld [smem:[%s9862_s0 + %s8625_s28]]   ;;  %s8629_s28 = smov 29  }
  0x34   :  { %9893 = sst [smem:[#allocation27_spill]] %s8759_s17 }
  0x35   :  { %9894 = sst [smem:[#allocation28_spill]] %s8764_s9 }
  0x36   :  { %9895 = sst [smem:[#allocation29_spill]] %s8769_s13 }
  0x37   :  { %9896 = sst [smem:[#allocation30_spill]] %s8774_s5 }
  0x38   :  { %s8779_s17 = sld [smem:[%s9862_s0 + %s8626_s7]]   ;;  %s8630_s7 = smov 30  }
  0x39   :  { %s8784_s9 = sld [smem:[%s9862_s0 + %s8627_s15]]   ;;  %s8631_s15 = smov 31  }
  0x3a   :  { %s8789_s13 = sld [smem:[%s9862_s0 + %s8628_s22]]   ;;  %s8632_s22 = smov 32  }
  0x3b   :  { %s8794_s5 = sld [smem:[%s9862_s0 + %s8629_s28]]  }
  0x3e   :  { %9897 = sst [smem:[#allocation31_spill]] %s8779_s17 }
  0x3f   :  { %9898 = sst [smem:[#allocation32_spill]] %s8784_s9 }
  0x40   :  { %9899 = sst [smem:[#allocation33_spill]] %s8789_s13 }
  0x41   :  { %9900 = sst [smem:[#allocation34_spill]] %s8794_s5 }
  0x42   :  { %s8799_s17 = sld [smem:[%s9862_s0 + %s8630_s7]]  }
  0x43   :  { %s8804_s9 = sld [smem:[%s9862_s0 + %s8631_s15]]  }
  0x44   :  { %s8809_s13 = sld [smem:[%s9862_s0 + %s8632_s22]]  }
  0x48   :  { %9901 = sst [smem:[#allocation35_spill]] %s8799_s17 }
  0x49   :  { %9902 = sst [smem:[#allocation36_spill]] %s8804_s9 }
  0x4a   :  { %9903 = sst [smem:[#allocation37_spill]] %s8809_s13 }
  0x4b   :  { %70 = vsyncpa [#allocation4], 0  ;;  %s8811_s28 = smov 0  }
  0x4c LB: > { %9904 = sst [smem:[#allocation38_spill]] %s8599_s28  ;;  %s8817_s1 = sadd.s32 4294967295, %s8599_s28   ;;  %s8599_s28 = sphi %s8811_s28, %s76_s28  }
  0x4d   : > { %9905 = sst [smem:[#allocation39_spill]] %s8817_s1  ;;  %p7567_p0 = scmp.ge.s32.totalorder %s8599_s28, 1 }
  0x4e   : > { %p1110_p1 = scmp.lt.s32.totalorder %s8599_s28, 3 }
  0x50   : > { %p1111_p2 = pnand %p7567_p0, %p1110_p1 }
  0x52   : > { %1114 = sbr.rel (%p1111_p2) target bundleno = 4425 (0x1149), region = 148 }
  0x57   : > { %s9913_s19 = sld [smem:[#allocation16_spill]]  ;;  %p1281_p3 = scmp.lt.s32.totalorder %s8817_s1, 1 }
  0x58   : > { %s9914_s30 = sld [smem:[#allocation18_spill]] }
  0x59   : > { %s9916_s12 = sld [smem:[#allocation20_spill]] }
  0x5a   : > { %s9918_s27 = sld [smem:[#allocation22_spill]] }
  0x5b   : > { %s8823_s0 = scalar_select %p1281_p3, %s8817_s1, 1 }
  0x5c   : > { %s9919_s2 = sld [smem:[#allocation23_spill]] }
  0x5d   : > { %s9920_s10 = sld [smem:[#allocation24_spill]]  ;;  %s7711_s17 = sshll.u32 %s8823_s0, 5 }
  0x5e   : > { %s9921_s15 = sld [smem:[#allocation25_spill]]  ;;  %s8841_s7 = scalar_lea.vmem %s9913_s19, %s7711_s17 }
  0x5f   : > { %s9922_s18 = sld [smem:[#allocation26_spill]]  ;;  %s8844_s11 = scalar_lea.vmem %s9914_s30, %s7711_s17 }
  0x60   : > { %s9923_s23 = sld [smem:[#allocation27_spill]]  ;;  %s8849_s22 = scalar_lea.vmem %s9916_s12, %s7711_s17 }
  0x61   : > { %s9924_s28 = sld [smem:[#allocation28_spill]]  ;;  %s8854_s13 = scalar_lea.vmem %s9918_s27, %s7711_s17 }
  0x62   : > { %s9925_s9 = sld [smem:[#allocation29_spill]]  ;;  %s8859_s5 = scalar_lea.vmem %s9919_s2, %s7711_s17 }
  0x63   : > { %s9926_s1 = sld [smem:[#allocation30_spill]]  ;;  %s1338_s19 = scalar_lea.vmem %s9920_s10, %s8823_s0 }
  0x64   : > { %s9927_s21 = sld [smem:[#allocation31_spill]]  ;;  %s8864_s24 = scalar_lea.vmem %s9921_s15, %s7711_s17 }
  0x65   : > { %s9928_s29 = sld [smem:[#allocation32_spill]]  ;;  %s1346_s30 = scalar_lea.vmem %s9922_s18, %s8823_s0 }
  0x66   : > { %9929 = sst [smem:[#allocation40_spill]] %s8849_s22  ;;  %s8869_s25 = scalar_lea.vmem %s9923_s23, %s7711_s17 }
  0x67   : > { %s9930_s8 = sld [smem:[#allocation33_spill]]  ;;  %s1354_s16 = scalar_lea.vmem %s9924_s28, %s8823_s0 }
  0x68   : > { %9931 = sst [smem:[#allocation41_spill]] %s8854_s13  ;;  %s8874_s6 = scalar_lea.vmem %s9925_s9, %s7711_s17 }
  0x69   : > { %s9932_s14 = sld [smem:[#allocation34_spill]]  ;;  %s1362_s12 = scalar_lea.vmem %s9926_s1, %s8823_s0 }
  0x6a   : > { %s7719_s22 = sshll.u32 %s8823_s0, 9  ;;  %s7586_s27 = sshll.u32 %s8823_s0, 4 }
  0x6b   : > { %s8880_s26 = scalar_lea.vmem %s9927_s21, %s7719_s22  ;;  %s8884_s13 = scalar_lea.vmem %s9928_s29, %s7586_s27 }
  0x6c   : > { %s7720_s20 = sshll.u32 %s8823_s0, 11  ;;  %s9933_s10 = sld [smem:[#allocation39_spill]] }
  0x6d   : > { %s8888_s3 = scalar_lea.vmem %s9930_s8, %s7720_s20 }
  0x6f   : > { %s1379_s2 = scalar_lea.vmem %s9932_s14, %s8823_s0 }
  0x72   : > { %p7589_p4 = scmp.ne.s32.totalorder %s9933_s10, 0 }
  0x73   : > { %s9934_s15 = sld [smem:[#allocation6_spill]] (!%p7589_p4) }
  0x74   : > { %1383 = sbr.rel (%p7589_p4) target bundleno = 123 (0x7b), region = 152 }
  0x79   : > { %v1384_v0 = vld [vmem:[%s9934_s15] sm:$0xff]  ;;  %vm1386_vm0 = vcmask 261120   ;;  %v1385_v1 = vld [vmem:[%s9934_s15 + $0x8] sm:$0xff] }
  0x7a   : > { %1387 = vst.msk [vmem:[#allocation2] sm:$0xff] %vm1386_vm0, %v1384_v0  ;;  %1388 = vst.msk [vmem:[#allocation2 + $0x8] sm:$0xff] %vm1386_vm0, %v1385_v1 }
  0x7b PF: > { %vm1393_vm1 = vcmask 261120   ;;  %v1462_v16 = vld [vmem:[%s8841_s7 + $0x18] sm:$0xff]  ;;  %v1461_v18 = vld [vmem:[%s8841_s7 + $0x10] sm:$0xff]  ;;  %s9935_s9 = sld [smem:[#allocation40_spill]]  ;;  %v1460_v20 = vld [vmem:[%s8841_s7 + $0x8] sm:$0xff]  ;;  %v8633_v54 = vmov 0.0  }
  0x7c   : > { %v1467_v17 = vld [vmem:[%s8844_s11 + $0x18] sm:$0xff]  ;;  %8149 = vmatprep.subr.mxu0 %v1462_v16  ;;  %v1466_v19 = vld [vmem:[%s8844_s11 + $0x10] sm:$0xff]  ;;  %v1465_v21 = vld [vmem:[%s8844_s11 + $0x8] sm:$0xff]  ;;  %s9936_s17 = sld [smem:[#allocation10_spill]]  ;;  %vm8634_vm6 = vmmov 0   ;;  %vm1776_vm7 = vcmask 64512  }
  0x7d   : > { %8160 = vmatprep.subr.mxu1 %v1467_v17  ;;  %8150 = vmatpush3.msra.mxu0 %v1462_v16  ;;  %v1459_v22 = vld [vmem:[%s8841_s7] sm:$0xff]  ;;  %s9937_s21 = sld [smem:[#allocation11_spill]]  ;;  %s8635_s1 = smov 120  }
  0x7e   : > { %8161 = vmatpush3.msra.mxu1 %v1467_v17  ;;  %8151 = vmatprep.subr.mxu0 %v1461_v18  ;;  %v1464_v23 = vld [vmem:[%s8844_s11] sm:$0xff]  ;;  %s9940_s14 = sld [smem:[#allocation19_spill]]  ;;  %s8636_s7 = smov 112  }
  0x7f   : > { %8162 = vmatprep.subr.mxu1 %v1466_v19  ;;  %8152 = vmatpush3.msra.mxu0 %v1461_v18  ;;  %s9941_s20 = sld [smem:[#allocation17_spill]]  ;;  %s8637_s11 = smov 104  }
  0x80   : > { %8163 = vmatpush3.msra.mxu1 %v1466_v19  ;;  %8153 = vmatprep.subr.mxu0 %v1460_v20  ;;  %s9944_s18 = sld [smem:[#allocation21_spill]] }
  0x81   : > { %v8895_v2 = vld [vmem:[#allocation2] sm:$0xff]  ;;  %v8897_v3 = vld [vmem:[#allocation2 + $0x8] sm:$0xff]  ;;  %8154 = vmatpush3.msra.mxu0 %v1460_v20  ;;  %8164 = vmatprep.subr.mxu1 %v1465_v21  ;;  %v1472_v24 = vld [vmem:[%s9935_s9 + $0x18] sm:$0xff]  ;;  %s9946_s23 = sld [smem:[#allocation8_spill]] }
  0x82   : > { %v1394_v4 = vsel %vm1393_vm1, %v8895_v2, 0.0  ;;  %v1397_v5 = vsel %vm1393_vm1, %v8897_v3, 0.0  ;;  %8155 = vmatprep.subr.mxu0 %v1459_v22  ;;  %8165 = vmatpush3.msra.mxu1 %v1465_v21  ;;  %s9938_s29 = scalar_lea.vmem %s9936_s17, %s8823_s0  ;;  %v1471_v51 = vld [vmem:[%s9935_s9 + $0x10] sm:$0xff]  ;;  %v1470_v52 = vld [vmem:[%s9935_s9 + $0x8] sm:$0xff]  ;;  %v1469_v53 = vld [vmem:[%s9935_s9] sm:$0xff]  ;;  %s9947_s10 = sld [smem:[#allocation41_spill]] }
  0x83   : > { %1395 = vadd.xlane.f32.xlu0 %v1394_v4  ;;  %8156 = vmatpush3.msra.mxu0 %v1459_v22  ;;  %v7590_v41 = vld [vmem:[%s9938_s29] ss:$0 sm:$0xff]  ;;  %s9939_s8 = scalar_lea.vmem %s9937_s21, %s8823_s0  ;;  %s9948_s9 = scalar_lea.vmem %s8734_s4, %s8823_s0 }
  0x84   : > { %8166 = vmatprep.subr.mxu1 %v1464_v23  ;;  %8171 = vmatprep.subr.mxu0 %v1472_v24  ;;  %v7591_v44 = vld [vmem:[%s9939_s8] ss:$0 sm:$0xff]  ;;  %s9942_s27 = scalar_lea.vmem %s9940_s14, %s8823_s0  ;;  %s9949_s17 = sld [smem:[#allocation7_spill]] }
  0x85   : > { %8167 = vmatpush3.msra.mxu1 %v1464_v23  ;;  %v7595_v55 = vld [vmem:[%s9942_s27] ss:$0 sm:$0xff]  ;;  %s9943_s28 = scalar_lea.vmem %s9941_s20, %s8823_s0  ;;  %s9951_s21 = sld [smem:[#allocation13_spill]] }
  0x86   : > { %8182 = vmatprep.subr.mxu1 %v8633_v54  ;;  %v7592_v59 = vld [vmem:[%s9943_s28] ss:$0 sm:$0xff]  ;;  %s9945_s22 = scalar_lea.vmem %s9944_s18, %s8823_s0 }
  0x87   : > { %1398 = vadd.xlane.f32.xlu0 %v1397_v5  ;;  %v1451_v20 = vld [vmem:[%s9946_s23] sm:$0xff] }
  0x8b   : > { %s9954_s8 = scalar_lea.vmem %s9951_s21, %s8823_s0 }
 0x10c   : > { %v1396_v6 = vpop.xlane.xlu0 %1395 }
 0x10d   : > { %v1401_v7 = vmul.f32 0.03125, %v1396_v6 }
 0x10f   : > { %v1403_v8 = vsub.f32 %v8895_v2, %v1401_v7 }
 0x110   : > { %v1399_v9 = vpop.xlane.xlu0 %1398 }
 0x111   : > { %v1402_v10 = vmul.f32 0.03125, %v1399_v9  ;;  %v1405_v11 = vmul.f32 %v1403_v8, %v1403_v8  ;;  %v1439_v42 = vmul.f32 %v7590_v41, %v1403_v8 }
 0x113   : > { %v1404_v12 = vsub.f32 %v8897_v3, %v1402_v10  ;;  %v1407_v13 = vsel %vm1393_vm1, %v1405_v11, 0.0 }
 0x114   : > { %1408 = vadd.xlane.f32.xlu1 %v1407_v13 }
 0x115   : > { %v1406_v14 = vmul.f32 %v1404_v12, %v1404_v12  ;;  %v1440_v46 = vmul.f32 %v7590_v41, %v1404_v12 }
 0x117   : > { %v1410_v15 = vsel %vm1393_vm1, %v1406_v14, 0.0  ;;  %v7598_v14 = vld [vmem:[%s9945_s22] ss:$0 sm:$0xff] }
 0x118   : > { %1411 = vadd.xlane.f32.xlu1 %v1410_v15 }
 0x19d   : > { %v1409_v25 = vpop.xlane.xlu1 %1408 }
 0x19e   : > { %v1413_v26 = vmul.f32 0.032258064, %v1409_v25 }
 0x1a0   : > { %8469 = vrsqrt.f32 %v1413_v26  ;;  %vm1417_vm2 = vcmp.eq.f32.partialorder %v1413_v26, inf  ;;  %v1420_v31 = vand.u32 2147483648, %v1413_v26  ;;  %vm1419_vm3 = vcmp.eq.f32.partialorder %v1413_v26, 0.0 }
 0x1a1   : > { %v1412_v27 = vpop.xlane.xlu1 %1411 }
 0x1a2   : > { %v1414_v28 = vmul.f32 0.032258064, %v1412_v27 }
 0x1a4   : > { %8471 = vrsqrt.f32 %v1414_v28  ;;  %vm1424_vm4 = vcmp.eq.f32.partialorder %v1414_v28, inf  ;;  %v1427_v37 = vand.u32 2147483648, %v1414_v28  ;;  %vm1426_vm5 = vcmp.eq.f32.partialorder %v1414_v28, 0.0 }
 0x1ad   : > { %v8470_v29 = vpop.eup %8469 }
 0x1ae   : > { %v1416_v30 = vmul.f32 %v8470_v29, %v1413_v26 }
 0x1b0   : > { %v1418_v32 = vsel %vm1417_vm2, %v1413_v26, %v1416_v30  ;;  %v1454_v30 = vld [vmem:[%s9946_s23 + $0x18] sm:$0xff] }
 0x1b1   : > { %v8472_v33 = vpop.eup %8471  ;;  %v1421_v34 = vsel %vm1419_vm3, %v1420_v31, %v1418_v32 }
 0x1b2   : > { %v1423_v35 = vmul.f32 %v8472_v33, %v1414_v28  ;;  %v1429_v36 = vadd.f32 1e-06, %v1421_v34 }
 0x1b4   : > { %v1425_v38 = vsel %vm1424_vm4, %v1414_v28, %v1423_v35  ;;  %8473 = vrcp.f32 %v1429_v36  ;;  %v1453_v35 = vld [vmem:[%s9946_s23 + $0x10] sm:$0xff] }
 0x1b5   : > { %v1428_v39 = vsel %vm1426_vm5, %v1427_v37, %v1425_v38 }
 0x1b6   : > { %v1430_v40 = vadd.f32 1e-06, %v1428_v39  ;;  %v1455_v39 = vld [vmem:[%s9946_s23 + $0x20] sm:$0xff] }
 0x1b8   : > { %8475 = vrcp.f32 %v1430_v40  ;;  %v1456_v40 = vld [vmem:[%s9946_s23 + $0x28] sm:$0xff] }
 0x1c1   : > { %v8474_v43 = vpop.eup %8473 }
 0x1c2   : > { %v1441_v45 = vmul.f32 %v8474_v43, %v1439_v42 }
 0x1c4   : > { %v1449_v47 = vadd.f32 %v7591_v44, %v1441_v45 }
 0x1c5   : > { %v8476_v48 = vpop.eup %8475 }
 0x1c6   : > { %v1442_v49 = vmul.f32 %v8476_v48, %v1440_v46  ;;  %8157 = vmatprep.mubr.msk.f32.mxu0 %vm1393_vm1, %v1449_v47  ;;  %8168 = vmatprep.mubr.msk.f32.mxu1 %vm1393_vm1, %v1449_v47  ;;  %v1457_v48 = vld [vmem:[%s9946_s23 + $0x30] sm:$0xff] }
 0x1c8   : > { %v1450_v50 = vadd.f32 %v7591_v44, %v1442_v49 }
 0x1ca   : > { %8158 = vmatmul.mubr.msk.f32.vlgmr.msra.gmra.mxu0 %vm1393_vm1, %v1450_v50  ;;  %8169 = vmatmul.mubr.msk.f32.vlgmr.msra.gmra.mxu1 %vm1393_vm1, %v1450_v50 }
 0x1cb   : > { %8172 = vmatpush3.msra.mxu0 %v1472_v24  ;;  %8179 = vmatprep.mubr.msk.f32.mxu0 %vm1393_vm1, %v1449_v47  ;;  %v1452_v24 = vld [vmem:[%s9946_s23 + $0x8] sm:$0xff] }
 0x1cc   : > { %8173 = vmatprep.subr.mxu0 %v1471_v51  ;;  %8184 = vmatprep.mubr.msk.f32.mxu1 %vm8634_vm6, %v8633_v54 }
 0x1cd   : > { %8174 = vmatpush3.msra.mxu0 %v1471_v51 }
 0x1ce   : > { %8175 = vmatprep.subr.mxu0 %v1470_v52 }
 0x1cf   : > { %8176 = vmatpush3.msra.mxu0 %v1470_v52 }
 0x1d0   : > { %8177 = vmatprep.subr.mxu0 %v1469_v53 }
 0x1d1   : > { %8178 = vmatpush3.msra.mxu0 %v1469_v53 }
 0x1d2   : > { %8180 = vmatmul.mubr.msk.f32.vlgmr.msra.gmra.mxu0 %vm1393_vm1, %v1450_v50  ;;  %8192 = vmatprep.subr.mxu0 %v8633_v54 }
 0x1d3   : > { %8194 = vmatprep.mubr.msk.f32.mxu0 %vm8634_vm6, %v8633_v54 }
 0x28a   : > { %v8159_v56 = vpop.f32.mrf.mxu0  ;;  %v8170_v57 = vpop.f32.mrf.mxu1 }
 0x28b   : > { %v1644_v58 = vadd.f32 %v8170_v57, %v7595_v55  ;;  %v1563_v63 = vadd.f32 %v8159_v56, %v7592_v59 }
 0x28c   : > { %v1638_v60 = vpop.f32.mrf.mxu1  ;;  %v1557_v61 = vpop.f32.mrf.mxu0 }
 0x28d   : > { %v1639_v62 = vadd.f32 %v7595_v55, %v1638_v60  ;;  %1746 = vrot.lane.b32.xlu1 %v1644_v58, %s8635_s1  ;;  %v1558_v0 = vadd.f32 %v7592_v59, %v1557_v61  ;;  %v1458_v55 = vld [vmem:[%s9946_s23 + $0x38] sm:$0xff] }
 0x28f   : > { %1744 = vrot.lane.b32.xlu0 %v1639_v62, %s8635_s1  ;;  %8183 = vmatpush3.xpose.msk.msra.mxu1 %vm1776_vm7, %v1639_v62 }
 0x290   : > { %8187 = vmatprep.subr.mxu1 %v8633_v54 }
 0x291   : > { %1732 = vrot.lane.b32.xlu1 %v1563_v63, %s8635_s1 }
 0x292   : > { %8185 = vmatmul.mubr.msk.f32.vlgmr.msra.gmra.mxu1 %vm1776_vm7, %v1558_v0  ;;  %v8181_v10 = vpop.f32.mrf.mxu0 }
 0x293   : > { %1748 = vrot.lane.b32.xlu0 %v1639_v62, %s8636_s7  ;;  %8188 = vmatpush3.xpose.msk.msra.mxu1 %vm1776_vm7, %v1644_v58  ;;  %v8999_v18 = vadd.f32 %v8181_v10, %v7598_v14 }
 0x294   : > { %8189 = vmatprep.mubr.msk.f32.mxu1 %vm8634_vm6, %v8633_v54  ;;  %8197 = vmatprep.subr.mxu1 %v8633_v54  ;;  %v1719_v13 = vpop.f32.mrf.mxu0 }
 0x295   : > { %1750 = vrot.lane.b32.xlu1 %v1644_v58, %s8636_s7  ;;  %v8990_v15 = vadd.f32 %v7598_v14, %v1719_v13 }
 0x296   : > { %8190 = vmatmul.mubr.msk.f32.vlgmr.msra.gmra.mxu1 %vm1776_vm7, %v1563_v63 }
 0x297   : > { %1734 = vrot.lane.b32.xlu0 %v1558_v0, %s8636_s7  ;;  %8199 = vmatprep.mubr.msk.f32.mxu1 %vm8634_vm6, %v8633_v54 }
 0x299   : > { %1730 = vrot.lane.b32.xlu1 %v1558_v0, %s8635_s1 }
 0x29b   : > { %1752 = vrot.lane.b32.xlu0 %v1639_v62, %s8637_s11 }
 0x29d   : > { %1736 = vrot.lane.b32.xlu1 %v1563_v63, %s8636_s7 }
 0x29f   : > { %1738 = vrot.lane.b32.xlu0 %v1558_v0, %s8637_s11 }
 0x2a1   : > { %1754 = vrot.lane.b32.xlu1 %v1644_v58, %s8637_s11 }
 0x2a5   : > { %1740 = vrot.lane.b32.xlu1 %v1563_v63, %s8637_s11 }
 0x2ff   : > { %v1747_v1 = vpop.permute.xlu1 %1746 }
 0x300   : > { %8198 = vmatpush3.xpose.msk.msra.mxu1 %vm1776_vm7, %v1747_v1 }
 0x301   : > { %v1745_v4 = vpop.permute.xlu0 %1744  ;;  %8207 = vmatprep.subr.mxu1 %v8633_v54 }
 0x302   : > { %8193 = vmatpush3.xpose.msk.msra.mxu0 %vm1776_vm7, %v1745_v4 }
 0x303   : > { %v1733_v5 = vpop.permute.xlu1 %1732  ;;  %8202 = vmatprep.subr.mxu0 %v8633_v54 }
 0x304   : > { %8200 = vmatmul.mubr.msk.f32.vlgmr.msra.gmra.mxu1 %vm1776_vm7, %v1733_v5 }
 0x305   : > { %v1749_v6 = vpop.permute.xlu0 %1748  ;;  %8209 = vmatprep.mubr.msk.f32.mxu1 %vm8634_vm6, %v8633_v54 }
 0x307   : > { %v1751_v7 = vpop.permute.xlu1 %1750 }
 0x308   : > { %8208 = vmatpush3.xpose.msk.msra.mxu1 %vm1776_vm7, %v1751_v7 }
 0x309   : > { %v1735_v8 = vpop.permute.xlu0 %1734  ;;  %8217 = vmatprep.subr.mxu1 %v8633_v54 }
 0x30b   : > { %v1731_v9 = vpop.permute.xlu1 %1730 }
 0x30c   : > { %8195 = vmatmul.mubr.msk.f32.vlgmr.msra.gmra.mxu0 %vm1776_vm7, %v1731_v9 }
 0x30d   : > { %8203 = vmatpush3.xpose.msk.msra.mxu0 %vm1776_vm7, %v1749_v6  ;;  %v1753_v11 = vpop.permute.xlu0 %1752  ;;  %8204 = vmatprep.mubr.msk.f32.mxu0 %vm8634_vm6, %v8633_v54 }
 0x30e   : > { %8212 = vmatprep.subr.mxu0 %v8633_v54 }
 0x30f   : > { %v1737_v12 = vpop.permute.xlu1 %1736 }
 0x310   : > { %8205 = vmatmul.mubr.msk.f32.vlgmr.msra.gmra.mxu0 %vm1776_vm7, %v1735_v8  ;;  %8210 = vmatmul.mubr.msk.f32.vlgmr.msra.gmra.mxu1 %vm1776_vm7, %v1737_v12 }
 0x311   : > { %8213 = vmatpush3.xpose.msk.msra.mxu0 %vm1776_vm7, %v1753_v11  ;;  %8214 = vmatprep.mubr.msk.f32.mxu0 %vm8634_vm6, %v8633_v54  ;;  %v1739_v16 = vpop.permute.xlu0 %1738 }
 0x312   : > { %8222 = vmatprep.subr.mxu0 %v8633_v54  ;;  %8219 = vmatprep.mubr.msk.f32.mxu1 %vm8634_vm6, %v8633_v54 }
 0x313   : > { %v1755_v17 = vpop.permute.xlu1 %1754 }
 0x314   : > { %8215 = vmatmul.mubr.msk.f32.vlgmr.msra.gmra.mxu0 %vm1776_vm7, %v1739_v16  ;;  %8218 = vmatpush3.xpose.msk.msra.mxu1 %vm1776_vm7, %v1755_v17 }
 0x315   : > { %8223 = vmatpush3.msra.mxu0 %v8990_v15  ;;  %8227 = vmatprep.subr.mxu1 %v8633_v54 }
 0x316   : > { %8224 = vmatprep.mubr.msk.f32.mxu0 %vm8634_vm6, %v8633_v54  ;;  %8232 = vmatprep.subr.mxu0 %v8633_v54 }
 0x317   : > { %v1741_v19 = vpop.permute.xlu1 %1740 }
 0x318   : > { %8220 = vmatmul.mubr.msk.f32.vlgmr.msra.gmra.mxu1 %vm1776_vm7, %v1741_v19 }
 0x319   : > { %8228 = vmatpush3.msra.mxu1 %v8999_v18  ;;  %8229 = vmatprep.mubr.msk.f32.mxu1 %vm8634_vm6, %v8633_v54 }
 0x31a   : > { %8237 = vmatprep.subr.mxu1 %v8633_v54 }
 0x352   : > { %v1847_v21 = vpop.f32.mrf.mxu1 }
 0x353   : > { %v1848_v22 = vadd.f32 %v1847_v21, %v1451_v20 }
 0x354   : > { %v8186_v23 = vpop.f32.mrf.mxu1 }
 0x355   : > { %v2369_v25 = vsel %vm1776_vm7, %v1848_v22, -inf }
 0x356   : > { %2370 = vmax.xlane.f32.xlu0 %v2369_v25  ;;  %v1921_v26 = vpop.f32.mrf.mxu1 }
 0x357   : > { %v1922_v27 = vadd.f32 %v1921_v26, %v1452_v24 }
 0x358   : > { %v8191_v28 = vpop.f32.mrf.mxu1 }
 0x359   : > { %v2372_v29 = vsel %vm1776_vm7, %v1922_v27, -inf }
 0x35a   : > { %2373 = vmax.xlane.f32.xlu1 %v2372_v29 }
 0x3c4   : > { %v2069_v31 = vpop.f32.mrf.mxu1 }
 0x3c5   : > { %v2070_v32 = vadd.f32 %v2069_v31, %v1454_v30 }
 0x3c6   : > { %v8201_v33 = vpop.f32.mrf.mxu1 }
 0x3c7   : > { %v2378_v34 = vsel %vm1776_vm7, %v2070_v32, -inf }
 0x3c8   : > { %2379 = vmax.xlane.f32.xlu0 %v2378_v34 }
 0x3cc   : > { %v1995_v36 = vpop.f32.mrf.mxu0 }
 0x3cd   : > { %v1996_v37 = vadd.f32 %v1995_v36, %v1453_v35 }
 0x3ce   : > { %v8196_v38 = vpop.f32.mrf.mxu0 }
 0x3cf   : > { %v2375_v41 = vsel %vm1776_vm7, %v1996_v37, -inf }
 0x3d0   : > { %v2143_v42 = vpop.f32.mrf.mxu0  ;;  %2376 = vmax.xlane.f32.xlu0 %v2375_v41  ;;  %v2217_v43 = vpop.f32.mrf.mxu1 }
 0x3d1   : > { %v2144_v44 = vadd.f32 %v2143_v42, %v1455_v39  ;;  %v2218_v45 = vadd.f32 %v2217_v43, %v1456_v40 }
 0x3d2   : > { %v8206_v46 = vpop.f32.mrf.mxu0  ;;  %v8211_v47 = vpop.f32.mrf.mxu1 }
 0x3d3   : > { %v2381_v49 = vsel %vm1776_vm7, %v2144_v44, -inf  ;;  %v2384_v50 = vsel %vm1776_vm7, %v2218_v45, -inf }
 0x3d4   : > { %v2291_v51 = vpop.f32.mrf.mxu0  ;;  %2382 = vmax.xlane.f32.xlu0 %v2381_v49  ;;  %2385 = vmax.xlane.f32.xlu1 %v2384_v50 }
 0x3d5   : > { %v2292_v52 = vadd.f32 %v2291_v51, %v1457_v48 }
 0x3d6   : > { %v8216_v53 = vpop.f32.mrf.mxu0 }
 0x3d7   : > { %v2387_v56 = vsel %vm1776_vm7, %v2292_v52, -inf }
 0x3d8   : > { %2388 = vmax.xlane.f32.xlu0 %v2387_v56  ;;  %v2365_v57 = vpop.f32.mrf.mxu1 }
 0x3d9   : > { %v2366_v58 = vadd.f32 %v2365_v57, %v1458_v55 }
 0x3da   : > { %v8221_v59 = vpop.f32.mrf.mxu1 }
 0x3db   : > { %v2390_v60 = vsel %vm1776_vm7, %v2366_v58, -inf }
 0x3dc   : > { %2391 = vmax.xlane.f32.xlu1 %v2390_v60 }
 0x3df   : > { %v2371_v61 = vpop.xlane.xlu0 %2370 }
 0x3e0   : > { %v2393_v62 = vsub.f32 %v1848_v22, %v2371_v61 }
 0x3e2   : > { %v2401_v63 = vmul.f32 1.442695, %v2393_v62 }
 0x3e3   : > { %v2374_v0 = vpop.xlane.xlu1 %2373 }
 0x3e4   : > { %8477 = vpow2.f32 %v2401_v63  ;;  %v2394_v1 = vsub.f32 %v1922_v27, %v2374_v0 }
 0x3e6   : > { %v2403_v4 = vmul.f32 1.442695, %v2394_v1  ;;  %v1474_v1 = vld [vmem:[%s9947_s10] sm:$0xff] }
 0x3e8   : > { %8479 = vpow2.f32 %v2403_v4 }
 0x3ed   : > { %1760 = vrot.lane.b32.xlu1 %v8999_v18, %s8635_s1 }
 0x3ee   : > { %1758 = vrot.lane.b32.xlu0 %v8990_v15, %s8635_s1 }
 0x3f1   : > { %1764 = vrot.lane.b32.xlu1 %v8990_v15, %s8636_s7  ;;  %v8478_v5 = vpop.eup %8477 }
 0x3f2   : > { %v2417_v6 = vsel %vm1776_vm7, %v8478_v5, 0.0 }
 0x3f5   : > { %1766 = vrot.lane.b32.xlu1 %v8999_v18, %s8636_s7  ;;  %v8480_v7 = vpop.eup %8479 }
 0x3f6   : > { %v2420_v8 = vsel %vm1776_vm7, %v8480_v7, 0.0 }
 0x40d   : > { %2418 = vadd.xlane.f32.xlu0 %v2417_v6 }
 0x419   : > { %2421 = vadd.xlane.f32.xlu1 %v2420_v8 }
 0x451   : > { %v2380_v9 = vpop.xlane.xlu0 %2379 }
 0x452   : > { %v2396_v10 = vsub.f32 %v2070_v32, %v2380_v9  ;;  %v1475_v9 = vld [vmem:[%s9947_s10 + $0x8] sm:$0xff] }
 0x454   : > { %v2407_v11 = vmul.f32 1.442695, %v2396_v10  ;;  %v1476_v10 = vld [vmem:[%s9947_s10 + $0x10] sm:$0xff] }
 0x456   : > { %8481 = vpow2.f32 %v2407_v11  ;;  %v1477_v11 = vld [vmem:[%s9947_s10 + $0x18] sm:$0xff] }
 0x459   : > { %v2377_v12 = vpop.xlane.xlu0 %2376 }
 0x45a   : > { %v2395_v13 = vsub.f32 %v1996_v37, %v2377_v12 }
 0x45c   : > { %v2405_v14 = vmul.f32 1.442695, %v2395_v13 }
 0x45d   : > { %v2383_v16 = vpop.xlane.xlu0 %2382  ;;  %v2386_v17 = vpop.xlane.xlu1 %2385 }
 0x45e   : > { %8483 = vpow2.f32 %v2405_v14  ;;  %v2397_v19 = vsub.f32 %v2144_v44, %v2383_v16  ;;  %v2398_v20 = vsub.f32 %v2218_v45, %v2386_v17 }
 0x460   : > { %v2409_v21 = vmul.f32 1.442695, %v2397_v19  ;;  %v2411_v22 = vmul.f32 1.442695, %v2398_v20 }
 0x461   : > { %v2389_v23 = vpop.xlane.xlu0 %2388 }
 0x462   : > { %8485 = vpow2.f32 %v2409_v21  ;;  %v2399_v24 = vsub.f32 %v2292_v52, %v2389_v23 }
 0x463   : > { %v8482_v25 = vpop.eup %8481  ;;  %8487 = vpow2.f32 %v2411_v22 }
 0x464   : > { %v2413_v26 = vmul.f32 1.442695, %v2399_v24  ;;  %v2426_v27 = vsel %vm1776_vm7, %v8482_v25, 0.0 }
 0x465   : > { %2427 = vadd.xlane.f32.xlu1 %v2426_v27  ;;  %v2392_v28 = vpop.xlane.xlu1 %2391  ;;  %v1759_v41 = vpop.permute.xlu0 %1758 }
 0x466   : > { %8489 = vpow2.f32 %v2413_v26  ;;  %v2400_v29 = vsub.f32 %v2366_v58, %v2392_v28 }
 0x468   : > { %v2415_v30 = vmul.f32 1.442695, %v2400_v29 }
 0x469   : > { %v1761_v42 = vpop.permute.xlu1 %1760 }
 0x46a   : > { %8491 = vpow2.f32 %v2415_v30 }
 0x46b   : > { %v8484_v31 = vpop.eup %8483 }
 0x46c   : > { %v2423_v32 = vsel %vm1776_vm7, %v8484_v31, 0.0 }
 0x46d   : > { %2424 = vadd.xlane.f32.xlu0 %v2423_v32  ;;  %v1765_v44 = vpop.permute.xlu1 %1764 }
 0x46f   : > { %v8486_v33 = vpop.eup %8485 }
 0x470   : > { %v8488_v34 = vpop.eup %8487  ;;  %v2429_v35 = vsel %vm1776_vm7, %v8486_v33, 0.0 }
 0x471   : > { %2430 = vadd.xlane.f32.xlu0 %v2429_v35  ;;  %v2432_v36 = vsel %vm1776_vm7, %v8488_v34, 0.0  ;;  %v1767_v45 = vpop.permute.xlu1 %1766 }
 0x472   : > { %2433 = vadd.xlane.f32.xlu1 %v2432_v36 }
 0x473   : > { %v9036_v37 = vpop.eup %8489 }
 0x474   : > { %v2435_v38 = vsel %vm1776_vm7, %v9036_v37, 0.0 }
 0x475   : > { %2436 = vadd.xlane.f32.xlu0 %v2435_v38 }
 0x477   : > { %v9040_v39 = vpop.eup %8491 }
 0x478   : > { %v2438_v40 = vsel %vm1776_vm7, %v9040_v39, 0.0 }
 0x479   : > { %2439 = vadd.xlane.f32.xlu1 %v2438_v40 }
 0x48a   : > { %1772 = vrot.lane.b32.xlu1 %v8999_v18, %s8637_s11 }
 0x48b   : > { %1770 = vrot.lane.b32.xlu0 %v8990_v15, %s8637_s11 }
 0x496   : > { %v2419_v43 = vpop.xlane.xlu0 %2418 }
 0x497   : > { %8493 = vrcp.f32 %v2419_v43 }
 0x4a2   : > { %v2422_v46 = vpop.xlane.xlu1 %2421 }
 0x4a3   : > { %8495 = vrcp.f32 %v2422_v46  ;;  %v7633_v46 = vld [vmem:[%s9948_s9] ss:$0 sm:$0xff] }
 0x4a4   : > { %v8494_v47 = vpop.eup %8493 }
 0x4a5   : > { %v2449_v48 = vmul.f32 %v8494_v47, %v8478_v5 }
 0x4a7   : > { %8225 = vmatmul.mubr.msk.f32.vlgmr.msra.gmra.mxu0 %vm1776_vm7, %v2449_v48 }
 0x4a8   : > { %8233 = vmatpush3.msra.mxu0 %v1759_v41  ;;  %8234 = vmatprep.mubr.msk.f32.mxu0 %vm8634_vm6, %v8633_v54 }
 0x4a9   : > { %8242 = vmatprep.subr.mxu0 %v8633_v54 }
 0x4b0   : > { %v8496_v18 = vpop.eup %8495 }
 0x4b1   : > { %v2450_v15 = vmul.f32 %v8496_v18, %v8480_v7 }
 0x4b3   : > { %8230 = vmatmul.mubr.msk.f32.vlgmr.msra.gmra.mxu1 %vm1776_vm7, %v2450_v15 }
 0x4b4   : > { %8238 = vmatpush3.msra.mxu1 %v1761_v42  ;;  %8239 = vmatprep.mubr.msk.f32.mxu1 %vm8634_vm6, %v8633_v54 }
 0x4b5   : > { %8247 = vmatprep.subr.mxu1 %v8633_v54 }
 0x4ee   : > { %v2428_v49 = vpop.xlane.xlu1 %2427 }
 0x4ef   : > { %8497 = vrcp.f32 %v2428_v49 }
 0x4f6   : > { %v2425_v50 = vpop.xlane.xlu0 %2424 }
 0x4f7   : > { %8499 = vrcp.f32 %v2425_v50 }
 0x4fa   : > { %v2431_v51 = vpop.xlane.xlu0 %2430 }
 0x4fb   : > { %8501 = vrcp.f32 %v2431_v51  ;;  %v2434_v52 = vpop.xlane.xlu1 %2433 }
 0x4fc   : > { %v8498_v53 = vpop.eup %8497  ;;  %8503 = vrcp.f32 %v2434_v52 }
 0x4fd   : > { %v2452_v55 = vmul.f32 %v8498_v53, %v8482_v25 }
 0x4fe   : > { %v2437_v56 = vpop.xlane.xlu0 %2436 }
 0x4ff   : > { %8505 = vrcp.f32 %v2437_v56  ;;  %8240 = vmatmul.mubr.msk.f32.vlgmr.msra.gmra.mxu1 %vm1776_vm7, %v2452_v55 }
 0x500   : > { %8248 = vmatpush3.msra.mxu1 %v1767_v45  ;;  %8249 = vmatprep.mubr.msk.f32.mxu1 %vm8634_vm6, %v8633_v54 }
 0x501   : > { %8257 = vmatprep.subr.mxu1 %v8633_v54 }
 0x502   : > { %v2440_v57 = vpop.xlane.xlu1 %2439  ;;  %v1771_v0 = vpop.permute.xlu0 %1770 }
 0x503   : > { %8507 = vrcp.f32 %v2440_v57 }
 0x504   : > { %v8500_v58 = vpop.eup %8499 }
 0x505   : > { %v2451_v59 = vmul.f32 %v8500_v58, %v8484_v31 }
 0x506   : > { %v1773_v5 = vpop.permute.xlu1 %1772 }
 0x507   : > { %8235 = vmatmul.mubr.msk.f32.vlgmr.msra.gmra.mxu0 %vm1776_vm7, %v2451_v59 }
 0x508   : > { %v8502_v60 = vpop.eup %8501  ;;  %8243 = vmatpush3.msra.mxu0 %v1765_v44  ;;  %8244 = vmatprep.mubr.msk.f32.mxu0 %vm8634_vm6, %v8633_v54 }
 0x509   : > { %v8504_v61 = vpop.eup %8503  ;;  %8252 = vmatprep.subr.mxu0 %v8633_v54  ;;  %v2453_v62 = vmul.f32 %v8502_v60, %v8486_v33 }
 0x50a   : > { %v2454_v63 = vmul.f32 %v8504_v61, %v8488_v34 }
 0x50b   : > { %8245 = vmatmul.mubr.msk.f32.vlgmr.msra.gmra.mxu0 %vm1776_vm7, %v2453_v62 }
 0x50c   : > { %v8506_v4 = vpop.eup %8505  ;;  %8250 = vmatmul.mubr.msk.f32.vlgmr.msra.gmra.mxu1 %vm1776_vm7, %v2454_v63  ;;  %8253 = vmatpush3.msra.mxu0 %v1771_v0 }
 0x50d   : > { %8258 = vmatpush3.msra.mxu1 %v1773_v5  ;;  %8254 = vmatprep.mubr.msk.f32.mxu0 %vm8634_vm6, %v8633_v54  ;;  %v2455_v6 = vmul.f32 %v8506_v4, %v9036_v37  ;;  %v3465_v4 = vld [vmem:[%s8864_s24 + $0x18] sm:$0xff]  ;;  %v3464_v5 = vld [vmem:[%s8864_s24 + $0x10] sm:$0xff] }
 0x50e   : > { %8259 = vmatprep.mubr.msk.f32.mxu1 %vm8634_vm6, %v8633_v54  ;;  %8262 = vmatprep.subr.mxu0 %v1474_v1 }
 0x50f   : > { %8255 = vmatmul.mubr.msk.f32.vlgmr.msra.gmra.mxu0 %vm1776_vm7, %v2455_v6  ;;  %8267 = vmatprep.subr.mxu1 %v1475_v9  ;;  %v3463_v6 = vld [vmem:[%s8864_s24 + $0x8] sm:$0xff] }
 0x510   : > { %v8508_v7 = vpop.eup %8507  ;;  %8263 = vmatpush3.msra.mxu0 %v1474_v1 }
 0x511   : > { %v2456_v8 = vmul.f32 %v8508_v7, %v9040_v39  ;;  %8272 = vmatprep.subr.mxu0 %v1476_v10  ;;  %v3462_v7 = vld [vmem:[%s8864_s24] sm:$0xff]  ;;  %s9950_s24 = sld [smem:[#allocation12_spill]] }
 0x513   : > { %8260 = vmatmul.mubr.msk.f32.vlgmr.msra.gmra.mxu1 %vm1776_vm7, %v2456_v8  ;;  %v3447_v8 = vld [vmem:[%s9949_s17] sm:$0xff] }
 0x514   : > { %8268 = vmatpush3.msra.mxu1 %v1475_v9  ;;  %v9121_v9 = vld [vmem:[%s9949_s17 + $0x8] sm:$0xff] }
 0x515   : > { %8277 = vmatprep.subr.mxu1 %v1477_v11 }
 0x517   : > { %s9953_s29 = scalar_lea.vmem %s9950_s24, %s8823_s0 }
 0x567   : > { %v2526_v12 = vpop.f32.mrf.mxu0 }
 0x568   : > { %8264 = vmatprep.mubr.msk.f32.mxu0 %vm1776_vm7, %v2526_v12  ;;  %v3458_v12 = vld [vmem:[%s8859_s5 + $0x8] sm:$0xff] }
 0x569   : > { %v8226_v13 = vpop.f32.mrf.mxu0 }
 0x56a   : > { %v3457_v13 = vld [vmem:[%s8859_s5] sm:$0xff] }
 0x573   : > { %v2599_v14 = vpop.f32.mrf.mxu1 }
 0x574   : > { %8265 = vmatmul.mubr.msk.f32.vlgmr.msra.gmra.mxu0 %vm1776_vm7, %v2599_v14 }
 0x575   : > { %v8231_v16 = vpop.f32.mrf.mxu1  ;;  %8273 = vmatpush3.msra.mxu0 %v1476_v10  ;;  %v3460_v10 = vld [vmem:[%s8859_s5 + $0x18] sm:$0xff] }
 0x576   : > { %8282 = vmatprep.subr.mxu0 %v3460_v10 }
 0x5bf   : > { %v2745_v17 = vpop.f32.mrf.mxu1 }
 0x5c1   : > { %v8241_v19 = vpop.f32.mrf.mxu1 }
 0x5c7   : > { %v2672_v20 = vpop.f32.mrf.mxu0 }
 0x5c8   : > { %8269 = vmatprep.mubr.msk.f32.mxu1 %vm1776_vm7, %v2672_v20 }
 0x5c9   : > { %v8236_v21 = vpop.f32.mrf.mxu0  ;;  %8270 = vmatmul.mubr.msk.f32.vlgmr.msra.gmra.mxu1 %vm1776_vm7, %v2745_v17 }
 0x5ca   : > { %8278 = vmatpush3.msra.mxu1 %v1477_v11  ;;  %v3459_v11 = vld [vmem:[%s8859_s5 + $0x10] sm:$0xff] }
 0x5cb   : > { %v2818_v22 = vpop.f32.mrf.mxu0  ;;  %8293 = vmatprep.subr.mxu1 %v3465_v4 }
 0x5cc   : > { %v2891_v23 = vpop.f32.mrf.mxu1  ;;  %8274 = vmatprep.mubr.msk.f32.mxu0 %vm1776_vm7, %v2818_v22 }
 0x5cd   : > { %v8246_v24 = vpop.f32.mrf.mxu0  ;;  %8275 = vmatmul.mubr.msk.f32.vlgmr.msra.gmra.mxu0 %vm1776_vm7, %v2891_v23 }
 0x5ce   : > { %v8251_v25 = vpop.f32.mrf.mxu1  ;;  %8283 = vmatpush3.msra.mxu0 %v3460_v10 }
 0x5cf   : > { %v2964_v26 = vpop.f32.mrf.mxu0  ;;  %8284 = vmatprep.subr.mxu0 %v3459_v11 }
 0x5d0   : > { %8279 = vmatprep.mubr.msk.f32.mxu1 %vm1776_vm7, %v2964_v26  ;;  %8285 = vmatpush3.msra.mxu0 %v3459_v11 }
 0x5d1   : > { %v8256_v27 = vpop.f32.mrf.mxu0  ;;  %8286 = vmatprep.subr.mxu0 %v3458_v12 }
 0x5d2   : > { %8287 = vmatpush3.msra.mxu0 %v3458_v12 }
 0x5d3   : > { %v3037_v28 = vpop.f32.mrf.mxu1  ;;  %8288 = vmatprep.subr.mxu0 %v3457_v13 }
 0x5d4   : > { %8280 = vmatmul.mubr.msk.f32.vlgmr.msra.gmra.mxu1 %vm1776_vm7, %v3037_v28  ;;  %8289 = vmatpush3.msra.mxu0 %v3457_v13 }
 0x5d5   : > { %v8261_v29 = vpop.f32.mrf.mxu1  ;;  %8294 = vmatpush3.msra.mxu1 %v3465_v4  ;;  %8301 = vmatprep.mubr.msk.f32.mxu1 %vm1393_vm1, %v3447_v8 }
 0x5d6   : > { %8295 = vmatprep.subr.mxu1 %v3464_v5 }
 0x5d7   : > { %8296 = vmatpush3.msra.mxu1 %v3464_v5 }
 0x5d8   : > { %8297 = vmatprep.subr.mxu1 %v3463_v6 }
 0x5d9   : > { %8298 = vmatpush3.msra.mxu1 %v3463_v6 }
 0x5da   : > { %8299 = vmatprep.subr.mxu1 %v3462_v7 }
 0x5db   : > { %8300 = vmatpush3.msra.mxu1 %v3462_v7 }
 0x5dc   : > { %8302 = vmatmul.mubr.msk.f32.vlgmr.msra.gmra.mxu1 %vm1393_vm1, %v9121_v9  ;;  %8315 = vmatprep.subr.mxu1 %v8633_v54 }
 0x5dd   : > { %8317 = vmatprep.mubr.msk.f32.mxu1 %vm8634_vm6, %v8633_v54 }
 0x634   : > { %v8266_v30 = vpop.f32.mrf.mxu0 }
 0x635   : > { %v3372_v37 = vsel %vm1393_vm1, %v8266_v30, 0.0 }
 0x636   : > { %v3113_v32 = vpop.f32.mrf.mxu0 }
 0x637   : > { %v3365_v41 = vsel %vm1393_vm1, %v3113_v32, 0.0  ;;  %v7634_v32 = vld [vmem:[%s9953_s29] ss:$0 sm:$0xff] }
 0x689   : > { %v8271_v31 = vpop.f32.mrf.mxu1 }
 0x68a   : > { %v3373_v35 = vsel %vm1393_vm1, %v8271_v31, 0.0 }
 0x68b   : > { %v3194_v34 = vpop.f32.mrf.mxu1  ;;  %v3374_v40 = vadd.f32 %v3373_v35, %v3372_v37  ;;  %v7635_v35 = vld [vmem:[%s9954_s8] ss:$0 sm:$0xff] }
 0x68c   : > { %v3366_v38 = vsel %vm1393_vm1, %v3194_v34, 0.0 }
 0x68d   : > { %v8276_v33 = vpop.f32.mrf.mxu0  ;;  %v3367_v43 = vadd.f32 %v3366_v38, %v3365_v41 }
 0x68e   : > { %v3375_v39 = vsel %vm1393_vm1, %v8276_v33, 0.0 }
 0x68f   : > { %v3275_v36 = vpop.f32.mrf.mxu0  ;;  %v3376_v44 = vadd.f32 %v3375_v39, %v3374_v40 }
 0x690   : > { %v3368_v42 = vsel %vm1393_vm1, %v3275_v36, 0.0 }
 0x691   : > { %v3369_v48 = vadd.f32 %v3368_v42, %v3367_v43  ;;  %v7639_v43 = vld [vmem:[%s1346_s30] ss:$0 sm:$0xff] }
 0x694   : > { %v8281_v45 = vpop.f32.mrf.mxu1 }
 0x695   : > { %v3377_v47 = vsel %vm1393_vm1, %v8281_v45, 0.0 }
 0x696   : > { %v3378_v18 = vadd.f32 %v3377_v47, %v3376_v44  ;;  %v3356_v15 = vpop.f32.mrf.mxu1  ;;  %v3470_v47 = vld [vmem:[%s8869_s25 + $0x18] sm:$0xff] }
 0x697   : > { %v3370_v49 = vsel %vm1393_vm1, %v3356_v15, 0.0  ;;  %8304 = vmatprep.subr.mxu0 %v3470_v47  ;;  %v3467_v15 = vld [vmem:[%s8869_s25] sm:$0xff] }
 0x698   : > { %v3386_v50 = vadd.f32 %v7633_v46, %v3378_v18  ;;  %v3371_v51 = vadd.f32 %v3370_v49, %v3369_v48  ;;  %v3469_v48 = vld [vmem:[%s8869_s25 + $0x10] sm:$0xff]  ;;  %v3468_v18 = vld [vmem:[%s8869_s25 + $0x8] sm:$0xff] }
 0x69a   : > { %v3385_v52 = vadd.f32 %v7633_v46, %v3371_v51  ;;  %v9098_v53 = vadd.f32 %v3386_v50, %v8897_v3  ;;  %v7636_v50 = vld [vmem:[%s1338_s19] ss:$0 sm:$0xff]  ;;  %s9957_s19 = sld [smem:[#allocation9_spill]] }
 0x69c   : > { %v3394_v55 = vsel %vm1393_vm1, %v9098_v53, 0.0  ;;  %v9103_v56 = vadd.f32 %v3385_v52, %v8895_v2  ;;  %v8303_v42 = vpop.f32.mrf.mxu1 }
 0x69d   : > { %3395 = vadd.xlane.f32.xlu1 %v3394_v55  ;;  %v3648_v44 = vadd.f32 %v8303_v42, %v7639_v43 }
 0x69e   : > { %v3391_v57 = vsel %vm1393_vm1, %v9103_v56, 0.0  ;;  %v3642_v45 = vpop.f32.mrf.mxu1 }
 0x69f   : > { %3392 = vadd.xlane.f32.xlu0 %v3391_v57  ;;  %v3643_v46 = vadd.f32 %v7639_v43, %v3642_v45 }
 0x6a0   : > { %v7645_v10 = vld [vmem:[%s9957_s19] ss:$0 sm:$0xff] }
 0x6a1   : > { %8316 = vmatpush3.xpose.msk.msra.mxu1 %vm1776_vm7, %v3643_v46 }
 0x6a2   : > { %8320 = vmatprep.subr.mxu1 %v8633_v54 }
 0x6ae   : > { %3750 = vrot.lane.b32.xlu1 %v3648_v44, %s8635_s1 }
 0x6b2   : > { %3754 = vrot.lane.b32.xlu1 %v3648_v44, %s8636_s7 }
 0x726   : > { %v3396_v58 = vpop.xlane.xlu1 %3395 }
 0x727   : > { %v3398_v59 = vmul.f32 0.03125, %v3396_v58 }
 0x728   : > { %v3393_v60 = vpop.xlane.xlu0 %3392 }
 0x729   : > { %v3397_v61 = vmul.f32 0.03125, %v3393_v60  ;;  %v9108_v3 = vsub.f32 %v9098_v53, %v3398_v59 }
 0x72a   : > { %v3751_v58 = vpop.permute.xlu1 %3750 }
 0x72b   : > { %v3399_v62 = vsub.f32 %v9103_v56, %v3397_v61  ;;  %v3402_v0 = vmul.f32 %v9108_v3, %v9108_v3  ;;  %v3436_v37 = vmul.f32 %v7634_v32, %v9108_v3 }
 0x72d   : > { %v3401_v2 = vmul.f32 %v3399_v62, %v3399_v62  ;;  %v3406_v1 = vsel %vm1393_vm1, %v3402_v0, 0.0  ;;  %v3435_v33 = vmul.f32 %v7634_v32, %v3399_v62  ;;  %v7642_v0 = vld [vmem:[%s1354_s16] ss:$0 sm:$0xff]  ;;  %v7649_v32 = vld [vmem:[%s9957_s19 + $0x4] ss:$0 sm:$0xff]  ;;  %s9960_s16 = sld [smem:[#allocation15_spill]] }
 0x72e   : > { %v3755_v60 = vpop.permute.xlu1 %3754 }
 0x72f   : > { %v3403_v63 = vsel %vm1393_vm1, %v3401_v2, 0.0 }
 0x730   : > { %3404 = vadd.xlane.f32.xlu0 %v3403_v63 }
 0x733   : > { %s9962_s20 = scalar_lea.vmem %s9960_s16, %s8823_s0 }
 0x734   : > { %3407 = vadd.xlane.f32.xlu0 %v3406_v1 }
 0x74a   : > { %3748 = vrot.lane.b32.xlu0 %v3643_v46, %s8635_s1 }
 0x74e   : > { %3752 = vrot.lane.b32.xlu0 %v3643_v46, %s8636_s7 }
 0x752   : > { %3756 = vrot.lane.b32.xlu0 %v3643_v46, %s8637_s11  ;;  %v7652_v46 = vld [vmem:[%s9957_s19 + $0x7] ss:$0 sm:$0xff] }
 0x7b9   : > { %v3405_v14 = vpop.xlane.xlu0 %3404 }
 0x7ba   : > { %v3409_v16 = vmul.f32 0.032258064, %v3405_v14  ;;  %v7646_v14 = vld [vmem:[%s9957_s19 + $0x1] ss:$0 sm:$0xff] }
 0x7bc   : > { %8509 = vrsqrt.f32 %v3409_v16  ;;  %vm3413_vm8 = vcmp.eq.f32.partialorder %v3409_v16, inf  ;;  %v3416_v22 = vand.u32 2147483648, %v3409_v16  ;;  %vm3415_vm9 = vcmp.eq.f32.partialorder %v3409_v16, 0.0 }
 0x7bd   : > { %v3408_v17 = vpop.xlane.xlu0 %3407 }
 0x7be   : > { %v3410_v19 = vmul.f32 0.032258064, %v3408_v17 }
 0x7c0   : > { %8511 = vrsqrt.f32 %v3410_v19  ;;  %vm3420_vm10 = vcmp.eq.f32.partialorder %v3410_v19, inf  ;;  %v3423_v28 = vand.u32 2147483648, %v3410_v19  ;;  %vm3422_vm11 = vcmp.eq.f32.partialorder %v3410_v19, 0.0 }
 0x7c1   : > { %v3749_v49 = vpop.permute.xlu0 %3748 }
 0x7c5   : > { %v3753_v59 = vpop.permute.xlu0 %3752 }
 0x7c9   : > { %v8510_v20 = vpop.eup %8509  ;;  %v3757_v3 = vpop.permute.xlu0 %3756 }
 0x7ca   : > { %v3412_v21 = vmul.f32 %v8510_v20, %v3409_v16 }
 0x7cc   : > { %v3414_v23 = vsel %vm3413_vm8, %v3409_v16, %v3412_v21 }
 0x7cd   : > { %v8512_v24 = vpop.eup %8511  ;;  %v3417_v25 = vsel %vm3415_vm9, %v3416_v22, %v3414_v23  ;;  %v7648_v22 = vld [vmem:[%s9957_s19 + $0x3] ss:$0 sm:$0xff] }
 0x7ce   : > { %v3425_v26 = vadd.f32 1e-06, %v3417_v25  ;;  %v3419_v27 = vmul.f32 %v8512_v24, %v3410_v19 }
 0x7d0   : > { %8513 = vrcp.f32 %v3425_v26  ;;  %v3421_v29 = vsel %vm3420_vm10, %v3410_v19, %v3419_v27  ;;  %v7647_v26 = vld [vmem:[%s9957_s19 + $0x2] ss:$0 sm:$0xff] }
 0x7d1   : > { %v3424_v30 = vsel %vm3422_vm11, %v3423_v28, %v3421_v29 }
 0x7d2   : > { %v3426_v31 = vadd.f32 1e-06, %v3424_v30 }
 0x7d4   : > { %8515 = vrcp.f32 %v3426_v31  ;;  %v7650_v31 = vld [vmem:[%s9957_s19 + $0x5] ss:$0 sm:$0xff] }
 0x7dd   : > { %v8514_v34 = vpop.eup %8513 }
 0x7de   : > { %v3437_v36 = vmul.f32 %v8514_v34, %v3435_v33 }
 0x7e0   : > { %v3445_v38 = vadd.f32 %v7635_v35, %v3437_v36 }
 0x7e1   : > { %v8516_v39 = vpop.eup %8515 }
 0x7e2   : > { %v3438_v40 = vmul.f32 %v8516_v39, %v3436_v37  ;;  %8290 = vmatprep.mubr.msk.f32.mxu0 %vm1393_vm1, %v3445_v38 }
 0x7e4   : > { %v3446_v41 = vadd.f32 %v7635_v35, %v3438_v40  ;;  %v7651_v40 = vld [vmem:[%s9957_s19 + $0x6] ss:$0 sm:$0xff] }
 0x7e6   : > { %8291 = vmatmul.mubr.msk.f32.vlgmr.msra.gmra.mxu0 %vm1393_vm1, %v3446_v41 }
 0x7e7   : > { %8312 = vmatprep.mubr.msk.f32.mxu0 %vm1393_vm1, %v3447_v8  ;;  %8305 = vmatpush3.msra.mxu0 %v3470_v47 }
 0x7e8   : > { %8306 = vmatprep.subr.mxu0 %v3469_v48 }
 0x7e9   : > { %8307 = vmatpush3.msra.mxu0 %v3469_v48 }
 0x7ea   : > { %8308 = vmatprep.subr.mxu0 %v3468_v18 }
 0x7eb   : > { %8309 = vmatpush3.msra.mxu0 %v3468_v18 }
 0x7ec   : > { %8310 = vmatprep.subr.mxu0 %v3467_v15 }
 0x7ed   : > { %8311 = vmatpush3.msra.mxu0 %v3467_v15 }
 0x7ee   : > { %8325 = vmatprep.subr.mxu0 %v8633_v54  ;;  %8313 = vmatmul.mubr.msk.f32.vlgmr.msra.gmra.mxu0 %vm1393_vm1, %v9121_v9 }
 0x7ef   : > { %8327 = vmatprep.mubr.msk.f32.mxu0 %vm8634_vm6, %v8633_v54  ;;  %8326 = vmatpush3.xpose.msk.msra.mxu0 %vm1776_vm7, %v3749_v49 }
 0x7f0   : > { %8335 = vmatprep.subr.mxu0 %v8633_v54 }
 0x8a6   : > { %v8292_v51 = vpop.f32.mrf.mxu0 }
 0x8a7   : > { %v3561_v52 = vadd.f32 %v8292_v51, %v7636_v50 }
 0x8a8   : > { %v3555_v55 = vpop.f32.mrf.mxu0 }
 0x8a9   : > { %v3556_v57 = vadd.f32 %v7636_v50, %v3555_v55  ;;  %3736 = vrot.lane.b32.xlu1 %v3561_v52, %s8635_s1 }
 0x8ab   : > { %3738 = vrot.lane.b32.xlu0 %v3556_v57, %s8636_s7  ;;  %8318 = vmatmul.mubr.msk.f32.vlgmr.msra.gmra.mxu1 %vm1776_vm7, %v3556_v57 }
 0x8ac   : > { %8321 = vmatpush3.xpose.msk.msra.mxu1 %vm1776_vm7, %v3648_v44  ;;  %8322 = vmatprep.mubr.msk.f32.mxu1 %vm8634_vm6, %v8633_v54 }
 0x8ad   : > { %3734 = vrot.lane.b32.xlu1 %v3556_v57, %s8635_s1  ;;  %8330 = vmatprep.subr.mxu1 %v8633_v54 }
 0x8ae   : > { %v8314_v5 = vpop.f32.mrf.mxu0 }
 0x8af   : > { %3742 = vrot.lane.b32.xlu0 %v3556_v57, %s8637_s11  ;;  %8323 = vmatmul.mubr.msk.f32.vlgmr.msra.gmra.mxu1 %vm1776_vm7, %v3561_v52  ;;  %v9207_v6 = vadd.f32 %v8314_v5, %v7642_v0 }
 0x8b0   : > { %8331 = vmatpush3.xpose.msk.msra.mxu1 %vm1776_vm7, %v3751_v58  ;;  %8332 = vmatprep.mubr.msk.f32.mxu1 %vm8634_vm6, %v8633_v54  ;;  %v3723_v8 = vpop.f32.mrf.mxu0 }
 0x8b1   : > { %3740 = vrot.lane.b32.xlu1 %v3561_v52, %s8636_s7  ;;  %8340 = vmatprep.subr.mxu1 %v8633_v54  ;;  %v9217_v9 = vadd.f32 %v7642_v0, %v3723_v8 }
 0x8b5   : > { %3758 = vrot.lane.b32.xlu1 %v3648_v44, %s8637_s11 }
 0x8b9   : > { %3744 = vrot.lane.b32.xlu1 %v3561_v52, %s8637_s11 }
 0x91b   : > { %v3737_v61 = vpop.permute.xlu1 %3736 }
 0x91c   : > { %8333 = vmatmul.mubr.msk.f32.vlgmr.msra.gmra.mxu1 %vm1776_vm7, %v3737_v61 }
 0x91d   : > { %8341 = vmatpush3.xpose.msk.msra.mxu1 %vm1776_vm7, %v3755_v60  ;;  %8342 = vmatprep.mubr.msk.f32.mxu1 %vm8634_vm6, %v8633_v54  ;;  %v3739_v2 = vpop.permute.xlu0 %3738 }
 0x91e   : > { %8350 = vmatprep.subr.mxu1 %v8633_v54 }
 0x91f   : > { %v3735_v62 = vpop.permute.xlu1 %3734 }
 0x920   : > { %8328 = vmatmul.mubr.msk.f32.vlgmr.msra.gmra.mxu0 %vm1776_vm7, %v3735_v62 }
 0x921   : > { %8336 = vmatpush3.xpose.msk.msra.mxu0 %vm1776_vm7, %v3753_v59  ;;  %8337 = vmatprep.mubr.msk.f32.mxu0 %vm8634_vm6, %v8633_v54  ;;  %v3743_v1 = vpop.permute.xlu0 %3742 }
 0x922   : > { %8345 = vmatprep.subr.mxu0 %v8633_v54 }
 0x923   : > { %v3741_v63 = vpop.permute.xlu1 %3740 }
 0x924   : > { %8338 = vmatmul.mubr.msk.f32.vlgmr.msra.gmra.mxu0 %vm1776_vm7, %v3739_v2  ;;  %8343 = vmatmul.mubr.msk.f32.vlgmr.msra.gmra.mxu1 %vm1776_vm7, %v3741_v63 }
 0x925   : > { %8346 = vmatpush3.xpose.msk.msra.mxu0 %vm1776_vm7, %v3757_v3  ;;  %8347 = vmatprep.mubr.msk.f32.mxu0 %vm8634_vm6, %v8633_v54 }
 0x926   : > { %8352 = vmatprep.mubr.msk.f32.mxu1 %vm8634_vm6, %v8633_v54  ;;  %8355 = vmatprep.subr.mxu0 %v8633_v54 }
 0x927   : > { %v3759_v4 = vpop.permute.xlu1 %3758 }
 0x928   : > { %8348 = vmatmul.mubr.msk.f32.vlgmr.msra.gmra.mxu0 %vm1776_vm7, %v3743_v1  ;;  %8351 = vmatpush3.xpose.msk.msra.mxu1 %vm1776_vm7, %v3759_v4 }
 0x929   : > { %8360 = vmatprep.subr.mxu1 %v8633_v54  ;;  %8357 = vmatprep.mubr.msk.f32.mxu0 %vm8634_vm6, %v8633_v54 }
 0x92a   : > { %8356 = vmatpush3.msra.mxu0 %v9217_v9 }
 0x92b   : > { %v3745_v7 = vpop.permute.xlu1 %3744  ;;  %8365 = vmatprep.subr.mxu0 %v8633_v54 }
 0x92c   : > { %8353 = vmatmul.mubr.msk.f32.vlgmr.msra.gmra.mxu1 %vm1776_vm7, %v3745_v7 }
 0x92d   : > { %8361 = vmatpush3.msra.mxu1 %v9207_v6  ;;  %8362 = vmatprep.mubr.msk.f32.mxu1 %vm8634_vm6, %v8633_v54 }
 0x92e   : > { %8370 = vmatprep.subr.mxu1 %v8633_v54 }
 0x96b   : > { %v3898_v11 = vpop.f32.mrf.mxu1 }
 0x96c   : > { %v3899_v12 = vadd.f32 %v7645_v10, %v3898_v11 }
 0x96d   : > { %v8319_v13 = vpop.f32.mrf.mxu1 }
 0x96e   : > { %v4420_v16 = vsel %vm1776_vm7, %v3899_v12, -inf }
 0x96f   : > { %4421 = vmax.xlane.f32.xlu0 %v4420_v16  ;;  %v3972_v17 = vpop.f32.mrf.mxu1 }
 0x970   : > { %v3973_v19 = vadd.f32 %v7646_v14, %v3972_v17 }
 0x971   : > { %v8324_v20 = vpop.f32.mrf.mxu1 }
 0x972   : > { %v4423_v21 = vsel %vm1776_vm7, %v3973_v19, -inf }
 0x973   : > { %4424 = vmax.xlane.f32.xlu1 %v4423_v21 }
 0x9dc   : > { %v4120_v23 = vpop.f32.mrf.mxu1 }
 0x9dd   : > { %v4121_v24 = vadd.f32 %v7648_v22, %v4120_v23 }
 0x9de   : > { %v8334_v25 = vpop.f32.mrf.mxu1 }
 0x9df   : > { %v4429_v27 = vsel %vm1776_vm7, %v4121_v24, -inf }
 0x9e0   : > { %4430 = vmax.xlane.f32.xlu0 %v4429_v27  ;;  %v4046_v28 = vpop.f32.mrf.mxu0 }
 0x9e1   : > { %v4047_v29 = vadd.f32 %v7647_v26, %v4046_v28 }
 0x9e2   : > { %v8329_v30 = vpop.f32.mrf.mxu0 }
 0x9e3   : > { %v4426_v33 = vsel %vm1776_vm7, %v4047_v29, -inf }
 0x9e4   : > { %v4268_v34 = vpop.f32.mrf.mxu1  ;;  %4427 = vmax.xlane.f32.xlu0 %v4426_v33  ;;  %v4194_v35 = vpop.f32.mrf.mxu0 }
 0x9e5   : > { %v4269_v36 = vadd.f32 %v7650_v31, %v4268_v34  ;;  %v4195_v37 = vadd.f32 %v7649_v32, %v4194_v35 }
 0x9e6   : > { %v8339_v38 = vpop.f32.mrf.mxu0  ;;  %v8344_v39 = vpop.f32.mrf.mxu1 }
 0x9e7   : > { %v4435_v41 = vsel %vm1776_vm7, %v4269_v36, -inf  ;;  %v4432_v42 = vsel %vm1776_vm7, %v4195_v37, -inf }
 0x9e8   : > { %4436 = vmax.xlane.f32.xlu1 %v4435_v41  ;;  %4433 = vmax.xlane.f32.xlu0 %v4432_v42  ;;  %v4342_v43 = vpop.f32.mrf.mxu0 }
 0x9e9   : > { %v4343_v44 = vadd.f32 %v7651_v40, %v4342_v43 }
 0x9ea   : > { %v8349_v45 = vpop.f32.mrf.mxu0 }
 0x9eb   : > { %v4438_v47 = vsel %vm1776_vm7, %v4343_v44, -inf }
 0x9ec   : > { %v4416_v48 = vpop.f32.mrf.mxu1  ;;  %4439 = vmax.xlane.f32.xlu0 %v4438_v47 }
 0x9ed   : > { %v4417_v18 = vadd.f32 %v7652_v46, %v4416_v48 }
 0x9ee   : > { %v8354_v15 = vpop.f32.mrf.mxu1 }
 0x9ef   : > { %v4441_v49 = vsel %vm1776_vm7, %v4417_v18, -inf }
 0x9f0   : > { %4442 = vmax.xlane.f32.xlu1 %v4441_v49 }
 0x9f8   : > { %v4422_v50 = vpop.xlane.xlu0 %4421 }
 0x9f9   : > { %v4444_v51 = vsub.f32 %v3899_v12, %v4422_v50 }
 0x9fb   : > { %v4452_v52 = vmul.f32 1.442695, %v4444_v51 }
 0x9fc   : > { %v4425_v55 = vpop.xlane.xlu1 %4424 }
 0x9fd   : > { %8517 = vpow2.f32 %v4452_v52  ;;  %v4445_v57 = vsub.f32 %v3973_v19, %v4425_v55 }
 0x9ff   : > { %v4454_v58 = vmul.f32 1.442695, %v4445_v57  ;;  %v3472_v57 = vld [vmem:[%s8874_s6] sm:$0xff] }
 0xa01   : > { %3764 = vrot.lane.b32.xlu1 %v9207_v6, %s8635_s1  ;;  %8519 = vpow2.f32 %v4454_v58 }
 0xa02   : > { %3762 = vrot.lane.b32.xlu0 %v9217_v9, %s8635_s1 }
 0xa05   : > { %3768 = vrot.lane.b32.xlu1 %v9217_v9, %s8636_s7 }
 0xa09   : > { %3770 = vrot.lane.b32.xlu1 %v9207_v6, %s8636_s7 }
 0xa0a   : > { %v8518_v59 = vpop.eup %8517 }
 0xa0b   : > { %v4468_v60 = vsel %vm1776_vm7, %v8518_v59, 0.0 }
 0xa0e   : > { %v8520_v61 = vpop.eup %8519 }
 0xa0f   : > { %v4471_v3 = vsel %vm1776_vm7, %v8520_v61, 0.0 }
 0xa21   : > { %4469 = vadd.xlane.f32.xlu0 %v4468_v60 }
 0xa2d   : > { %4472 = vadd.xlane.f32.xlu1 %v4471_v3 }
 0xa69   : > { %v4431_v62 = vpop.xlane.xlu0 %4430 }
 0xa6a   : > { %v4447_v2 = vsub.f32 %v4121_v24, %v4431_v62  ;;  %v3473_v62 = vld [vmem:[%s8874_s6 + $0x8] sm:$0xff] }
 0xa6c   : > { %v4458_v63 = vmul.f32 1.442695, %v4447_v2  ;;  %v3474_v2 = vld [vmem:[%s8874_s6 + $0x10] sm:$0xff] }
 0xa6d   : > { %v4428_v0 = vpop.xlane.xlu0 %4427 }
 0xa6e   : > { %8521 = vpow2.f32 %v4458_v63  ;;  %v4446_v1 = vsub.f32 %v4047_v29, %v4428_v0  ;;  %v3475_v63 = vld [vmem:[%s8874_s6 + $0x18] sm:$0xff] }
 0xa70   : > { %v4456_v4 = vmul.f32 1.442695, %v4446_v1 }
 0xa71   : > { %v4437_v5 = vpop.xlane.xlu1 %4436  ;;  %v4434_v7 = vpop.xlane.xlu0 %4433 }
 0xa72   : > { %8523 = vpow2.f32 %v4456_v4  ;;  %v4449_v8 = vsub.f32 %v4269_v36, %v4437_v5  ;;  %v4448_v10 = vsub.f32 %v4195_v37, %v4434_v7 }
 0xa74   : > { %v4462_v11 = vmul.f32 1.442695, %v4449_v8  ;;  %v4460_v12 = vmul.f32 1.442695, %v4448_v10 }
 0xa75   : > { %v4440_v13 = vpop.xlane.xlu0 %4439 }
 0xa76   : > { %8525 = vpow2.f32 %v4462_v11  ;;  %v4450_v14 = vsub.f32 %v4343_v44, %v4440_v13 }
 0xa77   : > { %8527 = vpow2.f32 %v4460_v12 }
 0xa78   : > { %v4464_v16 = vmul.f32 1.442695, %v4450_v14 }
 0xa79   : > { %v4443_v17 = vpop.xlane.xlu1 %4442  ;;  %v3763_v33 = vpop.permute.xlu0 %3762 }
 0xa7a   : > { %8529 = vpow2.f32 %v4464_v16  ;;  %v4451_v19 = vsub.f32 %v4417_v18, %v4443_v17 }
 0xa7b   : > { %v8522_v20 = vpop.eup %8521 }
 0xa7c   : > { %v4466_v21 = vmul.f32 1.442695, %v4451_v19  ;;  %v4477_v22 = vsel %vm1776_vm7, %v8522_v20, 0.0 }
 0xa7d   : > { %4478 = vadd.xlane.f32.xlu1 %v4477_v22  ;;  %v3765_v34 = vpop.permute.xlu1 %3764 }
 0xa7e   : > { %8531 = vpow2.f32 %v4466_v21 }
 0xa7f   : > { %v8524_v23 = vpop.eup %8523 }
 0xa80   : > { %v4474_v24 = vsel %vm1776_vm7, %v8524_v23, 0.0 }
 0xa81   : > { %4475 = vadd.xlane.f32.xlu0 %v4474_v24  ;;  %v3769_v36 = vpop.permute.xlu1 %3768 }
 0xa83   : > { %v8526_v25 = vpop.eup %8525 }
 0xa84   : > { %v8528_v26 = vpop.eup %8527  ;;  %v4483_v27 = vsel %vm1776_vm7, %v8526_v25, 0.0 }
 0xa85   : > { %4484 = vadd.xlane.f32.xlu1 %v4483_v27  ;;  %v4480_v28 = vsel %vm1776_vm7, %v8528_v26, 0.0  ;;  %v3771_v37 = vpop.permute.xlu1 %3770 }
 0xa86   : > { %4481 = vadd.xlane.f32.xlu0 %v4480_v28 }
 0xa87   : > { %v9251_v29 = vpop.eup %8529 }
 0xa88   : > { %v4486_v30 = vsel %vm1776_vm7, %v9251_v29, 0.0 }
 0xa8a   : > { %4487 = vadd.xlane.f32.xlu0 %v4486_v30 }
 0xa8b   : > { %v9255_v31 = vpop.eup %8531 }
 0xa8c   : > { %v4489_v32 = vsel %vm1776_vm7, %v9255_v31, 0.0 }
 0xa8d   : > { %4490 = vadd.xlane.f32.xlu1 %v4489_v32 }
 0xa9e   : > { %3776 = vrot.lane.b32.xlu1 %v9207_v6, %s8637_s11 }
 0xaa0   : > { %3774 = vrot.lane.b32.xlu0 %v9217_v9, %s8637_s11 }
 0xaaa   : > { %v4470_v35 = vpop.xlane.xlu0 %4469 }
 0xaab   : > { %8533 = vrcp.f32 %v4470_v35 }
 0xab6   : > { %v4473_v38 = vpop.xlane.xlu1 %4472 }
 0xab7   : > { %8535 = vrcp.f32 %v4473_v38  ;;  %v7685_v38 = vld [vmem:[%s1362_s12] ss:$0 sm:$0xff]  ;;  %s9959_s12 = sld [smem:[#allocation14_spill]] }
 0xab8   : > { %v8534_v39 = vpop.eup %8533 }
 0xab9   : > { %v4500_v40 = vmul.f32 %v8534_v39, %v8518_v59 }
 0xabb   : > { %8358 = vmatmul.mubr.msk.f32.vlgmr.msra.gmra.mxu0 %vm1776_vm7, %v4500_v40 }
 0xabc   : > { %8366 = vmatpush3.msra.mxu0 %v3763_v33  ;;  %8367 = vmatprep.mubr.msk.f32.mxu0 %vm8634_vm6, %v8633_v54 }
 0xabd   : > { %8375 = vmatprep.subr.mxu0 %v8633_v54  ;;  %s9961_s14 = scalar_lea.vmem %s9959_s12, %s8823_s0  ;;  %s9965_s0 = sld [smem:[#allocation36_spill]] }
 0xac4   : > { %v8536_v6 = vpop.eup %8535 }
 0xac5   : > { %v4501_v9 = vmul.f32 %v8536_v6, %v8520_v61 }
 0xac7   : > { %8363 = vmatmul.mubr.msk.f32.vlgmr.msra.gmra.mxu1 %vm1776_vm7, %v4501_v9 }
 0xac8   : > { %8371 = vmatpush3.msra.mxu1 %v3765_v34  ;;  %8372 = vmatprep.mubr.msk.f32.mxu1 %vm8634_vm6, %v8633_v54 }
 0xac9   : > { %8380 = vmatprep.subr.mxu1 %v8633_v54 }
 0xb06   : > { %v4479_v41 = vpop.xlane.xlu1 %4478 }
 0xb07   : > { %8537 = vrcp.f32 %v4479_v41 }
 0xb0a   : > { %v4476_v42 = vpop.xlane.xlu0 %4475 }
 0xb0b   : > { %8539 = vrcp.f32 %v4476_v42 }
 0xb0e   : > { %v4485_v43 = vpop.xlane.xlu1 %4484 }
 0xb0f   : > { %8541 = vrcp.f32 %v4485_v43  ;;  %v4482_v44 = vpop.xlane.xlu0 %4481 }
 0xb10   : > { %8543 = vrcp.f32 %v4482_v44 }
 0xb13   : > { %v4488_v45 = vpop.xlane.xlu0 %4487 }
 0xb14   : > { %v8538_v46 = vpop.eup %8537  ;;  %8545 = vrcp.f32 %v4488_v45 }
 0xb15   : > { %v4503_v47 = vmul.f32 %v8538_v46, %v8522_v20 }
 0xb16   : > { %v4491_v48 = vpop.xlane.xlu1 %4490 }
 0xb17   : > { %8547 = vrcp.f32 %v4491_v48  ;;  %8373 = vmatmul.mubr.msk.f32.vlgmr.msra.gmra.mxu1 %vm1776_vm7, %v4503_v47  ;;  %v3775_v58 = vpop.permute.xlu0 %3774 }
 0xb18   : > { %v8540_v18 = vpop.eup %8539  ;;  %8381 = vmatpush3.msra.mxu1 %v3771_v37  ;;  %8382 = vmatprep.mubr.msk.f32.mxu1 %vm8634_vm6, %v8633_v54 }
 0xb19   : > { %v4502_v15 = vmul.f32 %v8540_v18, %v8524_v23  ;;  %8390 = vmatprep.subr.mxu1 %v8633_v54 }
 0xb1a   : > { %v3777_v55 = vpop.permute.xlu1 %3776 }
 0xb1b   : > { %8368 = vmatmul.mubr.msk.f32.vlgmr.msra.gmra.mxu0 %vm1776_vm7, %v4502_v15 }
 0xb1c   : > { %v8542_v49 = vpop.eup %8541  ;;  %8376 = vmatpush3.msra.mxu0 %v3769_v36  ;;  %8377 = vmatprep.mubr.msk.f32.mxu0 %vm8634_vm6, %v8633_v54 }
 0xb1d   : > { %v8544_v50 = vpop.eup %8543  ;;  %8385 = vmatprep.subr.mxu0 %v8633_v54  ;;  %v4505_v51 = vmul.f32 %v8542_v49, %v8526_v25 }
 0xb1e   : > { %v4504_v52 = vmul.f32 %v8544_v50, %v8528_v26 }
 0xb1f   : > { %8383 = vmatmul.mubr.msk.f32.vlgmr.msra.gmra.mxu1 %vm1776_vm7, %v4505_v51 }
 0xb20   : > { %8378 = vmatmul.mubr.msk.f32.vlgmr.msra.gmra.mxu0 %vm1776_vm7, %v4504_v52  ;;  %8391 = vmatpush3.msra.mxu1 %v3777_v55 }
 0xb21   : > { %v8546_v59 = vpop.eup %8545  ;;  %8386 = vmatpush3.msra.mxu0 %v3775_v58  ;;  %8387 = vmatprep.mubr.msk.f32.mxu0 %vm8634_vm6, %v8633_v54  ;;  %v5547_v58 = vld [vmem:[%s8880_s26 + $0x188] sm:$0xff] }
 0xb22   : > { %v4506_v60 = vmul.f32 %v8546_v59, %v9251_v29  ;;  %8392 = vmatprep.mubr.msk.f32.mxu1 %vm8634_vm6, %v8633_v54  ;;  %8395 = vmatprep.subr.mxu0 %v3472_v57  ;;  %v5549_v59 = vld [vmem:[%s8880_s26 + $0x198] sm:$0xff] }
 0xb23   : > { %8400 = vmatprep.subr.mxu1 %v3473_v62 }
 0xb24   : > { %v8548_v61 = vpop.eup %8547  ;;  %8388 = vmatmul.mubr.msk.f32.vlgmr.msra.gmra.mxu0 %vm1776_vm7, %v4506_v60  ;;  %v5546_v60 = vld [vmem:[%s8880_s26 + $0x180] sm:$0xff] }
 0xb25   : > { %v4507_v3 = vmul.f32 %v8548_v61, %v9255_v31  ;;  %8396 = vmatpush3.msra.mxu0 %v3472_v57  ;;  %v5548_v61 = vld [vmem:[%s8880_s26 + $0x190] sm:$0xff] }
 0xb26   : > { %8405 = vmatprep.subr.mxu0 %v3474_v2 }
 0xb27   : > { %8393 = vmatmul.mubr.msk.f32.vlgmr.msra.gmra.mxu1 %vm1776_vm7, %v4507_v3  ;;  %v5531_v3 = vld [vmem:[%s8880_s26 + $0x108] sm:$0xff] }
 0xb28   : > { %8401 = vmatpush3.msra.mxu1 %v3473_v62  ;;  %v5533_v62 = vld [vmem:[%s8880_s26 + $0x118] sm:$0xff] }
 0xb29   : > { %8410 = vmatprep.subr.mxu1 %v3475_v63 }
 0xb7b   : > { %v4577_v0 = vpop.f32.mrf.mxu0 }
 0xb7c   : > { %8397 = vmatprep.mubr.msk.f32.mxu0 %vm1776_vm7, %v4577_v0  ;;  %v5515_v0 = vld [vmem:[%s8880_s26 + $0x88] sm:$0xff] }
 0xb7d   : > { %v8359_v1 = vpop.f32.mrf.mxu0 }
 0xb7e   : > { %v5517_v1 = vld [vmem:[%s8880_s26 + $0x98] sm:$0xff] }
 0xb87   : > { %v4650_v4 = vpop.f32.mrf.mxu1 }
 0xb88   : > { %8398 = vmatmul.mubr.msk.f32.vlgmr.msra.gmra.mxu0 %vm1776_vm7, %v4650_v4  ;;  %v5514_v4 = vld [vmem:[%s8880_s26 + $0x80] sm:$0xff] }
 0xb89   : > { %v8364_v5 = vpop.f32.mrf.mxu1  ;;  %8406 = vmatpush3.msra.mxu0 %v3474_v2  ;;  %v5530_v2 = vld [vmem:[%s8880_s26 + $0x100] sm:$0xff] }
 0xb8a   : > { %5676 = vmatprep.subr.mxu0 %v5547_v58  ;;  %v5516_v5 = vld [vmem:[%s8880_s26 + $0x90] sm:$0xff] }
 0xb8b   : > { %v5556_v58 = vld [vmem:[%s8880_s26 + $0x1d0] sm:$0xff] }
 0xbd7   : > { %v4796_v7 = vpop.f32.mrf.mxu1 }
 0xbd9   : > { %v8374_v8 = vpop.f32.mrf.mxu1 }
 0xbda   : > { %v5501_v8 = vld [vmem:[%s8880_s26 + $0x18] sm:$0xff] }
 0xbdb   : > { %v4723_v10 = vpop.f32.mrf.mxu0 }
 0xbdc   : > { %8402 = vmatprep.mubr.msk.f32.mxu1 %vm1776_vm7, %v4723_v10  ;;  %v5498_v10 = vld [vmem:[%s8880_s26] sm:$0xff] }
 0xbdd   : > { %v8369_v11 = vpop.f32.mrf.mxu0  ;;  %8403 = vmatmul.mubr.msk.f32.vlgmr.msra.gmra.mxu1 %vm1776_vm7, %v4796_v7  ;;  %v5499_v7 = vld [vmem:[%s8880_s26 + $0x8] sm:$0xff] }
 0xbde   : > { %8411 = vmatpush3.msra.mxu1 %v3475_v63  ;;  %v5532_v63 = vld [vmem:[%s8880_s26 + $0x110] sm:$0xff] }
 0xbdf   : > { %v4942_v12 = vpop.f32.mrf.mxu1  ;;  %5753 = vmatprep.subr.mxu1 %v5549_v59  ;;  %v5500_v11 = vld [vmem:[%s8880_s26 + $0x10] sm:$0xff]  ;;  %v5539_v59 = vld [vmem:[%s8880_s26 + $0x148] sm:$0xff] }
 0xbe0   : > { %v4869_v13 = vpop.f32.mrf.mxu0 }
 0xbe1   : > { %8407 = vmatprep.mubr.msk.f32.mxu0 %vm1776_vm7, %v4869_v13  ;;  %v8384_v14 = vpop.f32.mrf.mxu1  ;;  %v5553_v13 = vld [vmem:[%s8880_s26 + $0x1b8] sm:$0xff] }
 0xbe2   : > { %v8379_v16 = vpop.f32.mrf.mxu0  ;;  %8408 = vmatmul.mubr.msk.f32.vlgmr.msra.gmra.mxu0 %vm1776_vm7, %v4942_v12  ;;  %v5551_v12 = vld [vmem:[%s8880_s26 + $0x1a8] sm:$0xff] }
 0xbe3   : > { %5716 = vmatprep.mubr.f32.mxu0 %v8633_v54  ;;  %5677 = vmatpush1.msra.mxu0 %v5546_v60  ;;  %v5541_v60 = vld [vmem:[%s8880_s26 + $0x158] sm:$0xff] }
 0xbe4   : > { %v5015_v17 = vpop.f32.mrf.mxu0  ;;  %5678 = vmatprep.subr.mxu0 %v5531_v3  ;;  %v5540_v3 = vld [vmem:[%s8880_s26 + $0x150] sm:$0xff] }
 0xbe5   : > { %8412 = vmatprep.mubr.msk.f32.mxu1 %vm1776_vm7, %v5015_v17  ;;  %5679 = vmatpush1.msra.mxu0 %v5530_v2  ;;  %v5525_v2 = vld [vmem:[%s8880_s26 + $0xd8] sm:$0xff] }
 0xbe6   : > { %v8389_v19 = vpop.f32.mrf.mxu0  ;;  %5680 = vmatprep.subr.mxu0 %v5515_v0  ;;  %v5524_v0 = vld [vmem:[%s8880_s26 + $0xd0] sm:$0xff] }
 0xbe7   : > { %v5088_v20 = vpop.f32.mrf.mxu1  ;;  %5681 = vmatpush1.msra.mxu0 %v5514_v4  ;;  %v5509_v4 = vld [vmem:[%s8880_s26 + $0x58] sm:$0xff] }
 0xbe8   : > { %8413 = vmatmul.mubr.msk.f32.vlgmr.msra.gmra.mxu1 %vm1776_vm7, %v5088_v20  ;;  %5682 = vmatprep.subr.mxu0 %v5499_v7  ;;  %v5508_v7 = vld [vmem:[%s8880_s26 + $0x50] sm:$0xff] }
 0xbe9   : > { %v8394_v21 = vpop.f32.mrf.mxu1  ;;  %5793 = vmatprep.mubr.f32.mxu1 %v8633_v54  ;;  %5754 = vmatpush1.msra.mxu1 %v5548_v61  ;;  %v5538_v61 = vld [vmem:[%s8880_s26 + $0x140] sm:$0xff] }
 0xbea   : > { %5755 = vmatprep.subr.mxu1 %v5533_v62  ;;  %5683 = vmatpush1.msra.mxu0 %v5498_v10  ;;  %v5523_v62 = vld [vmem:[%s8880_s26 + $0xc8] sm:$0xff]  ;;  %v5561_v10 = vld [vmem:[%s8880_s26 + $0x1f8] sm:$0xff] }
 0xbeb   : > { %5756 = vmatpush1.msra.mxu1 %v5532_v63  ;;  %5830 = vmatprep.subr.mxu0 %v5551_v12  ;;  %v5522_v63 = vld [vmem:[%s8880_s26 + $0xc0] sm:$0xff]  ;;  %v5560_v12 = vld [vmem:[%s8880_s26 + $0x1f0] sm:$0xff] }
 0xbec   : > { %5757 = vmatprep.subr.mxu1 %v5517_v1  ;;  %v5507_v1 = vld [vmem:[%s8880_s26 + $0x48] sm:$0xff] }
 0xbed   : > { %5758 = vmatpush1.msra.mxu1 %v5516_v5  ;;  %v5506_v5 = vld [vmem:[%s8880_s26 + $0x40] sm:$0xff] }
 0xbee   : > { %5759 = vmatprep.subr.mxu1 %v5501_v8  ;;  %v5559_v8 = vld [vmem:[%s8880_s26 + $0x1e8] sm:$0xff] }
 0xbef   : > { %5760 = vmatpush1.msra.mxu1 %v5500_v11  ;;  %v5558_v11 = vld [vmem:[%s8880_s26 + $0x1e0] sm:$0xff] }
 0xbf0   : > { %5907 = vmatprep.subr.mxu1 %v5553_v13  ;;  %v5543_v13 = vld [vmem:[%s8880_s26 + $0x168] sm:$0xff] }
 0xc48   : > { %v8399_v22 = vpop.f32.mrf.mxu0 }
 0xc49   : > { %v5423_v29 = vsel %vm1393_vm1, %v8399_v22, 0.0 }
 0xc4a   : > { %v5164_v24 = vpop.f32.mrf.mxu0 }
 0xc4b   : > { %v5416_v33 = vsel %vm1393_vm1, %v5164_v24, 0.0 }
 0xc9d   : > { %v8404_v23 = vpop.f32.mrf.mxu1 }
 0xc9e   : > { %v5424_v27 = vsel %vm1393_vm1, %v8404_v23, 0.0 }
 0xc9f   : > { %v5245_v25 = vpop.f32.mrf.mxu1  ;;  %v5425_v32 = vadd.f32 %v5424_v27, %v5423_v29 }
 0xca0   : > { %v5417_v30 = vsel %vm1393_vm1, %v5245_v25, 0.0 }
 0xca1   : > { %v5418_v35 = vadd.f32 %v5417_v30, %v5416_v33 }
 0xca2   : > { %v8409_v26 = vpop.f32.mrf.mxu0 }
 0xca3   : > { %v5426_v31 = vsel %vm1393_vm1, %v8409_v26, 0.0 }
 0xca4   : > { %v5326_v28 = vpop.f32.mrf.mxu0  ;;  %v5427_v36 = vadd.f32 %v5426_v31, %v5425_v32  ;;  %v7686_v32 = vld [vmem:[%s9961_s14] ss:$0 sm:$0xff] }
 0xca5   : > { %v5419_v34 = vsel %vm1393_vm1, %v5326_v28, 0.0 }
 0xca6   : > { %v5420_v40 = vadd.f32 %v5419_v34, %v5418_v35  ;;  %v7687_v35 = vld [vmem:[%s9962_s20] ss:$0 sm:$0xff] }
 0xca8   : > { %v8414_v37 = vpop.f32.mrf.mxu1 }
 0xca9   : > { %v5428_v39 = vsel %vm1393_vm1, %v8414_v37, 0.0 }
 0xcaa   : > { %v5429_v6 = vadd.f32 %v5428_v39, %v5427_v36  ;;  %v5407_v9 = vpop.f32.mrf.mxu1  ;;  %v5550_v39 = vld [vmem:[%s8880_s26 + $0x1a0] sm:$0xff] }
 0xcab   : > { %v5421_v41 = vsel %vm1393_vm1, %v5407_v9, 0.0  ;;  %v5535_v9 = vld [vmem:[%s8880_s26 + $0x128] sm:$0xff] }
 0xcac   : > { %v5437_v42 = vadd.f32 %v7685_v38, %v5429_v6  ;;  %v5422_v43 = vadd.f32 %v5421_v41, %v5420_v40  ;;  %v5552_v40 = vld [vmem:[%s8880_s26 + $0x1b0] sm:$0xff]  ;;  %v5537_v41 = vld [vmem:[%s8880_s26 + $0x138] sm:$0xff] }
 0xcae   : > { %v5436_v44 = vadd.f32 %v7685_v38, %v5422_v43  ;;  %v9315_v45 = vadd.f32 %v5437_v42, %v9098_v53  ;;  %v5534_v43 = vld [vmem:[%s8880_s26 + $0x120] sm:$0xff] }
 0xcb0   : > { %v5445_v46 = vsel %vm1393_vm1, %v9315_v45, 0.0  ;;  %v9320_v47 = vadd.f32 %v5436_v44, %v9103_v56  ;;  %v5536_v44 = vld [vmem:[%s8880_s26 + $0x130] sm:$0xff] }
 0xcb1   : > { %5446 = vadd.xlane.f32.xlu1 %v5445_v46 }
 0xcb2   : > { %v5442_v48 = vsel %vm1393_vm1, %v9320_v47, 0.0 }
 0xcb3   : > { %5443 = vadd.xlane.f32.xlu0 %v5442_v48  ;;  %v5519_v48 = vld [vmem:[%s8880_s26 + $0xa8] sm:$0xff] }
 0xd3a   : > { %v5447_v18 = vpop.xlane.xlu1 %5446 }
 0xd3b   : > { %v5449_v15 = vmul.f32 0.03125, %v5447_v18  ;;  %v5521_v18 = vld [vmem:[%s8880_s26 + $0xb8] sm:$0xff] }
 0xd3c   : > { %v5444_v49 = vpop.xlane.xlu0 %5443 }
 0xd3d   : > { %v5448_v53 = vmul.f32 0.03125, %v5444_v49  ;;  %v9325_v50 = vsub.f32 %v9315_v45, %v5449_v15  ;;  %v5518_v15 = vld [vmem:[%s8880_s26 + $0xa0] sm:$0xff]  ;;  %v5520_v49 = vld [vmem:[%s8880_s26 + $0xb0] sm:$0xff] }
 0xd3f   : > { %v9328_v56 = vsub.f32 %v9320_v47, %v5448_v53  ;;  %v5453_v55 = vmul.f32 %v9325_v50, %v9325_v50  ;;  %v5487_v37 = vmul.f32 %v7686_v32, %v9325_v50  ;;  %v5503_v53 = vld [vmem:[%s8880_s26 + $0x28] sm:$0xff]  ;;  %v5505_v50 = vld [vmem:[%s8880_s26 + $0x38] sm:$0xff] }
 0xd41   : > { %v5452_v51 = vmul.f32 %v9328_v56, %v9328_v56  ;;  %v5457_v57 = vsel %vm1393_vm1, %v5453_v55, 0.0  ;;  %v5486_v33 = vmul.f32 %v7686_v32, %v9328_v56  ;;  %v5502_v56 = vld [vmem:[%s8880_s26 + $0x20] sm:$0xff]  ;;  %v5557_v55 = vld [vmem:[%s8880_s26 + $0x1d8] sm:$0xff]  ;;  %v6362_v32 = vld [vmem:[%s8888_s3 + $0x1f0] sm:$0xff] }
 0xd43   : > { %v5454_v52 = vsel %vm1393_vm1, %v5452_v51, 0.0  ;;  %v5504_v51 = vld [vmem:[%s8880_s26 + $0x30] sm:$0xff] }
 0xd44   : > { %5455 = vadd.xlane.f32.xlu0 %v5454_v52  ;;  %v5555_v52 = vld [vmem:[%s8880_s26 + $0x1c8] sm:$0xff] }
 0xd48   : > { %5458 = vadd.xlane.f32.xlu0 %v5457_v57  ;;  %v5554_v57 = vld [vmem:[%s8880_s26 + $0x1c0] sm:$0xff] }
 0xdcd   : > { %v5456_v14 = vpop.xlane.xlu0 %5455 }
 0xdce   : > { %v5460_v16 = vmul.f32 0.032258064, %v5456_v14  ;;  %v5545_v14 = vld [vmem:[%s8880_s26 + $0x178] sm:$0xff] }
 0xdd0   : > { %8549 = vrsqrt.f32 %v5460_v16  ;;  %vm5464_vm12 = vcmp.eq.f32.partialorder %v5460_v16, inf  ;;  %v5467_v22 = vand.u32 2147483648, %v5460_v16  ;;  %vm5466_vm13 = vcmp.eq.f32.partialorder %v5460_v16, 0.0 }
 0xdd1   : > { %v5459_v17 = vpop.xlane.xlu0 %5458 }
 0xdd2   : > { %v5461_v19 = vmul.f32 0.032258064, %v5459_v17  ;;  %v5544_v17 = vld [vmem:[%s8880_s26 + $0x170] sm:$0xff] }
 0xdd4   : > { %8551 = vrsqrt.f32 %v5461_v19  ;;  %vm5471_vm14 = vcmp.eq.f32.partialorder %v5461_v19, inf  ;;  %v5474_v28 = vand.u32 2147483648, %v5461_v19  ;;  %vm5473_vm15 = vcmp.eq.f32.partialorder %v5461_v19, 0.0 }
 0xddd   : > { %v8550_v20 = vpop.eup %8549 }
 0xdde   : > { %v5463_v21 = vmul.f32 %v8550_v20, %v5460_v16  ;;  %v5529_v20 = vld [vmem:[%s8880_s26 + $0xf8] sm:$0xff] }
 0xde0   : > { %v5465_v23 = vsel %vm5464_vm12, %v5460_v16, %v5463_v21  ;;  %v5542_v16 = vld [vmem:[%s8880_s26 + $0x160] sm:$0xff] }
 0xde1   : > { %v8552_v24 = vpop.eup %8551  ;;  %v5468_v25 = vsel %vm5466_vm13, %v5467_v22, %v5465_v23  ;;  %v5526_v21 = vld [vmem:[%s8880_s26 + $0xe0] sm:$0xff]  ;;  %v5528_v22 = vld [vmem:[%s8880_s26 + $0xf0] sm:$0xff]  ;;  %v5511_v23 = vld [vmem:[%s8880_s26 + $0x68] sm:$0xff] }
 0xde2   : > { %v5476_v26 = vadd.f32 1e-06, %v5468_v25  ;;  %v5470_v27 = vmul.f32 %v8552_v24, %v5461_v19  ;;  %v5513_v24 = vld [vmem:[%s8880_s26 + $0x78] sm:$0xff]  ;;  %v5510_v25 = vld [vmem:[%s8880_s26 + $0x60] sm:$0xff] }
 0xde4   : > { %8553 = vrcp.f32 %v5476_v26  ;;  %v5472_v29 = vsel %vm5471_vm14, %v5461_v19, %v5470_v27  ;;  %v5527_v19 = vld [vmem:[%s8880_s26 + $0xe8] sm:$0xff]  ;;  %v5512_v26 = vld [vmem:[%s8880_s26 + $0x70] sm:$0xff]  ;;  %v6331_v27 = vld [vmem:[%s8888_s3 + $0xf8] sm:$0xff]  ;;  %s9966_s26 = sld [smem:[#allocation39_spill]] }
 0xde5   : > { %v5475_v30 = vsel %vm5473_vm15, %v5474_v28, %v5472_v29  ;;  %v6363_v28 = vld [vmem:[%s8888_s3 + $0x1f8] sm:$0xff] }
 0xde6   : > { %v5477_v31 = vadd.f32 1e-06, %v5475_v30  ;;  %v6315_v29 = vld [vmem:[%s8888_s3 + $0x78] sm:$0xff] }
 0xde7   : > { %v6347_v30 = vld [vmem:[%s8888_s3 + $0x178] sm:$0xff] }
 0xde8   : > { %8555 = vrcp.f32 %v5477_v31  ;;  %v6330_v31 = vld [vmem:[%s8888_s3 + $0xf0] sm:$0xff] }
 0xdea   : > { %p8419_p5 = scmp.eq.s32.totalorder %s9966_s26, 1 }
 0xdf1   : > { %v8554_v34 = vpop.eup %8553 }
 0xdf2   : > { %v5488_v36 = vmul.f32 %v8554_v34, %v5486_v33  ;;  %v6314_v33 = vld [vmem:[%s8888_s3 + $0x70] sm:$0xff] }
 0xdf3   : > { %v6346_v34 = vld [vmem:[%s8888_s3 + $0x170] sm:$0xff] }
 0xdf4   : > { %v9362_v38 = vadd.f32 %v7687_v35, %v5488_v36  ;;  %v6313_v36 = vld [vmem:[%s8888_s3 + $0x68] sm:$0xff] }
 0xdf5   : > { %v8556_v6 = vpop.eup %8555 }
 0xdf6   : > { %7688 = vmatmul.mubr.msk.f32.vlgmr.msra.gmra.mxu0 %vm1393_vm1, %v9362_v38  ;;  %7690 = vmatmul.mubr.msk.f32.vlgmr.msra.gmra.mxu1 %vm1393_vm1, %v9362_v38  ;;  %v5489_v42 = vmul.f32 %v8556_v6, %v5487_v37  ;;  %v6345_v37 = vld [vmem:[%s8888_s3 + $0x168] sm:$0xff]  ;;  %v6344_v6 = vld [vmem:[%s8888_s3 + $0x160] sm:$0xff] }
 0xdf7   : > { %5831 = vmatpush1.msra.mxu0 %v5550_v39  ;;  %5908 = vmatpush1.msra.mxu1 %v5552_v40  ;;  %v6360_v39 = vld [vmem:[%s8888_s3 + $0x1e0] sm:$0xff] }
 0xdf8   : > { %5832 = vmatprep.subr.mxu0 %v5535_v9  ;;  %5909 = vmatprep.subr.mxu1 %v5537_v41  ;;  %v9374_v46 = vadd.f32 %v7687_v35, %v5489_v42  ;;  %v6361_v35 = vld [vmem:[%s8888_s3 + $0x1e8] sm:$0xff]  ;;  %v6312_v40 = vld [vmem:[%s8888_s3 + $0x60] sm:$0xff]  ;;  %v6327_v9 = vld [vmem:[%s8888_s3 + $0xd8] sm:$0xff] }
 0xdf9   : > { %5722 = vmatprep.mubr.f32.mxu0 %v8633_v54  ;;  %5799 = vmatprep.mubr.f32.mxu1 %v8633_v54  ;;  %v6359_v41 = vld [vmem:[%s8888_s3 + $0x1d8] sm:$0xff] }
 0xdfa   : > { %5833 = vmatpush1.msra.mxu0 %v5534_v43  ;;  %5910 = vmatpush1.msra.mxu1 %v5536_v44  ;;  %v6311_v42 = vld [vmem:[%s8888_s3 + $0x58] sm:$0xff]  ;;  %v6326_v44 = vld [vmem:[%s8888_s3 + $0xd0] sm:$0xff] }
 0xdfb   : > { %7689 = vmatmul.mubr.msk.f32.gmra.mxu0 %vm1393_vm1, %v9374_v46  ;;  %7691 = vmatmul.mubr.msk.f32.gmra.mxu1 %vm1393_vm1, %v9374_v46  ;;  %v6343_v43 = vld [vmem:[%s8888_s3 + $0x158] sm:$0xff] }
 0xdfc   : > { %5834 = vmatprep.subr.mxu0 %v5519_v48  ;;  %5911 = vmatprep.subr.mxu1 %v5521_v18  ;;  %v6310_v48 = vld [vmem:[%s8888_s3 + $0x50] sm:$0xff] }
 0xdfd   : > { %5835 = vmatpush1.msra.mxu0 %v5518_v15  ;;  %5912 = vmatpush1.msra.mxu1 %v5520_v49  ;;  %v6342_v18 = vld [vmem:[%s8888_s3 + $0x150] sm:$0xff]  ;;  %v6325_v15 = vld [vmem:[%s8888_s3 + $0xc8] sm:$0xff] }
 0xdfe   : > { %5836 = vmatprep.subr.mxu0 %v5503_v53  ;;  %5913 = vmatprep.subr.mxu1 %v5505_v50  ;;  %v6357_v49 = vld [vmem:[%s8888_s3 + $0x1c8] sm:$0xff] }
 0xdff   : > { %5837 = vmatpush1.msra.mxu0 %v5502_v56  ;;  %5870 = vmatprep.mubr.f32.mxu0 %v8633_v54  ;;  %v6309_v53 = vld [vmem:[%s8888_s3 + $0x48] sm:$0xff]  ;;  %v6324_v56 = vld [vmem:[%s8888_s3 + $0xc0] sm:$0xff] }
 0xe00   : > { %5914 = vmatpush1.msra.mxu1 %v5504_v51  ;;  %5947 = vmatprep.mubr.f32.mxu1 %v8633_v54  ;;  %v6341_v50 = vld [vmem:[%s8888_s3 + $0x148] sm:$0xff]  ;;  %v6356_v51 = vld [vmem:[%s8888_s3 + $0x1c0] sm:$0xff] }
 0xe01   : > { %7692 = vmatmul.mubr.msk.f32.vlgmr.msra.gmra.mxu0 %vm1393_vm1, %v9362_v38  ;;  %7694 = vmatmul.mubr.msk.f32.vlgmr.msra.gmra.mxu1 %vm1393_vm1, %v9362_v38 }
 0xe02   : > { %5984 = vmatprep.subr.mxu0 %v5555_v52  ;;  %6061 = vmatprep.subr.mxu1 %v5557_v55  ;;  %v6308_v52 = vld [vmem:[%s8888_s3 + $0x40] sm:$0xff] }
 0xe03   : > { %5985 = vmatpush1.msra.mxu0 %v5554_v57  ;;  %6062 = vmatpush1.msra.mxu1 %v5556_v58  ;;  %v6340_v55 = vld [vmem:[%s8888_s3 + $0x140] sm:$0xff]  ;;  %v6323_v57 = vld [vmem:[%s8888_s3 + $0xb8] sm:$0xff] }
 0xe04   : > { %5986 = vmatprep.subr.mxu0 %v5539_v59  ;;  %6063 = vmatprep.subr.mxu1 %v5541_v60  ;;  %v6355_v58 = vld [vmem:[%s8888_s3 + $0x1b8] sm:$0xff] }
 0xe05   : > { %5876 = vmatprep.mubr.f32.mxu0 %v8633_v54  ;;  %5953 = vmatprep.mubr.f32.mxu1 %v8633_v54  ;;  %v6307_v59 = vld [vmem:[%s8888_s3 + $0x38] sm:$0xff] }
 0xe06   : > { %5987 = vmatpush1.msra.mxu0 %v5538_v61  ;;  %6064 = vmatpush1.msra.mxu1 %v5540_v3  ;;  %v6339_v60 = vld [vmem:[%s8888_s3 + $0x138] sm:$0xff]  ;;  %v6322_v61 = vld [vmem:[%s8888_s3 + $0xb0] sm:$0xff] }
 0xe07   : > { %7693 = vmatmul.mubr.msk.f32.gmra.mxu0 %vm1393_vm1, %v9374_v46  ;;  %7695 = vmatmul.mubr.msk.f32.gmra.mxu1 %vm1393_vm1, %v9374_v46  ;;  %v6354_v3 = vld [vmem:[%s8888_s3 + $0x1b0] sm:$0xff] }
 0xe08   : > { %5988 = vmatprep.subr.mxu0 %v5523_v62  ;;  %6065 = vmatprep.subr.mxu1 %v5525_v2  ;;  %v6306_v62 = vld [vmem:[%s8888_s3 + $0x30] sm:$0xff] }
 0xe09   : > { %5989 = vmatpush1.msra.mxu0 %v5522_v63  ;;  %6066 = vmatpush1.msra.mxu1 %v5524_v0  ;;  %v6338_v2 = vld [vmem:[%s8888_s3 + $0x130] sm:$0xff]  ;;  %v6321_v63 = vld [vmem:[%s8888_s3 + $0xa8] sm:$0xff] }
 0xe0a   : > { %5990 = vmatprep.subr.mxu0 %v5507_v1  ;;  %6067 = vmatprep.subr.mxu1 %v5509_v4  ;;  %v6353_v0 = vld [vmem:[%s8888_s3 + $0x1a8] sm:$0xff] }
 0xe0b   : > { %5991 = vmatpush1.msra.mxu0 %v5506_v5  ;;  %6024 = vmatprep.mubr.f32.mxu0 %v8633_v54  ;;  %v6305_v1 = vld [vmem:[%s8888_s3 + $0x28] sm:$0xff]  ;;  %v6320_v5 = vld [vmem:[%s8888_s3 + $0xa0] sm:$0xff] }
 0xe0c   : > { %6068 = vmatpush1.msra.mxu1 %v5508_v7  ;;  %6101 = vmatprep.mubr.f32.mxu1 %v8633_v54  ;;  %v6337_v4 = vld [vmem:[%s8888_s3 + $0x128] sm:$0xff]  ;;  %v6352_v7 = vld [vmem:[%s8888_s3 + $0x1a0] sm:$0xff] }
 0xe0d   : > { %7696 = vmatmul.mubr.msk.f32.vlgmr.msra.gmra.mxu0 %vm1393_vm1, %v9362_v38  ;;  %7698 = vmatmul.mubr.msk.f32.vlgmr.msra.gmra.mxu1 %vm1393_vm1, %v9362_v38 }
 0xe0e   : > { %6138 = vmatprep.subr.mxu0 %v5559_v8  ;;  %6215 = vmatprep.subr.mxu1 %v5561_v10  ;;  %v6304_v8 = vld [vmem:[%s8888_s3 + $0x20] sm:$0xff] }
 0xe0f   : > { %6139 = vmatpush1.msra.mxu0 %v5558_v11  ;;  %6216 = vmatpush1.msra.mxu1 %v5560_v12  ;;  %v6336_v10 = vld [vmem:[%s8888_s3 + $0x120] sm:$0xff]  ;;  %v6319_v11 = vld [vmem:[%s8888_s3 + $0x98] sm:$0xff] }
 0xe10   : > { %6140 = vmatprep.subr.mxu0 %v5543_v13  ;;  %6217 = vmatprep.subr.mxu1 %v5545_v14  ;;  %v6351_v12 = vld [vmem:[%s8888_s3 + $0x198] sm:$0xff] }
 0xe11   : > { %6030 = vmatprep.mubr.f32.mxu0 %v8633_v54  ;;  %6107 = vmatprep.mubr.f32.mxu1 %v8633_v54  ;;  %v6303_v13 = vld [vmem:[%s8888_s3 + $0x18] sm:$0xff] }
 0xe12   : > { %6141 = vmatpush1.msra.mxu0 %v5542_v16  ;;  %6218 = vmatpush1.msra.mxu1 %v5544_v17  ;;  %v6335_v14 = vld [vmem:[%s8888_s3 + $0x118] sm:$0xff]  ;;  %v6318_v16 = vld [vmem:[%s8888_s3 + $0x90] sm:$0xff] }
 0xe13   : > { %7697 = vmatmul.mubr.msk.f32.gmra.mxu0 %vm1393_vm1, %v9374_v46  ;;  %7699 = vmatmul.mubr.msk.f32.gmra.mxu1 %vm1393_vm1, %v9374_v46  ;;  %v6350_v17 = vld [vmem:[%s8888_s3 + $0x190] sm:$0xff] }
 0xe14   : > { %6142 = vmatprep.subr.mxu0 %v5527_v19  ;;  %6219 = vmatprep.subr.mxu1 %v5529_v20  ;;  %v6302_v19 = vld [vmem:[%s8888_s3 + $0x10] sm:$0xff] }
 0xe15   : > { %6143 = vmatpush1.msra.mxu0 %v5526_v21  ;;  %6220 = vmatpush1.msra.mxu1 %v5528_v22  ;;  %v6334_v20 = vld [vmem:[%s8888_s3 + $0x110] sm:$0xff]  ;;  %v6317_v21 = vld [vmem:[%s8888_s3 + $0x88] sm:$0xff] }
 0xe16   : > { %6144 = vmatprep.subr.mxu0 %v5511_v23  ;;  %6221 = vmatprep.subr.mxu1 %v5513_v24  ;;  %v6349_v22 = vld [vmem:[%s8888_s3 + $0x188] sm:$0xff] }
 0xe17   : > { %6145 = vmatpush1.msra.mxu0 %v5510_v25  ;;  %6178 = vmatprep.mubr.f32.mxu0 %v8633_v54  ;;  %v6301_v23 = vld [vmem:[%s8888_s3 + $0x8] sm:$0xff]  ;;  %v6316_v25 = vld [vmem:[%s8888_s3 + $0x80] sm:$0xff] }
 0xe18   : > { %6222 = vmatpush1.msra.mxu1 %v5512_v26  ;;  %6255 = vmatprep.mubr.f32.mxu1 %v8633_v54  ;;  %v6333_v24 = vld [vmem:[%s8888_s3 + $0x108] sm:$0xff]  ;;  %v6348_v26 = vld [vmem:[%s8888_s3 + $0x180] sm:$0xff] }
 0xe19   : > { %7700 = vmatmul.mubr.msk.f32.vlgmr.msra.gmra.mxu0 %vm1393_vm1, %v9362_v38  ;;  %7702 = vmatmul.mubr.msk.f32.vlgmr.msra.gmra.mxu1 %vm1393_vm1, %v9362_v38  ;;  %v6328_v38 = vld [vmem:[%s8888_s3 + $0xe0] sm:$0xff] }
 0xe1a   : > { %6184 = vmatprep.mubr.f32.mxu0 %v8633_v54  ;;  %6261 = vmatprep.mubr.f32.mxu1 %v8633_v54  ;;  %v6329_v54 = vld [vmem:[%s8888_s3 + $0xe8] sm:$0xff] }
 0xe1b   : > { %7845 = vmatprep.subr.mxu0 %v6331_v27  ;;  %7883 = vmatprep.subr.mxu1 %v6363_v28  ;;  %v6300_v27 = vld [vmem:[%s8888_s3] sm:$0xff] }
 0xe1c   : > { %7846 = vmatpush3.msra.mxu0 %v6315_v29  ;;  %7884 = vmatpush3.msra.mxu1 %v6347_v30  ;;  %v6332_v28 = vld [vmem:[%s8888_s3 + $0x100] sm:$0xff]  ;;  %v6395_v29 = vld [vmem:[%s8888_s3 + $0x2f8] sm:$0xff] }
 0xe1d   : > { %7701 = vmatmul.mubr.msk.f32.gmra.mxu0 %vm1393_vm1, %v9374_v46  ;;  %7703 = vmatmul.mubr.msk.f32.gmra.mxu1 %vm1393_vm1, %v9374_v46  ;;  %v6358_v46 = vld [vmem:[%s8888_s3 + $0x1d0] sm:$0xff]  ;;  %v6427_v30 = vld [vmem:[%s8888_s3 + $0x3f8] sm:$0xff] }
 0xe1e   : > { %7847 = vmatprep.subr.mxu0 %v6330_v31  ;;  %7885 = vmatprep.subr.mxu1 %v6362_v32  ;;  %v5566_v31 = vlaneseq }
 0xe1f   : > { %7848 = vmatpush3.msra.mxu0 %v6314_v33  ;;  %7886 = vmatpush3.msra.mxu1 %v6346_v34 }
 0xe20   : > { %7849 = vmatprep.subr.mxu0 %v6329_v54  ;;  %7887 = vmatprep.subr.mxu1 %v6361_v35  ;;  %v9524_v32 = vshrl.u32 %v5566_v31, 7  ;;  %v9529_v54 = vld [vmem:[%s8884_s13 + $0x8] sm:$0xff]  ;;  %v6376_v31 = vld [vmem:[%s8888_s3 + $0x260] sm:$0xff] }
 0xe21   : > { %7850 = vmatpush3.msra.mxu0 %v6313_v36  ;;  %7888 = vmatpush3.msra.mxu1 %v6345_v37 }
 0xe22   : > { %7851 = vmatprep.subr.mxu0 %v6328_v38  ;;  %7889 = vmatprep.subr.mxu1 %v6360_v39  ;;  %v5584_v33 = vsub.s32 4, %v9524_v32  ;;  %v5592_v34 = vsub.s32 6, %v9524_v32  ;;  %v5568_v37 = vsub.s32 0, %v9524_v32  ;;  %v5576_v38 = vsub.s32 2, %v9524_v32  ;;  %v9544_v39 = vld [vmem:[%s8884_s13] sm:$0xff] }
 0xe23   : > { %7852 = vmatpush3.msra.mxu0 %v6312_v40  ;;  %7890 = vmatpush3.msra.mxu1 %v6344_v6  ;;  %v5572_v40 = vsub.s32 1, %v9524_v32  ;;  %v5580_v6 = vsub.s32 3, %v9524_v32 }
 0xe24   : > { %7853 = vmatprep.subr.mxu0 %v6327_v9  ;;  %7891 = vmatprep.subr.mxu1 %v6359_v41  ;;  %v9534_v35 = vrot.slane %v9529_v54, %v5584_v33  ;;  %v9539_v36 = vrot.slane %v9529_v54, %v5592_v34  ;;  %v5569_v9 = vrot.slane %v9544_v39, %v5568_v37 }
 0xe25   : > { %7854 = vmatpush3.msra.mxu0 %v6311_v42  ;;  %7892 = vmatpush3.msra.mxu1 %v6343_v43  ;;  %v5577_v41 = vrot.slane %v9544_v39, %v5576_v38  ;;  %v5573_v42 = vrot.slane %v9544_v39, %v5572_v40  ;;  %v5581_v43 = vrot.slane %v9544_v39, %v5580_v6 }
 0xe26   : > { %7855 = vmatprep.subr.mxu0 %v6326_v44  ;;  %7893 = vmatprep.subr.mxu1 %v6358_v46 }
 0xe27   : > { %7856 = vmatpush3.msra.mxu0 %v6310_v48  ;;  %7894 = vmatpush3.msra.mxu1 %v6342_v18 }
 0xe28   : > { %7857 = vmatprep.subr.mxu0 %v6325_v15  ;;  %7895 = vmatprep.subr.mxu1 %v6357_v49 }
 0xe29   : > { %7858 = vmatpush3.msra.mxu0 %v6309_v53  ;;  %7896 = vmatpush3.msra.mxu1 %v6341_v50 }
 0xe2a   : > { %7859 = vmatprep.subr.mxu0 %v6324_v56  ;;  %7897 = vmatprep.subr.mxu1 %v6356_v51 }
 0xe2b   : > { %7860 = vmatpush3.msra.mxu0 %v6308_v52  ;;  %7898 = vmatpush3.msra.mxu1 %v6340_v55 }
 0xe2c   : > { %7861 = vmatprep.subr.mxu0 %v6323_v57  ;;  %7899 = vmatprep.subr.mxu1 %v6355_v58 }
 0xe2d   : > { %7862 = vmatpush3.msra.mxu0 %v6307_v59  ;;  %7900 = vmatpush3.msra.mxu1 %v6339_v60  ;;  %v6379_v59 = vld [vmem:[%s8888_s3 + $0x278] sm:$0xff] }
 0xe2e   : > { %7863 = vmatprep.subr.mxu0 %v6322_v61  ;;  %7901 = vmatprep.subr.mxu1 %v6354_v3  ;;  %v6411_v60 = vld [vmem:[%s8888_s3 + $0x378] sm:$0xff]  ;;  %v5588_v61 = vsub.s32 5, %v9524_v32  ;;  %v5596_v3 = vsub.s32 7, %v9524_v32  ;;  %v6522_v32 = vld [vmem:[%s8888_s3 + $0x6f0] sm:$0xff] }
 0xe2f   : > { %7864 = vmatpush3.msra.mxu0 %v6306_v62  ;;  %7902 = vmatpush3.msra.mxu1 %v6338_v2 }
 0xe30   : > { %7865 = vmatprep.subr.mxu0 %v6321_v63  ;;  %7903 = vmatprep.subr.mxu1 %v6353_v0  ;;  %v6394_v0 = vld [vmem:[%s8888_s3 + $0x2f0] sm:$0xff] }
 0xe31   : > { %7866 = vmatpush3.msra.mxu0 %v6305_v1  ;;  %7904 = vmatpush3.msra.mxu1 %v6337_v4  ;;  %v6426_v1 = vld [vmem:[%s8888_s3 + $0x3f0] sm:$0xff] }
 0xe32   : > { %7867 = vmatprep.subr.mxu0 %v6320_v5  ;;  %7905 = vmatprep.subr.mxu1 %v6352_v7 }
 0xe33   : > { %7868 = vmatpush3.msra.mxu0 %v6304_v8  ;;  %7906 = vmatpush3.msra.mxu1 %v6336_v10  ;;  %v6378_v8 = vld [vmem:[%s8888_s3 + $0x270] sm:$0xff] }
 0xe34   : > { %7869 = vmatprep.subr.mxu0 %v6319_v11  ;;  %7907 = vmatprep.subr.mxu1 %v6351_v12  ;;  %v6410_v10 = vld [vmem:[%s8888_s3 + $0x370] sm:$0xff] }
 0xe35   : > { %7870 = vmatpush3.msra.mxu0 %v6303_v13  ;;  %7908 = vmatpush3.msra.mxu1 %v6335_v14  ;;  %v9571_v13 = vrot.slane %v9544_v39, %v5588_v61  ;;  %v9576_v14 = vrot.slane %v9544_v39, %v5596_v3 }
 0xe36   : > { %7871 = vmatprep.subr.mxu0 %v6318_v16  ;;  %7909 = vmatprep.subr.mxu1 %v6350_v17  ;;  %v6393_v16 = vld [vmem:[%s8888_s3 + $0x2e8] sm:$0xff] }
 0xe37   : > { %7872 = vmatpush3.msra.mxu0 %v6302_v19  ;;  %7910 = vmatpush3.msra.mxu1 %v6334_v20  ;;  %v6425_v17 = vld [vmem:[%s8888_s3 + $0x3e8] sm:$0xff] }
 0xe38   : > { %7873 = vmatprep.subr.mxu0 %v6317_v21  ;;  %7911 = vmatprep.subr.mxu1 %v6349_v22 }
 0xe39   : > { %7874 = vmatpush3.msra.mxu0 %v6301_v23  ;;  %7912 = vmatpush3.msra.mxu1 %v6333_v24  ;;  %v6377_v23 = vld [vmem:[%s8888_s3 + $0x268] sm:$0xff] }
 0xe3a   : > { %7875 = vmatprep.subr.mxu0 %v6316_v25  ;;  %7913 = vmatprep.subr.mxu1 %v6348_v26  ;;  %v6409_v24 = vld [vmem:[%s8888_s3 + $0x368] sm:$0xff] }
 0xe3b   : > { %7876 = vmatpush3.msra.mxu0 %v6300_v27  ;;  %7914 = vmatpush3.msra.mxu1 %v6332_v28  ;;  %v6392_v27 = vld [vmem:[%s8888_s3 + $0x2e0] sm:$0xff] }
 0xe3c   : > { %7921 = vmatprep.subr.mxu0 %v6395_v29  ;;  %7959 = vmatprep.subr.mxu1 %v6427_v30  ;;  %v6424_v28 = vld [vmem:[%s8888_s3 + $0x3e0] sm:$0xff] }
 0xeb6   : > { %v5718_v44 = vpop.f32.mrf.mxu0  ;;  %v5795_v46 = vpop.f32.mrf.mxu1 }
 0xeb7   : > { %v5719_v48 = vadd.f32 %v5718_v44, %v5569_v9  ;;  %v5796_v18 = vadd.f32 %v5795_v46, %v5577_v41  ;;  %v6423_v44 = vld [vmem:[%s8888_s3 + $0x3d8] sm:$0xff] }
 0xeb8   : > { %v5720_v15 = vpop.f32.mrf.mxu0  ;;  %v5797_v49 = vpop.f32.mrf.mxu1  ;;  %v6375_v46 = vld [vmem:[%s8888_s3 + $0x258] sm:$0xff] }
 0xeb9   : > { %v5721_v53 = vadd.f32 %v5720_v15, %v5573_v42  ;;  %v5798_v50 = vadd.f32 %v5797_v49, %v5581_v43  ;;  %v6268_v57 = vmax.f32 %v5719_v48, 0.0  ;;  %v6270_v58 = vmax.f32 %v5796_v18, 0.0  ;;  %v6407_v48 = vld [vmem:[%s8888_s3 + $0x358] sm:$0xff]  ;;  %v6390_v18 = vld [vmem:[%s8888_s3 + $0x2d0] sm:$0xff] }
 0xeba   : > { %v6422_v15 = vld [vmem:[%s8888_s3 + $0x3d0] sm:$0xff] }
 0xebb   : > { %v6269_v56 = vmax.f32 %v5721_v53, 0.0  ;;  %v6271_v51 = vmax.f32 %v5798_v50, 0.0  ;;  %v5724_v52 = vpop.f32.mrf.mxu0  ;;  %v5801_v55 = vpop.f32.mrf.mxu1  ;;  %v6374_v49 = vld [vmem:[%s8888_s3 + $0x250] sm:$0xff]  ;;  %v6389_v50 = vld [vmem:[%s8888_s3 + $0x2c8] sm:$0xff] }
 0xebc   : > { %v5725_v62 = vadd.f32 %v5724_v52, %v5569_v9  ;;  %v5802_v4 = vadd.f32 %v5801_v55, %v5577_v41  ;;  %v6408_v9 = vld [vmem:[%s8888_s3 + $0x360] sm:$0xff]  ;;  %v6391_v41 = vld [vmem:[%s8888_s3 + $0x2d8] sm:$0xff]  ;;  %v6406_v53 = vld [vmem:[%s8888_s3 + $0x350] sm:$0xff] }
 0xebd   : > { %v5726_v2 = vpop.f32.mrf.mxu0  ;;  %v5803_v63 = vpop.f32.mrf.mxu1  ;;  %6620 = vmatprep.mubr.f32.mxu0 %v6269_v56  ;;  %6695 = vmatprep.mubr.f32.mxu1 %v6271_v51  ;;  %v6421_v56 = vld [vmem:[%s8888_s3 + $0x3c8] sm:$0xff]  ;;  %v6388_v55 = vld [vmem:[%s8888_s3 + $0x2c0] sm:$0xff] }
 0xebe   : > { %v5727_v5 = vadd.f32 %v5726_v2, %v5573_v42  ;;  %v5804_v7 = vadd.f32 %v5803_v63, %v5581_v43  ;;  %6621 = vmatmul.mubr.f32.vlgmr.msra.gmra.mxu0 %v6268_v57  ;;  %6696 = vmatmul.mubr.f32.vlgmr.msra.gmra.mxu1 %v6270_v58  ;;  %v6284_v21 = vmax.f32 %v5725_v62, 0.0  ;;  %v6286_v22 = vmax.f32 %v5802_v4, 0.0  ;;  %v6373_v51 = vld [vmem:[%s8888_s3 + $0x248] sm:$0xff]  ;;  %v6420_v57 = vld [vmem:[%s8888_s3 + $0x3c0] sm:$0xff]  ;;  %v6419_v62 = vld [vmem:[%s8888_s3 + $0x3b8] sm:$0xff] }
 0xebf   : > { %7922 = vmatpush3.msra.mxu0 %v6379_v59  ;;  %7960 = vmatpush3.msra.mxu1 %v6411_v60  ;;  %v6405_v52 = vld [vmem:[%s8888_s3 + $0x348] sm:$0xff]  ;;  %v6372_v58 = vld [vmem:[%s8888_s3 + $0x240] sm:$0xff]  ;;  %v6387_v60 = vld [vmem:[%s8888_s3 + $0x2b8] sm:$0xff] }
 0xec0   : > { %v6285_v11 = vmax.f32 %v5727_v5, 0.0  ;;  %v6287_v12 = vmax.f32 %v5804_v7, 0.0  ;;  %7923 = vmatprep.subr.mxu0 %v6394_v0  ;;  %7961 = vmatprep.subr.mxu1 %v6426_v1  ;;  %v6404_v59 = vld [vmem:[%s8888_s3 + $0x340] sm:$0xff]  ;;  %v6371_v2 = vld [vmem:[%s8888_s3 + $0x238] sm:$0xff]  ;;  %v6386_v0 = vld [vmem:[%s8888_s3 + $0x2b0] sm:$0xff] }
 0xec1   : > { %v9580_v19 = vpop.f32.mrf.mxu0  ;;  %v9582_v20 = vpop.f32.mrf.mxu1  ;;  %7924 = vmatpush3.msra.mxu0 %v6378_v8  ;;  %7962 = vmatpush3.msra.mxu1 %v6410_v10  ;;  %v6403_v63 = vld [vmem:[%s8888_s3 + $0x338] sm:$0xff]  ;;  %v6418_v1 = vld [vmem:[%s8888_s3 + $0x3b0] sm:$0xff]  ;;  %v6385_v7 = vld [vmem:[%s8888_s3 + $0x2a8] sm:$0xff] }
 0xec2   : > { %6625 = vmatprep.mubr.f32.mxu0 %v6285_v11  ;;  %6700 = vmatprep.mubr.f32.mxu1 %v6287_v12  ;;  %v6370_v4 = vld [vmem:[%s8888_s3 + $0x230] sm:$0xff]  ;;  %v6417_v8 = vld [vmem:[%s8888_s3 + $0x3a8] sm:$0xff] }
 0xec3   : > { %v5874_v25 = vpop.f32.mrf.mxu0  ;;  %v5951_v26 = vpop.f32.mrf.mxu1  ;;  %7925 = vmatprep.subr.mxu0 %v6393_v16  ;;  %7963 = vmatprep.subr.mxu1 %v6425_v17  ;;  %v6402_v5 = vld [vmem:[%s8888_s3 + $0x330] sm:$0xff]  ;;  %v6369_v10 = vld [vmem:[%s8888_s3 + $0x228] sm:$0xff]  ;;  %v6384_v16 = vld [vmem:[%s8888_s3 + $0x2a0] sm:$0xff] }
 0xec4   : > { %v5875_v29 = vadd.f32 %v5874_v25, %v9571_v13  ;;  %v5952_v30 = vadd.f32 %v5951_v26, %v9576_v14  ;;  %6626 = vmatmul.mubr.f32.gmra.mxu0 %v6284_v21  ;;  %6701 = vmatmul.mubr.f32.gmra.mxu1 %v6286_v22  ;;  %v6401_v11 = vld [vmem:[%s8888_s3 + $0x328] sm:$0xff]  ;;  %v6416_v17 = vld [vmem:[%s8888_s3 + $0x3a0] sm:$0xff]  ;;  %v6415_v25 = vld [vmem:[%s8888_s3 + $0x398] sm:$0xff]  ;;  %v5585_v26 = vrot.slane %v9544_v39, %v5584_v33 }
 0xec5   : > { %7926 = vmatpush3.msra.mxu0 %v6377_v23  ;;  %7964 = vmatpush3.msra.mxu1 %v6409_v24  ;;  %v6368_v22 = vld [vmem:[%s8888_s3 + $0x220] sm:$0xff]  ;;  %v6383_v24 = vld [vmem:[%s8888_s3 + $0x298] sm:$0xff]  ;;  %v6366_v33 = vld [vmem:[%s8888_s3 + $0x210] sm:$0xff] }
 0xec6   : > { %v6273_v42 = vmax.f32 %v5875_v29, 0.0  ;;  %v6275_v43 = vmax.f32 %v5952_v30, 0.0  ;;  %7927 = vmatprep.subr.mxu0 %v6392_v27  ;;  %7965 = vmatprep.subr.mxu1 %v6424_v28  ;;  %v6400_v23 = vld [vmem:[%s8888_s3 + $0x320] sm:$0xff]  ;;  %v5593_v27 = vrot.slane %v9544_v39, %v5592_v34  ;;  %v6367_v28 = vld [vmem:[%s8888_s3 + $0x218] sm:$0xff]  ;;  %v6398_v34 = vld [vmem:[%s8888_s3 + $0x310] sm:$0xff] }
 0xec7   : > { %7928 = vmatpush3.msra.mxu0 %v6376_v31  ;;  %7966 = vmatpush3.msra.mxu1 %v6408_v9  ;;  %v9620_v12 = vpop.f32.mrf.mxu0  ;;  %v5955_v21 = vpop.f32.mrf.mxu1  ;;  %v6399_v29 = vld [vmem:[%s8888_s3 + $0x318] sm:$0xff]  ;;  %v6382_v31 = vld [vmem:[%s8888_s3 + $0x290] sm:$0xff]  ;;  %v6381_v39 = vld [vmem:[%s8888_s3 + $0x288] sm:$0xff] }
 0xec8   : > { %7929 = vmatprep.subr.mxu0 %v6391_v41  ;;  %6770 = vmatprep.mubr.f32.mxu0 %v6273_v42  ;;  %v6414_v9 = vld [vmem:[%s8888_s3 + $0x390] sm:$0xff]  ;;  %v6413_v42 = vld [vmem:[%s8888_s3 + $0x388] sm:$0xff] }
 0xec9   : > { %7967 = vmatprep.subr.mxu1 %v6423_v44  ;;  %6845 = vmatprep.mubr.f32.mxu1 %v6275_v43  ;;  %v5880_v30 = vpop.f32.mrf.mxu0  ;;  %v5957_v41 = vpop.f32.mrf.mxu1  ;;  %v5873_v43 = vadd.f32 %v9580_v19, %v5585_v26  ;;  %v5950_v44 = vadd.f32 %v9582_v20, %v5593_v27  ;;  %v6364_v20 = vld [vmem:[%s8888_s3 + $0x200] sm:$0xff] }
 0xeca   : > { %7930 = vmatpush3.msra.mxu0 %v6375_v46  ;;  %7968 = vmatpush3.msra.mxu1 %v6407_v48  ;;  %v6365_v46 = vld [vmem:[%s8888_s3 + $0x208] sm:$0xff]  ;;  %v5958_v19 = vadd.f32 %v5957_v41, %v9576_v14  ;;  %v6491_v14 = vld [vmem:[%s8888_s3 + $0x5f8] sm:$0xff]  ;;  %v6486_v41 = vld [vmem:[%s8888_s3 + $0x5d0] sm:$0xff] }
 0xecb   : > { %7931 = vmatprep.subr.mxu0 %v6390_v18  ;;  %7969 = vmatprep.subr.mxu1 %v6422_v15  ;;  %v6397_v48 = vld [vmem:[%s8888_s3 + $0x308] sm:$0xff]  ;;  %v6380_v15 = vld [vmem:[%s8888_s3 + $0x280] sm:$0xff] }
 0xecc   : > { %7932 = vmatpush3.msra.mxu0 %v6374_v49  ;;  %7970 = vmatpush3.msra.mxu1 %v6406_v53  ;;  %v6412_v49 = vld [vmem:[%s8888_s3 + $0x380] sm:$0xff]  ;;  %v5881_v53 = vadd.f32 %v5880_v30, %v9571_v13  ;;  %v6459_v13 = vld [vmem:[%s8888_s3 + $0x4f8] sm:$0xff] }
 0xecd   : > { %7933 = vmatprep.subr.mxu0 %v6389_v50  ;;  %7971 = vmatprep.subr.mxu1 %v6421_v56  ;;  %v9646_v18 = vpop.f32.mrf.mxu0  ;;  %v9652_v50 = vpop.f32.mrf.mxu1  ;;  %v6396_v56 = vld [vmem:[%s8888_s3 + $0x300] sm:$0xff]  ;;  %v6439_v30 = vld [vmem:[%s8888_s3 + $0x458] sm:$0xff] }
 0xece   : > { %7934 = vmatpush3.msra.mxu0 %v6373_v51  ;;  %7972 = vmatpush3.msra.mxu1 %v6405_v52  ;;  %v6272_v51 = vmax.f32 %v5873_v43, 0.0  ;;  %v6274_v52 = vmax.f32 %v5950_v44, 0.0  ;;  %v6437_v43 = vld [vmem:[%s8888_s3 + $0x448] sm:$0xff] }
 0xecf   : > { %7935 = vmatprep.subr.mxu0 %v6388_v55  ;;  %7973 = vmatprep.subr.mxu1 %v6420_v57  ;;  %v9659_v55 = vrot.slane %v9529_v54, %v5572_v40  ;;  %v6028_v57 = vpop.f32.mrf.mxu0  ;;  %v5956_v40 = vadd.f32 %v5955_v21, %v5593_v27  ;;  %v6472_v27 = vld [vmem:[%s8888_s3 + $0x560] sm:$0xff]  ;;  %v6469_v44 = vld [vmem:[%s8888_s3 + $0x548] sm:$0xff] }
 0xed0   : > { %7936 = vmatpush3.msra.mxu0 %v6372_v58  ;;  %7974 = vmatpush3.msra.mxu1 %v6404_v59  ;;  %v9666_v58 = vrot.slane %v9529_v54, %v5580_v6  ;;  %v5879_v59 = vadd.f32 %v9620_v12, %v5585_v26  ;;  %v6458_v6 = vld [vmem:[%s8888_s3 + $0x4f0] sm:$0xff]  ;;  %v6457_v12 = vld [vmem:[%s8888_s3 + $0x4e8] sm:$0xff]  ;;  %v6440_v26 = vld [vmem:[%s8888_s3 + $0x460] sm:$0xff] }
 0xed1   : > { %7937 = vmatprep.subr.mxu0 %v6387_v60  ;;  %7975 = vmatprep.subr.mxu1 %v6419_v62  ;;  %v6289_v60 = vmax.f32 %v5881_v53, 0.0  ;;  %v6291_v62 = vmax.f32 %v5958_v19, 0.0  ;;  %v6451_v53 = vld [vmem:[%s8888_s3 + $0x4b8] sm:$0xff] }
 0xed2   : > { %7938 = vmatpush3.msra.mxu0 %v6371_v2  ;;  %7976 = vmatpush3.msra.mxu1 %v6403_v63  ;;  %v6105_v2 = vpop.f32.mrf.mxu1  ;;  %v6443_v63 = vld [vmem:[%s8888_s3 + $0x478] sm:$0xff] }
 0xed3   : > { %7939 = vmatprep.subr.mxu0 %v6386_v0  ;;  %7977 = vmatprep.subr.mxu1 %v6418_v1  ;;  %v6475_v0 = vld [vmem:[%s8888_s3 + $0x578] sm:$0xff]  ;;  %v6490_v1 = vld [vmem:[%s8888_s3 + $0x5f0] sm:$0xff] }
 0xed4   : > { %7940 = vmatpush3.msra.mxu0 %v6370_v4  ;;  %7978 = vmatpush3.msra.mxu1 %v6402_v5  ;;  %v6029_v4 = vadd.f32 %v6028_v57, %v9659_v55  ;;  %v6442_v5 = vld [vmem:[%s8888_s3 + $0x470] sm:$0xff]  ;;  %v6483_v19 = vld [vmem:[%s8888_s3 + $0x5b8] sm:$0xff]  ;;  %v6449_v57 = vld [vmem:[%s8888_s3 + $0x4a8] sm:$0xff] }
 0xed5   : > { %7941 = vmatprep.subr.mxu0 %v6385_v7  ;;  %7979 = vmatprep.subr.mxu1 %v6417_v8  ;;  %v6474_v7 = vld [vmem:[%s8888_s3 + $0x570] sm:$0xff]  ;;  %v6106_v8 = vadd.f32 %v6105_v2, %v9666_v58  ;;  %v6448_v2 = vld [vmem:[%s8888_s3 + $0x4a0] sm:$0xff] }
 0xed6   : > { %7942 = vmatpush3.msra.mxu0 %v6369_v10  ;;  %7980 = vmatpush3.msra.mxu1 %v6401_v11  ;;  %v6288_v10 = vmax.f32 %v5879_v59, 0.0  ;;  %v6290_v11 = vmax.f32 %v5956_v40, 0.0  ;;  %v6277_v21 = vmax.f32 %v6029_v4, 0.0  ;;  %v6481_v59 = vld [vmem:[%s8888_s3 + $0x5a8] sm:$0xff]  ;;  %v6447_v4 = vld [vmem:[%s8888_s3 + $0x498] sm:$0xff] }
 0xed7   : > { %7943 = vmatprep.subr.mxu0 %v6384_v16  ;;  %7981 = vmatprep.subr.mxu1 %v6416_v17  ;;  %v6489_v16 = vld [vmem:[%s8888_s3 + $0x5e8] sm:$0xff] }
 0xed8   : > { %7944 = vmatpush3.msra.mxu0 %v6368_v22  ;;  %7982 = vmatpush3.msra.mxu1 %v6400_v23  ;;  %v6441_v17 = vld [vmem:[%s8888_s3 + $0x468] sm:$0xff]  ;;  %v6279_v23 = vmax.f32 %v6106_v8, 0.0  ;;  %v5609_v8 = vrot.slane %v9529_v54, %v5576_v38  ;;  %v6462_v38 = vld [vmem:[%s8888_s3 + $0x510] sm:$0xff] }
 0xed9   : > { %7945 = vmatprep.subr.mxu0 %v6383_v24  ;;  %7983 = vmatprep.subr.mxu1 %v6415_v25  ;;  %v6473_v22 = vld [vmem:[%s8888_s3 + $0x568] sm:$0xff]  ;;  %v6456_v24 = vld [vmem:[%s8888_s3 + $0x4e0] sm:$0xff] }
 0xeda   : > { %7946 = vmatpush3.msra.mxu0 %v6367_v28  ;;  %7984 = vmatpush3.msra.mxu1 %v6399_v29  ;;  %v6488_v25 = vld [vmem:[%s8888_s3 + $0x5e0] sm:$0xff]  ;;  %v6455_v28 = vld [vmem:[%s8888_s3 + $0x4d8] sm:$0xff]  ;;  %v6433_v40 = vld [vmem:[%s8888_s3 + $0x428] sm:$0xff] }
 0xedb   : > { %7947 = vmatprep.subr.mxu0 %v6382_v31  ;;  %7985 = vmatprep.subr.mxu1 %v6414_v9  ;;  %v6487_v29 = vld [vmem:[%s8888_s3 + $0x5d8] sm:$0xff]  ;;  %v6454_v9 = vld [vmem:[%s8888_s3 + $0x4d0] sm:$0xff] }
 0xedc   : > { %7948 = vmatpush3.msra.mxu0 %v6366_v33  ;;  %7986 = vmatpush3.msra.mxu1 %v6398_v34  ;;  %v6471_v31 = vld [vmem:[%s8888_s3 + $0x558] sm:$0xff]  ;;  %v6438_v33 = vld [vmem:[%s8888_s3 + $0x450] sm:$0xff] }
 0xedd   : > { %7949 = vmatprep.subr.mxu0 %v6381_v39  ;;  %7987 = vmatprep.subr.mxu1 %v6413_v42  ;;  %v6470_v34 = vld [vmem:[%s8888_s3 + $0x550] sm:$0xff]  ;;  %v6453_v39 = vld [vmem:[%s8888_s3 + $0x4c8] sm:$0xff] }
 0xede   : > { %7950 = vmatpush3.msra.mxu0 %v6365_v46  ;;  %7988 = vmatpush3.msra.mxu1 %v6397_v48  ;;  %v6485_v42 = vld [vmem:[%s8888_s3 + $0x5c8] sm:$0xff]  ;;  %v6452_v46 = vld [vmem:[%s8888_s3 + $0x4c0] sm:$0xff] }
 0xedf   : > { %7951 = vmatprep.subr.mxu0 %v6380_v15  ;;  %7989 = vmatprep.subr.mxu1 %v6412_v49  ;;  %v6484_v48 = vld [vmem:[%s8888_s3 + $0x5c0] sm:$0xff] }
 0xee0   : > { %7952 = vmatpush3.msra.mxu0 %v6364_v20  ;;  %7990 = vmatpush3.msra.mxu1 %v6396_v56  ;;  %v6436_v15 = vld [vmem:[%s8888_s3 + $0x440] sm:$0xff]  ;;  %v6435_v20 = vld [vmem:[%s8888_s3 + $0x438] sm:$0xff] }
 0xee1   : > { %6771 = vmatmul.mubr.f32.vlgmr.msra.gmra.mxu0 %v6272_v51  ;;  %6846 = vmatmul.mubr.f32.vlgmr.msra.gmra.mxu1 %v6274_v52  ;;  %v6468_v49 = vld [vmem:[%s8888_s3 + $0x540] sm:$0xff]  ;;  %v6467_v56 = vld [vmem:[%s8888_s3 + $0x538] sm:$0xff]  ;;  %v6450_v51 = vld [vmem:[%s8888_s3 + $0x4b0] sm:$0xff] }
 0xee2   : > { %7997 = vmatprep.subr.mxu0 %v6459_v13  ;;  %8035 = vmatprep.subr.mxu1 %v6491_v14  ;;  %v6482_v52 = vld [vmem:[%s8888_s3 + $0x5b0] sm:$0xff] }
 0xee3   : > { %6775 = vmatprep.mubr.f32.mxu0 %v6289_v60  ;;  %6850 = vmatprep.mubr.f32.mxu1 %v6291_v62  ;;  %v6434_v13 = vld [vmem:[%s8888_s3 + $0x430] sm:$0xff]  ;;  %v6465_v60 = vld [vmem:[%s8888_s3 + $0x528] sm:$0xff]  ;;  %v9713_v62 = vpop.f32.mrf.mxu0 }
 0xee4   : > { %7998 = vmatpush3.msra.mxu0 %v6443_v63  ;;  %8036 = vmatpush3.msra.mxu1 %v6475_v0  ;;  %v6466_v14 = vld [vmem:[%s8888_s3 + $0x530] sm:$0xff]  ;;  %v6480_v63 = vld [vmem:[%s8888_s3 + $0x5a0] sm:$0xff]  ;;  %v6109_v0 = vpop.f32.mrf.mxu1 }
 0xee5   : > { %7999 = vmatprep.subr.mxu0 %v6458_v6  ;;  %8037 = vmatprep.subr.mxu1 %v6490_v1  ;;  %v6432_v6 = vld [vmem:[%s8888_s3 + $0x420] sm:$0xff] }
 0xee6   : > { %8000 = vmatpush3.msra.mxu0 %v6442_v5  ;;  %8038 = vmatpush3.msra.mxu1 %v6474_v7  ;;  %v6464_v1 = vld [vmem:[%s8888_s3 + $0x520] sm:$0xff]  ;;  %v6479_v5 = vld [vmem:[%s8888_s3 + $0x598] sm:$0xff]  ;;  %v5601_v7 = vrot.slane %v9529_v54, %v5568_v37  ;;  %v6430_v37 = vld [vmem:[%s8888_s3 + $0x410] sm:$0xff] }
 0xee7   : > { %6776 = vmatmul.mubr.f32.gmra.mxu0 %v6288_v10  ;;  %6851 = vmatmul.mubr.f32.gmra.mxu1 %v6290_v11  ;;  %v6431_v10 = vld [vmem:[%s8888_s3 + $0x418] sm:$0xff] }
 0xee8   : > { %8001 = vmatprep.subr.mxu0 %v6457_v12  ;;  %8039 = vmatprep.subr.mxu1 %v6489_v16  ;;  %v6463_v11 = vld [vmem:[%s8888_s3 + $0x518] sm:$0xff]  ;;  %v6034_v12 = vpop.f32.mrf.mxu0  ;;  %v6446_v16 = vld [vmem:[%s8888_s3 + $0x490] sm:$0xff] }
 0xee9   : > { %8002 = vmatpush3.msra.mxu0 %v6441_v17  ;;  %6920 = vmatprep.mubr.f32.mxu0 %v6277_v21  ;;  %v6478_v17 = vld [vmem:[%s8888_s3 + $0x590] sm:$0xff]  ;;  %v6111_v21 = vpop.f32.mrf.mxu1 }
 0xeea   : > { %8040 = vmatpush3.msra.mxu1 %v6473_v22  ;;  %6995 = vmatprep.mubr.f32.mxu1 %v6279_v23  ;;  %v6445_v22 = vld [vmem:[%s8888_s3 + $0x488] sm:$0xff] }
 0xeeb   : > { %8003 = vmatprep.subr.mxu0 %v6456_v24  ;;  %8041 = vmatprep.subr.mxu1 %v6488_v25  ;;  %v6477_v23 = vld [vmem:[%s8888_s3 + $0x588] sm:$0xff]  ;;  %v6027_v24 = vadd.f32 %v9646_v18, %v5601_v7  ;;  %v6104_v25 = vadd.f32 %v9652_v50, %v5609_v8  ;;  %v6112_v18 = vadd.f32 %v6111_v21, %v9666_v58  ;;  %v6428_v50 = vld [vmem:[%s8888_s3 + $0x400] sm:$0xff]  ;;  %v6555_v58 = vld [vmem:[%s8888_s3 + $0x7f8] sm:$0xff] }
 0xeec   : > { %8004 = vmatpush3.msra.mxu0 %v6440_v26  ;;  %8042 = vmatpush3.msra.mxu1 %v6472_v27  ;;  %v6429_v26 = vld [vmem:[%s8888_s3 + $0x408] sm:$0xff] }
 0xeed   : > { %8005 = vmatprep.subr.mxu0 %v6455_v28  ;;  %8043 = vmatprep.subr.mxu1 %v6487_v29  ;;  %v6461_v27 = vld [vmem:[%s8888_s3 + $0x508] sm:$0xff]  ;;  %v9739_v28 = vpop.f32.mrf.mxu0  ;;  %v6444_v29 = vld [vmem:[%s8888_s3 + $0x480] sm:$0xff] }
 0xeee   : > { %8006 = vmatpush3.msra.mxu0 %v6439_v30  ;;  %8044 = vmatpush3.msra.mxu1 %v6471_v31  ;;  %v6476_v30 = vld [vmem:[%s8888_s3 + $0x580] sm:$0xff]  ;;  %v6035_v31 = vadd.f32 %v6034_v12, %v9659_v55  ;;  %v6523_v55 = vld [vmem:[%s8888_s3 + $0x6f8] sm:$0xff]  ;;  %v6517_v12 = vld [vmem:[%s8888_s3 + $0x6c8] sm:$0xff] }
 0xeef   : > { %8007 = vmatprep.subr.mxu0 %v6454_v9  ;;  %8045 = vmatprep.subr.mxu1 %v6486_v41  ;;  %v9745_v9 = vpop.f32.mrf.mxu1  ;;  %v6460_v41 = vld [vmem:[%s8888_s3 + $0x500] sm:$0xff]  ;;  %v6533_v21 = vld [vmem:[%s8888_s3 + $0x748] sm:$0xff] }
 0xef0   : > { %8008 = vmatpush3.msra.mxu0 %v6438_v33  ;;  %8046 = vmatpush3.msra.mxu1 %v6470_v34  ;;  %v6276_v33 = vmax.f32 %v6027_v24, 0.0  ;;  %v6278_v34 = vmax.f32 %v6104_v25, 0.0  ;;  %v6515_v24 = vld [vmem:[%s8888_s3 + $0x6b8] sm:$0xff] }
 0xef1   : > { %8009 = vmatprep.subr.mxu0 %v6453_v39  ;;  %8047 = vmatprep.subr.mxu1 %v6485_v42  ;;  %v9752_v39 = vrot.slane %v9529_v54, %v5588_v61  ;;  %v6182_v42 = vpop.f32.mrf.mxu0  ;;  %v6110_v61 = vadd.f32 %v6109_v0, %v5609_v8  ;;  %v6536_v0 = vld [vmem:[%s8888_s3 + $0x760] sm:$0xff]  ;;  %v6550_v8 = vld [vmem:[%s8888_s3 + $0x7d0] sm:$0xff]  ;;  %v6547_v25 = vld [vmem:[%s8888_s3 + $0x7b8] sm:$0xff] }
 0xef2   : > { %8010 = vmatpush3.msra.mxu0 %v6437_v43  ;;  %8048 = vmatpush3.msra.mxu1 %v6469_v44  ;;  %v9759_v43 = vrot.slane %v9529_v54, %v5596_v3  ;;  %v6033_v44 = vadd.f32 %v9713_v62, %v5601_v7  ;;  %v6554_v54 = vld [vmem:[%s8888_s3 + $0x7f0] sm:$0xff]  ;;  %v6520_v62 = vld [vmem:[%s8888_s3 + $0x6e0] sm:$0xff] }
 0xef3   : > { %8011 = vmatprep.subr.mxu0 %v6452_v46  ;;  %8049 = vmatprep.subr.mxu1 %v6484_v48  ;;  %v6293_v46 = vmax.f32 %v6035_v31, 0.0  ;;  %v6295_v48 = vmax.f32 %v6112_v18, 0.0  ;;  %v6183_v3 = vadd.f32 %v6182_v42, %v9752_v39  ;;  %v6518_v7 = vld [vmem:[%s8888_s3 + $0x6d0] sm:$0xff]  ;;  %v6186_v42 = vpop.f32.mrf.mxu0 }
 0xef4   : > { %8012 = vmatpush3.msra.mxu0 %v6436_v15  ;;  %8050 = vmatpush3.msra.mxu1 %v6468_v49  ;;  %v6259_v15 = vpop.f32.mrf.mxu1  ;;  %v6507_v49 = vld [vmem:[%s8888_s3 + $0x678] sm:$0xff]  ;;  %v6498_v31 = vld [vmem:[%s8888_s3 + $0x630] sm:$0xff] }
 0xef5   : > { %8013 = vmatprep.subr.mxu0 %v6451_v53  ;;  %8051 = vmatprep.subr.mxu1 %v6483_v19  ;;  %v6539_v53 = vld [vmem:[%s8888_s3 + $0x778] sm:$0xff]  ;;  %v6506_v19 = vld [vmem:[%s8888_s3 + $0x670] sm:$0xff] }
 0xef6   : > { %8014 = vmatpush3.msra.mxu0 %v6435_v20  ;;  %8052 = vmatpush3.msra.mxu1 %v6467_v56  ;;  %v6538_v20 = vld [vmem:[%s8888_s3 + $0x770] sm:$0xff]  ;;  %v6260_v56 = vadd.f32 %v6259_v15, %v9759_v43  ;;  %v6543_v15 = vld [vmem:[%s8888_s3 + $0x798] sm:$0xff] }
 0xef7   : > { %8015 = vmatprep.subr.mxu0 %v6450_v51  ;;  %8053 = vmatprep.subr.mxu1 %v6482_v52  ;;  %v6292_v51 = vmax.f32 %v6033_v44, 0.0  ;;  %v6294_v52 = vmax.f32 %v6110_v61, 0.0  ;;  %v6530_v18 = vld [vmem:[%s8888_s3 + $0x730] sm:$0xff]  ;;  %v6263_v44 = vpop.f32.mrf.mxu1  ;;  %v6496_v61 = vld [vmem:[%s8888_s3 + $0x620] sm:$0xff] }
 0xef8   : > { %8016 = vmatpush3.msra.mxu0 %v6434_v13  ;;  %8054 = vmatpush3.msra.mxu1 %v6466_v14  ;;  %v6521_v13 = vld [vmem:[%s8888_s3 + $0x6e8] sm:$0xff] }
 0xef9   : > { %8017 = vmatprep.subr.mxu0 %v6449_v57  ;;  %8055 = vmatprep.subr.mxu1 %v6481_v59  ;;  %v6553_v14 = vld [vmem:[%s8888_s3 + $0x7e8] sm:$0xff]  ;;  %v6281_v59 = vmax.f32 %v6183_v3, 0.0  ;;  %v6188_v3 = vpop.f32.mrf.mxu0 }
 0xefa   : > { %8018 = vmatpush3.msra.mxu0 %v6433_v40  ;;  %8056 = vmatpush3.msra.mxu1 %v6465_v60  ;;  %v6505_v57 = vld [vmem:[%s8888_s3 + $0x668] sm:$0xff]  ;;  %v6283_v60 = vmax.f32 %v6260_v56, 0.0  ;;  %v6526_v56 = vld [vmem:[%s8888_s3 + $0x710] sm:$0xff] }
 0xefb   : > { %8019 = vmatprep.subr.mxu0 %v6448_v2  ;;  %8057 = vmatprep.subr.mxu1 %v6480_v63  ;;  %v6537_v40 = vld [vmem:[%s8888_s3 + $0x768] sm:$0xff]  ;;  %v6552_v2 = vld [vmem:[%s8888_s3 + $0x7e0] sm:$0xff] }
 0xefc   : > { %8020 = vmatpush3.msra.mxu0 %v6432_v6  ;;  %8058 = vmatpush3.msra.mxu1 %v6464_v1  ;;  %v6504_v63 = vld [vmem:[%s8888_s3 + $0x660] sm:$0xff]  ;;  %v6519_v6 = vld [vmem:[%s8888_s3 + $0x6d8] sm:$0xff] }
 0xefd   : > { %8021 = vmatprep.subr.mxu0 %v6447_v4  ;;  %8059 = vmatprep.subr.mxu1 %v6479_v5  ;;  %v6551_v1 = vld [vmem:[%s8888_s3 + $0x7d8] sm:$0xff] }
 0xefe   : > { %8022 = vmatpush3.msra.mxu0 %v6431_v10  ;;  %8060 = vmatpush3.msra.mxu1 %v6463_v11  ;;  %v6503_v4 = vld [vmem:[%s8888_s3 + $0x658] sm:$0xff]  ;;  %v6502_v10 = vld [vmem:[%s8888_s3 + $0x650] sm:$0xff] }
 0xeff   : > { %8023 = vmatprep.subr.mxu0 %v6446_v16  ;;  %8061 = vmatprep.subr.mxu1 %v6478_v17  ;;  %v6535_v5 = vld [vmem:[%s8888_s3 + $0x758] sm:$0xff]  ;;  %v6534_v11 = vld [vmem:[%s8888_s3 + $0x750] sm:$0xff]  ;;  %v6549_v16 = vld [vmem:[%s8888_s3 + $0x7c8] sm:$0xff] }
 0xf00   : > { %8024 = vmatpush3.msra.mxu0 %v6430_v37  ;;  %8062 = vmatpush3.msra.mxu1 %v6462_v38  ;;  %v6501_v17 = vld [vmem:[%s8888_s3 + $0x648] sm:$0xff]  ;;  %v6516_v37 = vld [vmem:[%s8888_s3 + $0x6c0] sm:$0xff] }
 0xf01   : > { %8025 = vmatprep.subr.mxu0 %v6445_v22  ;;  %8063 = vmatprep.subr.mxu1 %v6477_v23  ;;  %v6548_v38 = vld [vmem:[%s8888_s3 + $0x7c0] sm:$0xff] }
 0xf02   : > { %8026 = vmatpush3.msra.mxu0 %v6429_v26  ;;  %8064 = vmatpush3.msra.mxu1 %v6461_v27  ;;  %v6500_v22 = vld [vmem:[%s8888_s3 + $0x640] sm:$0xff]  ;;  %v6499_v26 = vld [vmem:[%s8888_s3 + $0x638] sm:$0xff] }
 0xf03   : > { %8027 = vmatprep.subr.mxu0 %v6444_v29  ;;  %8065 = vmatprep.subr.mxu1 %v6476_v30  ;;  %v6532_v23 = vld [vmem:[%s8888_s3 + $0x740] sm:$0xff]  ;;  %v6531_v27 = vld [vmem:[%s8888_s3 + $0x738] sm:$0xff]  ;;  %v6514_v29 = vld [vmem:[%s8888_s3 + $0x6b0] sm:$0xff] }
 0xf04   : > { %8028 = vmatpush3.msra.mxu0 %v6428_v50  ;;  %8066 = vmatpush3.msra.mxu1 %v6460_v41  ;;  %v6546_v30 = vld [vmem:[%s8888_s3 + $0x7b0] sm:$0xff]  ;;  %v6513_v50 = vld [vmem:[%s8888_s3 + $0x6a8] sm:$0xff] }
 0xf05   : > { %6921 = vmatmul.mubr.f32.vlgmr.msra.gmra.mxu0 %v6276_v33  ;;  %6996 = vmatmul.mubr.f32.vlgmr.msra.gmra.mxu1 %v6278_v34  ;;  %v6545_v41 = vld [vmem:[%s8888_s3 + $0x7a8] sm:$0xff] }
 0xf06   : > { %8073 = vmatprep.subr.mxu0 %v6523_v55  ;;  %8111 = vmatprep.subr.mxu1 %v6555_v58  ;;  %v6497_v33 = vld [vmem:[%s8888_s3 + $0x628] sm:$0xff]  ;;  %v6512_v55 = vld [vmem:[%s8888_s3 + $0x6a0] sm:$0xff] }
 0xf07   : > { %6925 = vmatprep.mubr.f32.mxu0 %v6293_v46  ;;  %7000 = vmatprep.mubr.f32.mxu1 %v6295_v48  ;;  %v6529_v34 = vld [vmem:[%s8888_s3 + $0x728] sm:$0xff]  ;;  %v6544_v58 = vld [vmem:[%s8888_s3 + $0x7a0] sm:$0xff]  ;;  %v6511_v48 = vld [vmem:[%s8888_s3 + $0x698] sm:$0xff] }
 0xf08   : > { %8074 = vmatpush3.msra.mxu0 %v6507_v49  ;;  %8112 = vmatpush3.msra.mxu1 %v6539_v53  ;;  %v6528_v46 = vld [vmem:[%s8888_s3 + $0x720] sm:$0xff]  ;;  %v6495_v49 = vld [vmem:[%s8888_s3 + $0x618] sm:$0xff] }
 0xf09   : > { %8075 = vmatprep.subr.mxu0 %v6522_v32  ;;  %8113 = vmatprep.subr.mxu1 %v6554_v54  ;;  %v6527_v53 = vld [vmem:[%s8888_s3 + $0x718] sm:$0xff]  ;;  %v6510_v32 = vld [vmem:[%s8888_s3 + $0x690] sm:$0xff] }
 0xf0a   : > { %8076 = vmatpush3.msra.mxu0 %v6506_v19  ;;  %8114 = vmatpush3.msra.mxu1 %v6538_v20  ;;  %v6542_v54 = vld [vmem:[%s8888_s3 + $0x790] sm:$0xff]  ;;  %v6265_v19 = vpop.f32.mrf.mxu1 }
 0xf0b   : > { %6926 = vmatmul.mubr.f32.gmra.mxu0 %v6292_v51  ;;  %7001 = vmatmul.mubr.f32.gmra.mxu1 %v6294_v52  ;;  %v6494_v20 = vld [vmem:[%s8888_s3 + $0x610] sm:$0xff]  ;;  %v6509_v51 = vld [vmem:[%s8888_s3 + $0x688] sm:$0xff] }
 0xf0c   : > { %8077 = vmatprep.subr.mxu0 %v6521_v13  ;;  %8115 = vmatprep.subr.mxu1 %v6553_v14  ;;  %v6541_v52 = vld [vmem:[%s8888_s3 + $0x788] sm:$0xff]  ;;  %v6181_v13 = vadd.f32 %v9739_v28, %v9534_v35  ;;  %v6258_v14 = vadd.f32 %v9745_v9, %v9539_v36 }
 0xf0d   : > { %8078 = vmatpush3.msra.mxu0 %v6505_v57  ;;  %7070 = vmatprep.mubr.f32.mxu0 %v6281_v59  ;;  %v6493_v57 = vld [vmem:[%s8888_s3 + $0x608] sm:$0xff] }
 0xf0e   : > { %8116 = vmatpush3.msra.mxu1 %v6537_v40  ;;  %7145 = vmatprep.mubr.f32.mxu1 %v6283_v60  ;;  %v6525_v59 = vld [vmem:[%s8888_s3 + $0x708] sm:$0xff]  ;;  %v6189_v40 = vadd.f32 %v6188_v3, %v9752_v39  ;;  %v6266_v60 = vadd.f32 %v6265_v19, %v9759_v43  ;;  %v6280_v28 = vmax.f32 %v6181_v13, 0.0  ;;  %v6282_v9 = vmax.f32 %v6258_v14, 0.0 }
 0xf0f   : > { %8079 = vmatprep.subr.mxu0 %v6520_v62  ;;  %8117 = vmatprep.subr.mxu1 %v6552_v2  ;;  %v6508_v62 = vld [vmem:[%s8888_s3 + $0x680] sm:$0xff] }
 0xf10   : > { %8080 = vmatpush3.msra.mxu0 %v6504_v63  ;;  %8118 = vmatpush3.msra.mxu1 %v6536_v0  ;;  %v6540_v2 = vld [vmem:[%s8888_s3 + $0x780] sm:$0xff]  ;;  %v6297_v39 = vmax.f32 %v6189_v40, 0.0  ;;  %v6299_v43 = vmax.f32 %v6266_v60, 0.0 }
 0xf11   : > { %8081 = vmatprep.subr.mxu0 %v6519_v6  ;;  %8119 = vmatprep.subr.mxu1 %v6551_v1  ;;  %v6492_v63 = vld [vmem:[%s8888_s3 + $0x600] sm:$0xff]  ;;  %v6187_v6 = vadd.f32 %v6186_v42, %v9534_v35  ;;  %v6264_v1 = vadd.f32 %v6263_v44, %v9539_v36 }
 0xf12   : > { %8082 = vmatpush3.msra.mxu0 %v6503_v4  ;;  %8120 = vmatpush3.msra.mxu1 %v6535_v5  ;;  %v6524_v0 = vld [vmem:[%s8888_s3 + $0x700] sm:$0xff]  ;;  %s9964_s3 = sld [smem:[#allocation35_spill]] }
 0xf13   : > { %8083 = vmatprep.subr.mxu0 %v6518_v7  ;;  %8121 = vmatprep.subr.mxu1 %v6550_v8  ;;  %v6296_v4 = vmax.f32 %v6187_v6, 0.0  ;;  %v6298_v5 = vmax.f32 %v6264_v1, 0.0 }
 0xf14   : > { %8084 = vmatpush3.msra.mxu0 %v6502_v10  ;;  %8122 = vmatpush3.msra.mxu1 %v6534_v11 }
 0xf15   : > { %8085 = vmatprep.subr.mxu0 %v6517_v12  ;;  %8123 = vmatprep.subr.mxu1 %v6549_v16 }
 0xf16   : > { %8086 = vmatpush3.msra.mxu0 %v6501_v17  ;;  %8124 = vmatpush3.msra.mxu1 %v6533_v21 }
 0xf17   : > { %8087 = vmatprep.subr.mxu0 %v6516_v37  ;;  %8125 = vmatprep.subr.mxu1 %v6548_v38 }
 0xf18   : > { %8088 = vmatpush3.msra.mxu0 %v6500_v22  ;;  %8126 = vmatpush3.msra.mxu1 %v6532_v23 }
 0xf19   : > { %8089 = vmatprep.subr.mxu0 %v6515_v24  ;;  %8127 = vmatprep.subr.mxu1 %v6547_v25 }
 0xf1a   : > { %8090 = vmatpush3.msra.mxu0 %v6499_v26  ;;  %8128 = vmatpush3.msra.mxu1 %v6531_v27 }
 0xf1b   : > { %8091 = vmatprep.subr.mxu0 %v6514_v29  ;;  %8129 = vmatprep.subr.mxu1 %v6546_v30 }
 0xf1c   : > { %8092 = vmatpush3.msra.mxu0 %v6498_v31  ;;  %8130 = vmatpush3.msra.mxu1 %v6530_v18 }
 0xf1d   : > { %8093 = vmatprep.subr.mxu0 %v6513_v50  ;;  %8131 = vmatprep.subr.mxu1 %v6545_v41 }
 0xf1e   : > { %8094 = vmatpush3.msra.mxu0 %v6497_v33  ;;  %8132 = vmatpush3.msra.mxu1 %v6529_v34 }
 0xf1f   : > { %8095 = vmatprep.subr.mxu0 %v6512_v55  ;;  %8133 = vmatprep.subr.mxu1 %v6544_v58 }
 0xf20   : > { %8096 = vmatpush3.msra.mxu0 %v6496_v61  ;;  %8134 = vmatpush3.msra.mxu1 %v6528_v46 }
 0xf21   : > { %8097 = vmatprep.subr.mxu0 %v6511_v48  ;;  %8135 = vmatprep.subr.mxu1 %v6543_v15 }
 0xf22   : > { %8098 = vmatpush3.msra.mxu0 %v6495_v49  ;;  %8136 = vmatpush3.msra.mxu1 %v6527_v53 }
 0xf23   : > { %8099 = vmatprep.subr.mxu0 %v6510_v32  ;;  %8137 = vmatprep.subr.mxu1 %v6542_v54 }
 0xf24   : > { %8100 = vmatpush3.msra.mxu0 %v6494_v20  ;;  %8138 = vmatpush3.msra.mxu1 %v6526_v56 }
 0xf25   : > { %8101 = vmatprep.subr.mxu0 %v6509_v51  ;;  %8139 = vmatprep.subr.mxu1 %v6541_v52 }
 0xf26   : > { %8102 = vmatpush3.msra.mxu0 %v6493_v57  ;;  %8140 = vmatpush3.msra.mxu1 %v6525_v59 }
 0xf27   : > { %8103 = vmatprep.subr.mxu0 %v6508_v62  ;;  %8141 = vmatprep.subr.mxu1 %v6540_v2 }
 0xf28   : > { %8104 = vmatpush3.msra.mxu0 %v6492_v63  ;;  %8142 = vmatpush3.msra.mxu1 %v6524_v0 }
 0xf29   : > { %7071 = vmatmul.mubr.f32.vlgmr.msra.gmra.mxu0 %v6280_v28  ;;  %7146 = vmatmul.mubr.f32.vlgmr.msra.gmra.mxu1 %v6282_v9 }
 0xf2a   : > { %7075 = vmatprep.mubr.f32.mxu0 %v6297_v39  ;;  %7150 = vmatprep.mubr.f32.mxu1 %v6299_v43  ;;  %v7704_v43 = vld [vmem:[%s1379_s2] ss:$0 sm:$0xff]  ;;  %s8638_s2 = smov [#allocation3]  }
 0xf2b   : > { %s7235_s27 = sshll.u32 %s8638_s2, 4  ;;  %s7236_s27 = int_to_ptr.vmem [resolvable:$true] %s7235_s27 }
 0xf2c   : > { %s8565_s28 = scalar_lea.vmem %s7236_s27, 256  ;;  %p8572_p9 = scmp.lt.s32.totalorder %s7236_s27, %s7236_s27 }
 0xf2d   : > { %7076 = vmatmul.mubr.f32.gmra.mxu0 %v6296_v4  ;;  %7151 = vmatmul.mubr.f32.gmra.mxu1 %v6298_v5  ;;  %p8566_p6 = scmp.ne.s32.totalorder %s7236_s27, %s8565_s28  ;;  %p8573_p10 = scmp.lt.s32.totalorder %s8565_s28, %s8565_s28 }
 0xf2f   : > { %p8567_p7 = pnand %p8566_p6, %p8419_p5  ;;  %p8574_p11 = por %p8573_p10, %p8572_p9 }
 0xf31   : > { %p8568_p8 = pneg %p8567_p7 }
 0xf33   : > { %p8575_p12 = pnand %p8574_p11, %p8568_p8 }
 0xf7e   : > { %v7877_v7 = vpop.f32.mrf.mxu0  ;;  %v7915_v8 = vpop.f32.mrf.mxu1 }
 0xf80   : > { %v7878_v10 = vpop.f32.mrf.mxu0  ;;  %v7916_v35 = vpop.f32.mrf.mxu1 }
 0xf81   : > { %v7879_v29 = vadd.f32 %v7878_v10, %v7877_v7  ;;  %v7917_v30 = vadd.f32 %v7916_v35, %v7915_v8 }
 0xf83   : > { %v6698_v41 = vadd.f32 %v7917_v30, %v7879_v29 }
 0xf84   : > { %v7880_v11 = vpop.f32.mrf.mxu0  ;;  %v7918_v36 = vpop.f32.mrf.mxu1 }
 0xf86   : > { %v7881_v12 = vpop.f32.mrf.mxu0  ;;  %v7919_v16 = vpop.f32.mrf.mxu1 }
 0xf87   : > { %v7882_v33 = vadd.f32 %v7881_v12, %v7880_v11  ;;  %v7920_v34 = vadd.f32 %v7919_v16, %v7918_v36 }
 0xf89   : > { %v6703_v61 = vadd.f32 %v7920_v34, %v7882_v33 }
 0xfa1   : > { %v7953_v17 = vpop.f32.mrf.mxu0  ;;  %v7991_v21 = vpop.f32.mrf.mxu1 }
 0xfa3   : > { %v7954_v37 = vpop.f32.mrf.mxu0  ;;  %v7992_v38 = vpop.f32.mrf.mxu1 }
 0xfa4   : > { %v7955_v18 = vadd.f32 %v7954_v37, %v7953_v17  ;;  %v7993_v46 = vadd.f32 %v7992_v38, %v7991_v21 }
 0xfa6   : > { %v6773_v58 = vadd.f32 %v7955_v18, %v6698_v41 }
 0xfa7   : > { %v7956_v22 = vpop.f32.mrf.mxu0  ;;  %v7994_v23 = vpop.f32.mrf.mxu1 }
 0xfa8   : > { %v6848_v49 = vadd.f32 %v7993_v46, %v6773_v58  ;;  %v7705_v46 = vld [vmem:[%s9964_s3] ss:$0 sm:$0xff] }
 0xfa9   : > { %v7957_v24 = vpop.f32.mrf.mxu0  ;;  %v7995_v25 = vpop.f32.mrf.mxu1 }
 0xfaa   : > { %v7958_v42 = vadd.f32 %v7957_v24, %v7956_v22  ;;  %v7996_v54 = vadd.f32 %v7995_v25, %v7994_v23 }
 0xfac   : > { %v6778_v53 = vadd.f32 %v7958_v42, %v6703_v61 }
 0xfae   : > { %v6853_v51 = vadd.f32 %v7996_v54, %v6778_v53 }
 0xfc5   : > { %v8029_v26 = vpop.f32.mrf.mxu0  ;;  %v8067_v27 = vpop.f32.mrf.mxu1 }
 0xfc7   : > { %v8030_v31 = vpop.f32.mrf.mxu0  ;;  %v8068_v50 = vpop.f32.mrf.mxu1 }
 0xfc8   : > { %v8031_v48 = vadd.f32 %v8030_v31, %v8029_v26  ;;  %v8069_v52 = vadd.f32 %v8068_v50, %v8067_v27 }
 0xfca   : > { %v6923_v3 = vadd.f32 %v8031_v48, %v6848_v49  ;;  %v7706_v49 = vld [vmem:[%s9965_s0] ss:$0 sm:$0xff] }
 0xfcb   : > { %v8032_v55 = vpop.f32.mrf.mxu0  ;;  %v8070_v44 = vpop.f32.mrf.mxu1 }
 0xfcc   : > { %v6998_v57 = vadd.f32 %v8069_v52, %v6923_v3 }
 0xfcd   : > { %v8033_v15 = vpop.f32.mrf.mxu0  ;;  %v8071_v32 = vpop.f32.mrf.mxu1 }
 0xfce   : > { %v8034_v19 = vadd.f32 %v8033_v15, %v8032_v55  ;;  %v8072_v2 = vadd.f32 %v8071_v32, %v8070_v44 }
 0xfd0   : > { %v6928_v59 = vadd.f32 %v8034_v19, %v6853_v51 }
 0xfd2   : > { %v7003_v6 = vadd.f32 %v8072_v2, %v6928_v59 }
 0xfe9   : > { %v8105_v20 = vpop.f32.mrf.mxu0  ;;  %v8143_v56 = vpop.f32.mrf.mxu1 }
 0xfeb   : > { %v8106_v13 = vpop.f32.mrf.mxu0  ;;  %v8144_v14 = vpop.f32.mrf.mxu1 }
 0xfec   : > { %v8107_v40 = vadd.f32 %v8106_v13, %v8105_v20  ;;  %v8145_v0 = vadd.f32 %v8144_v14, %v8143_v56 }
 0xfed   : > { %v8108_v60 = vpop.f32.mrf.mxu0  ;;  %v8146_v62 = vpop.f32.mrf.mxu1 }
 0xfee   : > { %v7073_v63 = vadd.f32 %v8107_v40, %v6998_v57 }
 0xfef   : > { %v8109_v28 = vpop.f32.mrf.mxu0  ;;  %v8147_v9 = vpop.f32.mrf.mxu1 }
 0xff0   : > { %v7148_v1 = vadd.f32 %v8145_v0, %v7073_v63  ;;  %v8110_v39 = vadd.f32 %v8109_v28, %v8108_v60  ;;  %v8148_v7 = vadd.f32 %v8147_v9, %v8146_v62 }
 0xff2   : > { %v7156_v4 = vadd.f32 %v7148_v1, %v9320_v47  ;;  %v7078_v5 = vadd.f32 %v8110_v39, %v7003_v6 }
 0xff4   : > { %v7153_v8 = vadd.f32 %v8148_v7, %v7078_v5  ;;  %v7165_v10 = vadd.f32 %v7704_v43, %v7156_v4 }
 0xff6   : > { %v7157_v35 = vadd.f32 %v7153_v8, %v9315_v45  ;;  %v7171_v11 = vsel %vm1393_vm1, %v7165_v10, 0.0  ;;  %7167 = vst.msk [vmem:[#allocation2] sm:$0xff] %vm1393_vm1, %v7165_v10 }
 0xff7   : > { %7172 = vadd.xlane.f32.xlu0 %v7171_v11 }
 0xff8   : > { %v7166_v36 = vadd.f32 %v7704_v43, %v7157_v35 }
 0xffa   : > { %v7174_v12 = vsel %vm1393_vm1, %v7166_v36, 0.0  ;;  %7168 = vst.msk [vmem:[#allocation2 + $0x8] sm:$0xff] %vm1393_vm1, %v7166_v36 }
 0xffb   : > { %7175 = vadd.xlane.f32.xlu1 %v7174_v12 }
0x1080   : > { %v7173_v16 = vpop.xlane.xlu0 %7172 }
0x1081   : > { %v7177_v17 = vmul.f32 0.03125, %v7173_v16 }
0x1083   : > { %v7179_v47 = vsub.f32 %v7165_v10, %v7177_v17 }
0x1084   : > { %v7176_v21 = vpop.xlane.xlu1 %7175 }
0x1085   : > { %v7178_v37 = vmul.f32 0.03125, %v7176_v21  ;;  %v7181_v38 = vmul.f32 %v7179_v47, %v7179_v47  ;;  %v7215_v48 = vmul.f32 %v7705_v46, %v7179_v47 }
0x1087   : > { %v7180_v22 = vsub.f32 %v7166_v36, %v7178_v37  ;;  %v7183_v45 = vsel %vm1393_vm1, %v7181_v38, 0.0 }
0x1088   : > { %7184 = vadd.xlane.f32.xlu0 %v7183_v45 }
0x1089   : > { %v7182_v23 = vmul.f32 %v7180_v22, %v7180_v22  ;;  %v7216_v32 = vmul.f32 %v7705_v46, %v7180_v22 }
0x108b   : > { %v7186_v24 = vsel %vm1393_vm1, %v7182_v23, 0.0 }
0x108c   : > { %7187 = vadd.xlane.f32.xlu1 %v7186_v24 }
0x1111   : > { %v7185_v25 = vpop.xlane.xlu0 %7184 }
0x1112   : > { %v7189_v26 = vmul.f32 0.032258064, %v7185_v25 }
0x1114   : > { %8557 = vrsqrt.f32 %v7189_v26  ;;  %vm7193_vm0 = vcmp.eq.f32.partialorder %v7189_v26, inf  ;;  %v7196_v18 = vand.u32 2147483648, %v7189_v26  ;;  %vm7195_vm2 = vcmp.eq.f32.partialorder %v7189_v26, 0.0 }
0x1115   : > { %v7188_v27 = vpop.xlane.xlu1 %7187 }
0x1116   : > { %v7190_v29 = vmul.f32 0.032258064, %v7188_v27 }
0x1118   : > { %8559 = vrsqrt.f32 %v7190_v29  ;;  %vm7200_vm3 = vcmp.eq.f32.partialorder %v7190_v29, inf  ;;  %v7203_v58 = vand.u32 2147483648, %v7190_v29  ;;  %vm7202_vm4 = vcmp.eq.f32.partialorder %v7190_v29, 0.0 }
0x1121   : > { %v8558_v30 = vpop.eup %8557 }
0x1122   : > { %v7192_v31 = vmul.f32 %v8558_v30, %v7189_v26 }
0x1124   : > { %v7194_v50 = vsel %vm7193_vm0, %v7189_v26, %v7192_v31 }
0x1125   : > { %v8560_v41 = vpop.eup %8559  ;;  %v7197_v33 = vsel %vm7195_vm2, %v7196_v18, %v7194_v50 }
0x1126   : > { %v7205_v34 = vadd.f32 1e-06, %v7197_v33  ;;  %v7199_v55 = vmul.f32 %v8560_v41, %v7190_v29 }
0x1128   : > { %8561 = vrcp.f32 %v7205_v34  ;;  %v7201_v42 = vsel %vm7200_vm3, %v7190_v29, %v7199_v55 }
0x1129   : > { %v7204_v44 = vsel %vm7202_vm4, %v7203_v58, %v7201_v42 }
0x112a   : > { %v7206_v61 = vadd.f32 1e-06, %v7204_v44 }
0x112c   : > { %8563 = vrcp.f32 %v7206_v61 }
0x1135   : > { %v8562_v15 = vpop.eup %8561 }
0x1136   : > { %v7217_v53 = vmul.f32 %v8562_v15, %v7215_v48 }
0x1138   : > { %v7225_v54 = vadd.f32 %v7706_v49, %v7217_v53 }
0x1139   : > { %v8564_v3 = vpop.eup %8563 }
0x113a   : > { %v7218_v19 = vmul.f32 %v8564_v3, %v7216_v32  ;;  %7227 = vst.msk [vmem:[#allocation3] sm:$0xff] %vm1393_vm1, %v7225_v54 }
0x113c   : > { %v7226_v20 = vadd.f32 %v7706_v49, %v7218_v19 }
0x113e   : > { %7228 = vst.msk [vmem:[#allocation3 + $0x8] sm:$0xff] %vm1393_vm1, %v7226_v20 }
0x113f   : > { %8578 = shalt.err (!%p8575_p12)
}
0x1140   : > { %s8639_s1 = smov 128   ;;  %s9967_s7 = sld [smem:[#allocation37_spill]] }
0x1141   : > { %s8640_s11 = smov 8  }
0x1146   : > { %8416 = dma.vmem_to_hbm [thread:$0]  (%p8419_p5), %s7236_s27, 256, %s9967_s7, [#allocation4], %s8639_s1, %s8639_s1, %s8640_s11  }
0x1147   : > { %8594 = dma.done.wait (%p8419_p5), [#allocation4], 256  }
0x1148   : > { %8596 = vsyncadd (%p8419_p5), [#allocation4], 4294967040 }
0x1149 PF: > { %s9968_s18 = sld [smem:[#allocation38_spill]] }
0x114f   : > { %s76_s28 = sadd.s32 1, %s9968_s18  }
0x1150   : > { %p73_p13 = scmp.ge.s32.totalorder %s76_s28, 4  }
0x1152   :  { %75 = sbr.rel (!%p73_p13) target bundleno = 76 (0x4c), region = 286 }
0x1157   :  { %7251 = vsyncpa [#allocation4], 1 }
0x1158   :  { %7253 = vsyncpa [#allocation4 + $0x1], 1 }

</bundles_post_ra>
